<compile_context>
chip_gen: v6e
topology: v6e:2x2x1
jax: 0.10.0
libtpu: 0.0.40
codegen_flags: <defaults>
</compile_context>

<pallas_src>
import jax
import jax.numpy as jnp
from jax import lax
from jax.experimental import pallas as pl
from jax.experimental.pallas import tpu as pltpu

BN_EPS = 1e-5
F32 = jnp.float32
BF16 = jnp.bfloat16


# ----------------------------------------------------------------------------
# Fused Pallas kernel: the whole Model_2 forward for one batch element.
# ----------------------------------------------------------------------------
def _model2_kernel(x_ref,
                   w1_ref, s1_ref, b1_ref,
                   w2_ref, s2_ref, b2_ref, w3_ref,
                   w4_ref, s4_ref, b4_ref,
                   w5_ref, s5_ref, b5_ref,
                   w6_ref, s6_ref, b6_ref,
                   w7_ref, w8_ref,
                   out_ref,
                   a1, a2, a3, a4, a5, a6):
  # ---- convblock1: 3x3 conv 1->16 (Cin==1 -> cheap VPU broadcast-MAC),
  #      ReLU, folded BN.  Output (26, 26, 16) -> a1 (bf16). -------------------
  w1_taps = [w1_ref[pl.ds(t, 1), :].astype(F32) for t in range(9)]   # (1, 16)
  s1 = s1_ref[...]
  b1 = b1_ref[...]

  def conv1_row(h, carry):
    acc = jnp.zeros((26, 16), F32)
    for dh in range(3):
      for dw in range(3):
        col = x_ref[h + dh, pl.ds(dw, 26), :].astype(F32)            # (26, 1)
        acc = acc + col * w1_taps[dh * 3 + dw]                       # (26, 16)
    acc = jnp.maximum(acc, 0.0) * s1 + b1
    a1[h] = acc.astype(a1.dtype)
    return carry

  lax.fori_loop(0, 26, conv1_row, 0)

  # ---- generic 3x3 conv block: per-output-row im2col dots on the MXU. -------
  def conv3x3(src, w_im2col_ref, scale_ref, shift_ref, dst, post_w_ref=None):
    ho, wo, _ = dst.shape
    cin = src.shape[-1]
    w_taps = [w_im2col_ref[pl.ds(t * cin, cin), :] for t in range(9)]  # bf16
    sc = scale_ref[...]                                                # (1, c)
    sh = shift_ref[...]
    wp = None if post_w_ref is None else post_w_ref[...]               # bf16

    def row(h, carry):
      acc = jnp.zeros((wo, w_taps[0].shape[1]), F32)
      for dh in range(3):
        for dw in range(3):
          lhs = src[h + dh, pl.ds(dw, wo), :]                          # (wo, cin)
          acc = acc + jnp.dot(lhs, w_taps[dh * 3 + dw],
                              preferred_element_type=F32)
      acc = jnp.maximum(acc, 0.0) * sc + sh                            # ReLU + BN
      if wp is not None:                                               # fused 1x1
        acc = jnp.dot(acc.astype(BF16), wp, preferred_element_type=F32)
      dst[h] = acc.astype(dst.dtype)
      return carry

    lax.fori_loop(0, ho, row, 0)

  # convblock2 (3x3, 16->8, ReLU, BN) fused with convblock3 (1x1, 8->16).
  conv3x3(a1, w2_ref, s2_ref, b2_ref, a2, post_w_ref=w3_ref)

  # ---- 2x2 max pool, stride 2: row pairs via leading-dim reads, column pairs
  #      via exact 0/1 selection matmuls (exact: activations already bf16). ---
  rows_i = lax.broadcasted_iota(jnp.int32, (12, 24), 0)
  cols_i = lax.broadcasted_iota(jnp.int32, (12, 24), 1)
  p_even = (cols_i == 2 * rows_i).astype(BF16)                         # (12, 24)
  p_odd = (cols_i == 2 * rows_i + 1).astype(BF16)
  for h in range(12):
    m = jnp.maximum(a2[2 * h], a2[2 * h + 1])                          # (24, 16)
    me = jnp.dot(p_even, m, preferred_element_type=F32)                # m[2w]
    mo = jnp.dot(p_odd, m, preferred_element_type=F32)                 # m[2w+1]
    a3[h] = jnp.maximum(me, mo).astype(a3.dtype)

  # convblocks 4..6 (3x3, 16->16, ReLU, BN).
  conv3x3(a3, w4_ref, s4_ref, b4_ref, a4)
  conv3x3(a4, w5_ref, s5_ref, b5_ref, a5)
  conv3x3(a5, w6_ref, s6_ref, b6_ref, a6)

  # ---- GAP(6x6) -> 1x1 conv (16->16) -> 1x1 conv (16->10) -> log_softmax. ---
  s = a6[0] + a6[1] + a6[2] + a6[3] + a6[4] + a6[5]                    # (6, 16)
  g = jnp.sum(s, axis=0, keepdims=True) * (1.0 / 36.0)                 # (1, 16)
  h7 = jnp.dot(g.astype(BF16), w7_ref[...], preferred_element_type=F32)
  y = jnp.dot(h7.astype(BF16), w8_ref[...], preferred_element_type=F32)
  ymax = jnp.max(y, axis=-1, keepdims=True)
  lse = ymax + jnp.log(jnp.sum(jnp.exp(y - ymax), axis=-1, keepdims=True))
  out_ref[...] = (y - lse).astype(out_ref.dtype)


# ----------------------------------------------------------------------------
# Wrapper: one pallas_call, grid over batch, weights in im2col/bf16 layout.
# ----------------------------------------------------------------------------
def _const_spec(arr):
  assert arr.ndim == 2
  return pl.BlockSpec(arr.shape, lambda b: (0, 0))


def model2_forward(x_nchw, p):
  B = x_nchw.shape[0]
  # Cin == 1 -> NCHW to NHWC is a pure reshape (no transpose, no extra pass).
  x = x_nchw.reshape(B, 28, 28, 1).astype(BF16)

  im2col = lambda w: w.reshape(-1, w.shape[-1]).astype(BF16)  # (KH*KW*Cin, Co)
  w1 = im2col(p["w1"])   # (9, 16)
  w2 = im2col(p["w2"])   # (144, 8)
  w3 = im2col(p["w3"])   # (8, 16)
  w4 = im2col(p["w4"])   # (144, 16)
  w5 = im2col(p["w5"])   # (144, 16)
  w6 = im2col(p["w6"])   # (144, 16)
  w7 = p["w7"].astype(BF16)   # (16, 16)
  w8 = p["w8"].astype(BF16)   # (16, 10)

  operands = (x,
              w1, p["s1"], p["b1"],
              w2, p["s2"], p["b2"], w3,
              w4, p["s4"], p["b4"],
              w5, p["s5"], p["b5"],
              w6, p["s6"], p["b6"],
              w7, w8)

  in_specs = [pl.BlockSpec((None, 28, 28, 1), lambda b: (b, 0, 0, 0))]
  in_specs += [_const_spec(a) for a in operands[1:]]

  out = pl.pallas_call(
      _model2_kernel,
      out_shape=jax.ShapeDtypeStruct((B, 1, 10), F32),
      grid=(B,),
      in_specs=in_specs,
      out_specs=pl.BlockSpec((None, 1, 10), lambda b: (b, 0, 0)),
      scratch_shapes=[
          pltpu.VMEM((26, 26, 16), BF16),   # convblock1 output
          pltpu.VMEM((24, 24, 16), BF16),   # convblock2+3 output
          pltpu.VMEM((12, 12, 16), BF16),   # maxpool output
          pltpu.VMEM((10, 10, 16), BF16),   # convblock4 output
          pltpu.VMEM((8, 8, 16), BF16),     # convblock5 output
          pltpu.VMEM((6, 6, 16), F32),      # convblock6 output (GAP input)
      ],
      compiler_params=pltpu.CompilerParams(
          dimension_semantics=("parallel",)),
  )(*operands)
  return out.reshape(B, 10)


# ----------------------------------------------------------------------------
# Parameters (deterministic synthetic init, folded eval-mode BatchNorm).
# ----------------------------------------------------------------------------
def _bn_fold(key, c):
  kg, kb, km, kv = jax.random.split(key, 4)
  gamma = 1.0 + 0.1 * jax.random.normal(kg, (c,), F32)
  beta = 0.1 * jax.random.normal(kb, (c,), F32)
  mean = 0.1 * jax.random.normal(km, (c,), F32)
  var = 1.0 + 0.1 * jnp.abs(jax.random.normal(kv, (c,), F32))
  scale = gamma / jnp.sqrt(var + BN_EPS)
  shift = beta - mean * scale
  return scale.reshape(1, c), shift.reshape(1, c)


def init_params(key):
  ks = jax.random.split(key, 13)
  cw = lambda k, kh, kw, ci, co: 0.2 * jax.random.normal(k, (kh, kw, ci, co),
                                                         F32)
  p = {}
  p["w1"] = cw(ks[0], 3, 3, 1, 16)
  p["w2"] = cw(ks[1], 3, 3, 16, 8)
  p["w3"] = cw(ks[2], 1, 1, 8, 16)
  p["w4"] = cw(ks[3], 3, 3, 16, 16)
  p["w5"] = cw(ks[4], 3, 3, 16, 16)
  p["w6"] = cw(ks[5], 3, 3, 16, 16)
  p["w7"] = 0.2 * jax.random.normal(ks[6], (16, 16), F32)   # 1x1 conv (GAP head)
  p["w8"] = 0.2 * jax.random.normal(ks[7], (16, 10), F32)   # 1x1 conv (GAP head)
  p["s1"], p["b1"] = _bn_fold(ks[8], 16)
  p["s2"], p["b2"] = _bn_fold(ks[9], 8)
  p["s4"], p["b4"] = _bn_fold(ks[10], 16)
  p["s5"], p["b5"] = _bn_fold(ks[11], 16)
  p["s6"], p["b6"] = _bn_fold(ks[12], 16)
  return p


# ----------------------------------------------------------------------------
# Pure-JAX/XLA reference using the same TPU numerics convention as the kernel
# (bf16 matmul/conv inputs, f32 accumulation, f32 element-wise math).
# ----------------------------------------------------------------------------
def reference_forward(x_nchw, p):
  B = x_nchw.shape[0]
  x = x_nchw.reshape(B, 28, 28, 1)
  conv = lambda x, w: lax.conv_general_dilated(
      x.astype(BF16), w.astype(BF16), (1, 1), "VALID",
      dimension_numbers=("NHWC", "HWIO", "NHWC"),
      preferred_element_type=F32)
  bn = lambda x, s, b: x * s[0] + b[0]
  x = bn(jax.nn.relu(conv(x, p["w1"])), p["s1"], p["b1"])
  x = bn(jax.nn.relu(conv(x, p["w2"])), p["s2"], p["b2"])
  x = conv(x, p["w3"])
  x = lax.reduce_window(x, -jnp.inf, lax.max, (1, 2, 2, 1), (1, 2, 2, 1),
                        "VALID")
  x = bn(jax.nn.relu(conv(x, p["w4"])), p["s4"], p["b4"])
  x = bn(jax.nn.relu(conv(x, p["w5"])), p["s5"], p["b5"])
  x = bn(jax.nn.relu(conv(x, p["w6"])), p["s6"], p["b6"])
  g = jnp.mean(x, axis=(1, 2))                                   # (B, 16)
  h = jnp.dot(g.astype(BF16), p["w7"].astype(BF16), preferred_element_type=F32)
  y = jnp.dot(h.astype(BF16), p["w8"].astype(BF16), preferred_element_type=F32)
  return jax.nn.log_softmax(y, axis=-1)


if __name__ == "__main__":
  key = jax.random.PRNGKey(0)
  kx, kp = jax.random.split(key)
  # Input shape implied by the module: 1 channel, 28x28 (GAP(6) sees 6x6).
  x = jax.random.normal(kx, (2, 1, 28, 28), F32)
  params = init_params(kp)

  out = jax.jit(model2_forward)(x, params)
  out = jax.block_until_ready(out)
  assert out.shape == (2, 10)

  ref = jax.block_until_ready(jax.jit(reference_forward)(x, params))
  # Kernel and reference share the same bf16-input / f32-accumulate numerics,
  # so typical max|diff| is ~1e-4; 5e-3 leaves margin for rare bf16 ties.
  if not bool(jnp.allclose(out, ref, atol=5e-3, rtol=5e-3)):
    max_err = float(jnp.max(jnp.abs(out - ref)))
    raise AssertionError(
        f"Pallas output does not match JAX reference (max abs err={max_err:.3e})")

  print("KERNEL_OK")
</pallas_src>

<mosaic_0001>
module attributes {stable_mosaic.version = 11 : i64} {
  func.func @_model2_kernel(%arg0: i32, %arg1: memref<1x28x28x1xbf16, #tpu.memory_space<vmem>>, %arg2: memref<9x16xbf16, #tpu.memory_space<vmem>>, %arg3: memref<1x16xf32, #tpu.memory_space<vmem>>, %arg4: memref<1x16xf32, #tpu.memory_space<vmem>>, %arg5: memref<144x8xbf16, #tpu.memory_space<vmem>>, %arg6: memref<1x8xf32, #tpu.memory_space<vmem>>, %arg7: memref<1x8xf32, #tpu.memory_space<vmem>>, %arg8: memref<8x16xbf16, #tpu.memory_space<vmem>>, %arg9: memref<144x16xbf16, #tpu.memory_space<vmem>>, %arg10: memref<1x16xf32, #tpu.memory_space<vmem>>, %arg11: memref<1x16xf32, #tpu.memory_space<vmem>>, %arg12: memref<144x16xbf16, #tpu.memory_space<vmem>>, %arg13: memref<1x16xf32, #tpu.memory_space<vmem>>, %arg14: memref<1x16xf32, #tpu.memory_space<vmem>>, %arg15: memref<144x16xbf16, #tpu.memory_space<vmem>>, %arg16: memref<1x16xf32, #tpu.memory_space<vmem>>, %arg17: memref<1x16xf32, #tpu.memory_space<vmem>>, %arg18: memref<16x16xbf16, #tpu.memory_space<vmem>>, %arg19: memref<16x10xbf16, #tpu.memory_space<vmem>>, %arg20: memref<1x1x10xf32, #tpu.memory_space<vmem>>, %arg21: memref<26x26x16xbf16, #tpu.memory_space<vmem>>, %arg22: memref<24x24x16xbf16, #tpu.memory_space<vmem>>, %arg23: memref<12x12x16xbf16, #tpu.memory_space<vmem>>, %arg24: memref<10x10x16xbf16, #tpu.memory_space<vmem>>, %arg25: memref<8x8x16xbf16, #tpu.memory_space<vmem>>, %arg26: memref<6x6x16xf32, #tpu.memory_space<vmem>>) attributes {dimension_semantics = [#tpu.dimension_semantics<parallel>], iteration_bounds = array<i64: 2>, scalar_prefetch = 0 : i64, scratch_operands = 6 : i64, tpu.core_type = #tpu.core_type<tc>, window_params = [{transform_indices = @transform_0, window_bounds = array<i64: 1, 28, 28, 1>}, {pipeline_mode = #tpu.pipeline_mode<synchronous>, transform_indices = @transform_1, window_bounds = array<i64: 9, 16>}, {pipeline_mode = #tpu.pipeline_mode<synchronous>, transform_indices = @transform_2, window_bounds = array<i64: 1, 16>}, {pipeline_mode = #tpu.pipeline_mode<synchronous>, transform_indices = @transform_3, window_bounds = array<i64: 1, 16>}, {pipeline_mode = #tpu.pipeline_mode<synchronous>, transform_indices = @transform_4, window_bounds = array<i64: 144, 8>}, {pipeline_mode = #tpu.pipeline_mode<synchronous>, transform_indices = @transform_5, window_bounds = array<i64: 1, 8>}, {pipeline_mode = #tpu.pipeline_mode<synchronous>, transform_indices = @transform_6, window_bounds = array<i64: 1, 8>}, {pipeline_mode = #tpu.pipeline_mode<synchronous>, transform_indices = @transform_7, window_bounds = array<i64: 8, 16>}, {pipeline_mode = #tpu.pipeline_mode<synchronous>, transform_indices = @transform_8, window_bounds = array<i64: 144, 16>}, {pipeline_mode = #tpu.pipeline_mode<synchronous>, transform_indices = @transform_9, window_bounds = array<i64: 1, 16>}, {pipeline_mode = #tpu.pipeline_mode<synchronous>, transform_indices = @transform_10, window_bounds = array<i64: 1, 16>}, {pipeline_mode = #tpu.pipeline_mode<synchronous>, transform_indices = @transform_11, window_bounds = array<i64: 144, 16>}, {pipeline_mode = #tpu.pipeline_mode<synchronous>, transform_indices = @transform_12, window_bounds = array<i64: 1, 16>}, {pipeline_mode = #tpu.pipeline_mode<synchronous>, transform_indices = @transform_13, window_bounds = array<i64: 1, 16>}, {pipeline_mode = #tpu.pipeline_mode<synchronous>, transform_indices = @transform_14, window_bounds = array<i64: 144, 16>}, {pipeline_mode = #tpu.pipeline_mode<synchronous>, transform_indices = @transform_15, window_bounds = array<i64: 1, 16>}, {pipeline_mode = #tpu.pipeline_mode<synchronous>, transform_indices = @transform_16, window_bounds = array<i64: 1, 16>}, {pipeline_mode = #tpu.pipeline_mode<synchronous>, transform_indices = @transform_17, window_bounds = array<i64: 16, 16>}, {pipeline_mode = #tpu.pipeline_mode<synchronous>, transform_indices = @transform_18, window_bounds = array<i64: 16, 10>}, {transform_indices = @transform_19, window_bounds = array<i64: 1, 1, 10>}]} {
    %c0 = arith.constant 0 : index
    %c0_0 = arith.constant 0 : index
    %0 = vector.load %arg2[%c0, %c0_0] : memref<9x16xbf16, #tpu.memory_space<vmem>>, vector<1x16xbf16>
    %1 = arith.extf %0 : vector<1x16xbf16> to vector<1x16xf32>
    %c1 = arith.constant 1 : index
    %c0_1 = arith.constant 0 : index
    %2 = vector.load %arg2[%c1, %c0_1] : memref<9x16xbf16, #tpu.memory_space<vmem>>, vector<1x16xbf16>
    %3 = arith.extf %2 : vector<1x16xbf16> to vector<1x16xf32>
    %c2 = arith.constant 2 : index
    %c0_2 = arith.constant 0 : index
    %4 = vector.load %arg2[%c2, %c0_2] : memref<9x16xbf16, #tpu.memory_space<vmem>>, vector<1x16xbf16>
    %5 = arith.extf %4 : vector<1x16xbf16> to vector<1x16xf32>
    %c3 = arith.constant 3 : index
    %c0_3 = arith.constant 0 : index
    %6 = vector.load %arg2[%c3, %c0_3] : memref<9x16xbf16, #tpu.memory_space<vmem>>, vector<1x16xbf16>
    %7 = arith.extf %6 : vector<1x16xbf16> to vector<1x16xf32>
    %c4 = arith.constant 4 : index
    %c0_4 = arith.constant 0 : index
    %8 = vector.load %arg2[%c4, %c0_4] : memref<9x16xbf16, #tpu.memory_space<vmem>>, vector<1x16xbf16>
    %9 = arith.extf %8 : vector<1x16xbf16> to vector<1x16xf32>
    %c5 = arith.constant 5 : index
    %c0_5 = arith.constant 0 : index
    %10 = vector.load %arg2[%c5, %c0_5] : memref<9x16xbf16, #tpu.memory_space<vmem>>, vector<1x16xbf16>
    %11 = arith.extf %10 : vector<1x16xbf16> to vector<1x16xf32>
    %c6 = arith.constant 6 : index
    %c0_6 = arith.constant 0 : index
    %12 = vector.load %arg2[%c6, %c0_6] : memref<9x16xbf16, #tpu.memory_space<vmem>>, vector<1x16xbf16>
    %13 = arith.extf %12 : vector<1x16xbf16> to vector<1x16xf32>
    %c7 = arith.constant 7 : index
    %c0_7 = arith.constant 0 : index
    %14 = vector.load %arg2[%c7, %c0_7] : memref<9x16xbf16, #tpu.memory_space<vmem>>, vector<1x16xbf16>
    %15 = arith.extf %14 : vector<1x16xbf16> to vector<1x16xf32>
    %c8 = arith.constant 8 : index
    %c0_8 = arith.constant 0 : index
    %16 = vector.load %arg2[%c8, %c0_8] : memref<9x16xbf16, #tpu.memory_space<vmem>>, vector<1x16xbf16>
    %17 = arith.extf %16 : vector<1x16xbf16> to vector<1x16xf32>
    %c0_9 = arith.constant 0 : index
    %c0_10 = arith.constant 0 : index
    %18 = vector.load %arg3[%c0_9, %c0_10] : memref<1x16xf32, #tpu.memory_space<vmem>>, vector<1x16xf32>
    %c0_11 = arith.constant 0 : index
    %c0_12 = arith.constant 0 : index
    %19 = vector.load %arg4[%c0_11, %c0_12] : memref<1x16xf32, #tpu.memory_space<vmem>>, vector<1x16xf32>
    %c0_i32 = arith.constant 0 : i32
    %c26_i32 = arith.constant 26 : i32
    %20 = arith.addi %c0_i32, %c26_i32 : i32
    %c1_i32 = arith.constant 1 : i32
    scf.for %arg27 = %c0_i32 to %20 step %c1_i32  : i32 {
      %cst_258 = arith.constant 0.000000e+00 : f32
      %271 = vector.broadcast %cst_258 : f32 to vector<26x16xf32>
      %c0_i32_259 = arith.constant 0 : i32
      %272 = arith.addi %arg27, %c0_i32_259 : i32
      %c0_260 = arith.constant 0 : index
      %273 = arith.index_cast %272 : i32 to index
      %c0_261 = arith.constant 0 : index
      %c0_262 = arith.constant 0 : index
      %274 = vector.load %arg1[%c0_260, %273, %c0_261, %c0_262] : memref<1x28x28x1xbf16, #tpu.memory_space<vmem>>, vector<1x1x26x1xbf16>
      %275 = vector.shape_cast %274 : vector<1x1x26x1xbf16> to vector<26x1xbf16>
      %276 = arith.extf %275 : vector<26x1xbf16> to vector<26x1xf32>
      %277 = vector.broadcast %276 : vector<26x1xf32> to vector<26x16xf32>
      %278 = vector.broadcast %1 : vector<1x16xf32> to vector<26x16xf32>
      %279 = arith.mulf %277, %278 : vector<26x16xf32>
      %280 = arith.addf %271, %279 : vector<26x16xf32>
      %c0_i32_263 = arith.constant 0 : i32
      %281 = arith.addi %arg27, %c0_i32_263 : i32
      %c0_264 = arith.constant 0 : index
      %282 = arith.index_cast %281 : i32 to index
      %c1_265 = arith.constant 1 : index
      %c0_266 = arith.constant 0 : index
      %283 = vector.load %arg1[%c0_264, %282, %c1_265, %c0_266] : memref<1x28x28x1xbf16, #tpu.memory_space<vmem>>, vector<1x1x26x1xbf16>
      %284 = vector.shape_cast %283 : vector<1x1x26x1xbf16> to vector<26x1xbf16>
      %285 = arith.extf %284 : vector<26x1xbf16> to vector<26x1xf32>
      %286 = vector.broadcast %285 : vector<26x1xf32> to vector<26x16xf32>
      %287 = vector.broadcast %3 : vector<1x16xf32> to vector<26x16xf32>
      %288 = arith.mulf %286, %287 : vector<26x16xf32>
      %289 = arith.addf %280, %288 : vector<26x16xf32>
      %c0_i32_267 = arith.constant 0 : i32
      %290 = arith.addi %arg27, %c0_i32_267 : i32
      %c0_268 = arith.constant 0 : index
      %291 = arith.index_cast %290 : i32 to index
      %c2_269 = arith.constant 2 : index
      %c0_270 = arith.constant 0 : index
      %292 = vector.load %arg1[%c0_268, %291, %c2_269, %c0_270] : memref<1x28x28x1xbf16, #tpu.memory_space<vmem>>, vector<1x1x26x1xbf16>
      %293 = vector.shape_cast %292 : vector<1x1x26x1xbf16> to vector<26x1xbf16>
      %294 = arith.extf %293 : vector<26x1xbf16> to vector<26x1xf32>
      %295 = vector.broadcast %294 : vector<26x1xf32> to vector<26x16xf32>
      %296 = vector.broadcast %5 : vector<1x16xf32> to vector<26x16xf32>
      %297 = arith.mulf %295, %296 : vector<26x16xf32>
      %298 = arith.addf %289, %297 : vector<26x16xf32>
      %c1_i32_271 = arith.constant 1 : i32
      %299 = arith.addi %arg27, %c1_i32_271 : i32
      %c0_272 = arith.constant 0 : index
      %300 = arith.index_cast %299 : i32 to index
      %c0_273 = arith.constant 0 : index
      %c0_274 = arith.constant 0 : index
      %301 = vector.load %arg1[%c0_272, %300, %c0_273, %c0_274] : memref<1x28x28x1xbf16, #tpu.memory_space<vmem>>, vector<1x1x26x1xbf16>
      %302 = vector.shape_cast %301 : vector<1x1x26x1xbf16> to vector<26x1xbf16>
      %303 = arith.extf %302 : vector<26x1xbf16> to vector<26x1xf32>
      %304 = vector.broadcast %303 : vector<26x1xf32> to vector<26x16xf32>
      %305 = vector.broadcast %7 : vector<1x16xf32> to vector<26x16xf32>
      %306 = arith.mulf %304, %305 : vector<26x16xf32>
      %307 = arith.addf %298, %306 : vector<26x16xf32>
      %c1_i32_275 = arith.constant 1 : i32
      %308 = arith.addi %arg27, %c1_i32_275 : i32
      %c0_276 = arith.constant 0 : index
      %309 = arith.index_cast %308 : i32 to index
      %c1_277 = arith.constant 1 : index
      %c0_278 = arith.constant 0 : index
      %310 = vector.load %arg1[%c0_276, %309, %c1_277, %c0_278] : memref<1x28x28x1xbf16, #tpu.memory_space<vmem>>, vector<1x1x26x1xbf16>
      %311 = vector.shape_cast %310 : vector<1x1x26x1xbf16> to vector<26x1xbf16>
      %312 = arith.extf %311 : vector<26x1xbf16> to vector<26x1xf32>
      %313 = vector.broadcast %312 : vector<26x1xf32> to vector<26x16xf32>
      %314 = vector.broadcast %9 : vector<1x16xf32> to vector<26x16xf32>
      %315 = arith.mulf %313, %314 : vector<26x16xf32>
      %316 = arith.addf %307, %315 : vector<26x16xf32>
      %c1_i32_279 = arith.constant 1 : i32
      %317 = arith.addi %arg27, %c1_i32_279 : i32
      %c0_280 = arith.constant 0 : index
      %318 = arith.index_cast %317 : i32 to index
      %c2_281 = arith.constant 2 : index
      %c0_282 = arith.constant 0 : index
      %319 = vector.load %arg1[%c0_280, %318, %c2_281, %c0_282] : memref<1x28x28x1xbf16, #tpu.memory_space<vmem>>, vector<1x1x26x1xbf16>
      %320 = vector.shape_cast %319 : vector<1x1x26x1xbf16> to vector<26x1xbf16>
      %321 = arith.extf %320 : vector<26x1xbf16> to vector<26x1xf32>
      %322 = vector.broadcast %321 : vector<26x1xf32> to vector<26x16xf32>
      %323 = vector.broadcast %11 : vector<1x16xf32> to vector<26x16xf32>
      %324 = arith.mulf %322, %323 : vector<26x16xf32>
      %325 = arith.addf %316, %324 : vector<26x16xf32>
      %c2_i32_283 = arith.constant 2 : i32
      %326 = arith.addi %arg27, %c2_i32_283 : i32
      %c0_284 = arith.constant 0 : index
      %327 = arith.index_cast %326 : i32 to index
      %c0_285 = arith.constant 0 : index
      %c0_286 = arith.constant 0 : index
      %328 = vector.load %arg1[%c0_284, %327, %c0_285, %c0_286] : memref<1x28x28x1xbf16, #tpu.memory_space<vmem>>, vector<1x1x26x1xbf16>
      %329 = vector.shape_cast %328 : vector<1x1x26x1xbf16> to vector<26x1xbf16>
      %330 = arith.extf %329 : vector<26x1xbf16> to vector<26x1xf32>
      %331 = vector.broadcast %330 : vector<26x1xf32> to vector<26x16xf32>
      %332 = vector.broadcast %13 : vector<1x16xf32> to vector<26x16xf32>
      %333 = arith.mulf %331, %332 : vector<26x16xf32>
      %334 = arith.addf %325, %333 : vector<26x16xf32>
      %c2_i32_287 = arith.constant 2 : i32
      %335 = arith.addi %arg27, %c2_i32_287 : i32
      %c0_288 = arith.constant 0 : index
      %336 = arith.index_cast %335 : i32 to index
      %c1_289 = arith.constant 1 : index
      %c0_290 = arith.constant 0 : index
      %337 = vector.load %arg1[%c0_288, %336, %c1_289, %c0_290] : memref<1x28x28x1xbf16, #tpu.memory_space<vmem>>, vector<1x1x26x1xbf16>
      %338 = vector.shape_cast %337 : vector<1x1x26x1xbf16> to vector<26x1xbf16>
      %339 = arith.extf %338 : vector<26x1xbf16> to vector<26x1xf32>
      %340 = vector.broadcast %339 : vector<26x1xf32> to vector<26x16xf32>
      %341 = vector.broadcast %15 : vector<1x16xf32> to vector<26x16xf32>
      %342 = arith.mulf %340, %341 : vector<26x16xf32>
      %343 = arith.addf %334, %342 : vector<26x16xf32>
      %c2_i32_291 = arith.constant 2 : i32
      %344 = arith.addi %arg27, %c2_i32_291 : i32
      %c0_292 = arith.constant 0 : index
      %345 = arith.index_cast %344 : i32 to index
      %c2_293 = arith.constant 2 : index
      %c0_294 = arith.constant 0 : index
      %346 = vector.load %arg1[%c0_292, %345, %c2_293, %c0_294] : memref<1x28x28x1xbf16, #tpu.memory_space<vmem>>, vector<1x1x26x1xbf16>
      %347 = vector.shape_cast %346 : vector<1x1x26x1xbf16> to vector<26x1xbf16>
      %348 = arith.extf %347 : vector<26x1xbf16> to vector<26x1xf32>
      %349 = vector.broadcast %348 : vector<26x1xf32> to vector<26x16xf32>
      %350 = vector.broadcast %17 : vector<1x16xf32> to vector<26x16xf32>
      %351 = arith.mulf %349, %350 : vector<26x16xf32>
      %352 = arith.addf %343, %351 : vector<26x16xf32>
      %cst_295 = arith.constant 0.000000e+00 : f32
      %353 = vector.broadcast %cst_295 : f32 to vector<26x16xf32>
      %354 = arith.maximumf %352, %353 : vector<26x16xf32>
      %355 = vector.broadcast %18 : vector<1x16xf32> to vector<26x16xf32>
      %356 = arith.mulf %354, %355 : vector<26x16xf32>
      %357 = vector.broadcast %19 : vector<1x16xf32> to vector<26x16xf32>
      %358 = arith.addf %356, %357 : vector<26x16xf32>
      %359 = arith.truncf %358 : vector<26x16xf32> to vector<26x16xbf16>
      %360 = arith.index_cast %arg27 : i32 to index
      %c0_296 = arith.constant 0 : index
      %c0_297 = arith.constant 0 : index
      %361 = vector.load %arg21[%360, %c0_296, %c0_297] : memref<26x26x16xbf16, #tpu.memory_space<vmem>>, vector<1x26x16xbf16>
      %362 = vector.shape_cast %361 : vector<1x26x16xbf16> to vector<26x16xbf16>
      %363 = vector.shape_cast %359 : vector<26x16xbf16> to vector<1x26x16xbf16>
      tpu.vector_store %arg21[%360, %c0_296, %c0_297], %363 {strides = array<i32>} : memref<26x26x16xbf16, #tpu.memory_space<vmem>>, vector<1x26x16xbf16>,
    }
    %c26_i32_13 = arith.constant 26 : i32
    %c0_14 = arith.constant 0 : index
    %c0_15 = arith.constant 0 : index
    %21 = vector.load %arg5[%c0_14, %c0_15] : memref<144x8xbf16, #tpu.memory_space<vmem>>, vector<16x8xbf16>
    %c16 = arith.constant 16 : index
    %c0_16 = arith.constant 0 : index
    %22 = vector.load %arg5[%c16, %c0_16] : memref<144x8xbf16, #tpu.memory_space<vmem>>, vector<16x8xbf16>
    %c32 = arith.constant 32 : index
    %c0_17 = arith.constant 0 : index
    %23 = vector.load %arg5[%c32, %c0_17] : memref<144x8xbf16, #tpu.memory_space<vmem>>, vector<16x8xbf16>
    %c48 = arith.constant 48 : index
    %c0_18 = arith.constant 0 : index
    %24 = vector.load %arg5[%c48, %c0_18] : memref<144x8xbf16, #tpu.memory_space<vmem>>, vector<16x8xbf16>
    %c64 = arith.constant 64 : index
    %c0_19 = arith.constant 0 : index
    %25 = vector.load %arg5[%c64, %c0_19] : memref<144x8xbf16, #tpu.memory_space<vmem>>, vector<16x8xbf16>
    %c80 = arith.constant 80 : index
    %c0_20 = arith.constant 0 : index
    %26 = vector.load %arg5[%c80, %c0_20] : memref<144x8xbf16, #tpu.memory_space<vmem>>, vector<16x8xbf16>
    %c96 = arith.constant 96 : index
    %c0_21 = arith.constant 0 : index
    %27 = vector.load %arg5[%c96, %c0_21] : memref<144x8xbf16, #tpu.memory_space<vmem>>, vector<16x8xbf16>
    %c112 = arith.constant 112 : index
    %c0_22 = arith.constant 0 : index
    %28 = vector.load %arg5[%c112, %c0_22] : memref<144x8xbf16, #tpu.memory_space<vmem>>, vector<16x8xbf16>
    %c128 = arith.constant 128 : index
    %c0_23 = arith.constant 0 : index
    %29 = vector.load %arg5[%c128, %c0_23] : memref<144x8xbf16, #tpu.memory_space<vmem>>, vector<16x8xbf16>
    %c0_24 = arith.constant 0 : index
    %c0_25 = arith.constant 0 : index
    %30 = vector.load %arg6[%c0_24, %c0_25] : memref<1x8xf32, #tpu.memory_space<vmem>>, vector<1x8xf32>
    %c0_26 = arith.constant 0 : index
    %c0_27 = arith.constant 0 : index
    %31 = vector.load %arg7[%c0_26, %c0_27] : memref<1x8xf32, #tpu.memory_space<vmem>>, vector<1x8xf32>
    %c0_28 = arith.constant 0 : index
    %c0_29 = arith.constant 0 : index
    %32 = vector.load %arg8[%c0_28, %c0_29] : memref<8x16xbf16, #tpu.memory_space<vmem>>, vector<8x16xbf16>
    %c0_i32_30 = arith.constant 0 : i32
    %c24_i32 = arith.constant 24 : i32
    %33 = arith.addi %c0_i32_30, %c24_i32 : i32
    %c1_i32_31 = arith.constant 1 : i32
    scf.for %arg27 = %c0_i32_30 to %33 step %c1_i32_31  : i32 {
      %cst_258 = arith.constant 0.000000e+00 : f32
      %271 = vector.broadcast %cst_258 : f32 to vector<24x8xf32>
      %c0_i32_259 = arith.constant 0 : i32
      %272 = arith.addi %arg27, %c0_i32_259 : i32
      %273 = arith.index_cast %272 : i32 to index
      %c0_260 = arith.constant 0 : index
      %c0_261 = arith.constant 0 : index
      %274 = vector.load %arg21[%273, %c0_260, %c0_261] : memref<26x26x16xbf16, #tpu.memory_space<vmem>>, vector<1x24x16xbf16>
      %275 = vector.shape_cast %274 : vector<1x24x16xbf16> to vector<24x16xbf16>
      %cst_262 = arith.constant dense<0.000000e+00> : vector<24x8xf32>
      %276 = tpu.matmul %275, %21, %cst_262 {dimension_numbers = #tpu.dot_dimension_numbers<[1], [0], [0], [1], [0, 0, 1, 1], [], []>} : vector<24x16xbf16>, vector<16x8xbf16>, vector<24x8xf32> -> vector<24x8xf32>
      %277 = arith.addf %271, %276 : vector<24x8xf32>
      %c0_i32_263 = arith.constant 0 : i32
      %278 = arith.addi %arg27, %c0_i32_263 : i32
      %279 = arith.index_cast %278 : i32 to index
      %c1_264 = arith.constant 1 : index
      %c0_265 = arith.constant 0 : index
      %280 = vector.load %arg21[%279, %c1_264, %c0_265] : memref<26x26x16xbf16, #tpu.memory_space<vmem>>, vector<1x24x16xbf16>
      %281 = vector.shape_cast %280 : vector<1x24x16xbf16> to vector<24x16xbf16>
      %cst_266 = arith.constant dense<0.000000e+00> : vector<24x8xf32>
      %282 = tpu.matmul %281, %22, %cst_266 {dimension_numbers = #tpu.dot_dimension_numbers<[1], [0], [0], [1], [0, 0, 1, 1], [], []>} : vector<24x16xbf16>, vector<16x8xbf16>, vector<24x8xf32> -> vector<24x8xf32>
      %283 = arith.addf %277, %282 : vector<24x8xf32>
      %c0_i32_267 = arith.constant 0 : i32
      %284 = arith.addi %arg27, %c0_i32_267 : i32
      %285 = arith.index_cast %284 : i32 to index
      %c2_268 = arith.constant 2 : index
      %c0_269 = arith.constant 0 : index
      %286 = vector.load %arg21[%285, %c2_268, %c0_269] : memref<26x26x16xbf16, #tpu.memory_space<vmem>>, vector<1x24x16xbf16>
      %287 = vector.shape_cast %286 : vector<1x24x16xbf16> to vector<24x16xbf16>
      %cst_270 = arith.constant dense<0.000000e+00> : vector<24x8xf32>
      %288 = tpu.matmul %287, %23, %cst_270 {dimension_numbers = #tpu.dot_dimension_numbers<[1], [0], [0], [1], [0, 0, 1, 1], [], []>} : vector<24x16xbf16>, vector<16x8xbf16>, vector<24x8xf32> -> vector<24x8xf32>
      %289 = arith.addf %283, %288 : vector<24x8xf32>
      %c1_i32_271 = arith.constant 1 : i32
      %290 = arith.addi %arg27, %c1_i32_271 : i32
      %291 = arith.index_cast %290 : i32 to index
      %c0_272 = arith.constant 0 : index
      %c0_273 = arith.constant 0 : index
      %292 = vector.load %arg21[%291, %c0_272, %c0_273] : memref<26x26x16xbf16, #tpu.memory_space<vmem>>, vector<1x24x16xbf16>
      %293 = vector.shape_cast %292 : vector<1x24x16xbf16> to vector<24x16xbf16>
      %cst_274 = arith.constant dense<0.000000e+00> : vector<24x8xf32>
      %294 = tpu.matmul %293, %24, %cst_274 {dimension_numbers = #tpu.dot_dimension_numbers<[1], [0], [0], [1], [0, 0, 1, 1], [], []>} : vector<24x16xbf16>, vector<16x8xbf16>, vector<24x8xf32> -> vector<24x8xf32>
      %295 = arith.addf %289, %294 : vector<24x8xf32>
      %c1_i32_275 = arith.constant 1 : i32
      %296 = arith.addi %arg27, %c1_i32_275 : i32
      %297 = arith.index_cast %296 : i32 to index
      %c1_276 = arith.constant 1 : index
      %c0_277 = arith.constant 0 : index
      %298 = vector.load %arg21[%297, %c1_276, %c0_277] : memref<26x26x16xbf16, #tpu.memory_space<vmem>>, vector<1x24x16xbf16>
      %299 = vector.shape_cast %298 : vector<1x24x16xbf16> to vector<24x16xbf16>
      %cst_278 = arith.constant dense<0.000000e+00> : vector<24x8xf32>
      %300 = tpu.matmul %299, %25, %cst_278 {dimension_numbers = #tpu.dot_dimension_numbers<[1], [0], [0], [1], [0, 0, 1, 1], [], []>} : vector<24x16xbf16>, vector<16x8xbf16>, vector<24x8xf32> -> vector<24x8xf32>
      %301 = arith.addf %295, %300 : vector<24x8xf32>
      %c1_i32_279 = arith.constant 1 : i32
      %302 = arith.addi %arg27, %c1_i32_279 : i32
      %303 = arith.index_cast %302 : i32 to index
      %c2_280 = arith.constant 2 : index
      %c0_281 = arith.constant 0 : index
      %304 = vector.load %arg21[%303, %c2_280, %c0_281] : memref<26x26x16xbf16, #tpu.memory_space<vmem>>, vector<1x24x16xbf16>
      %305 = vector.shape_cast %304 : vector<1x24x16xbf16> to vector<24x16xbf16>
      %cst_282 = arith.constant dense<0.000000e+00> : vector<24x8xf32>
      %306 = tpu.matmul %305, %26, %cst_282 {dimension_numbers = #tpu.dot_dimension_numbers<[1], [0], [0], [1], [0, 0, 1, 1], [], []>} : vector<24x16xbf16>, vector<16x8xbf16>, vector<24x8xf32> -> vector<24x8xf32>
      %307 = arith.addf %301, %306 : vector<24x8xf32>
      %c2_i32_283 = arith.constant 2 : i32
      %308 = arith.addi %arg27, %c2_i32_283 : i32
      %309 = arith.index_cast %308 : i32 to index
      %c0_284 = arith.constant 0 : index
      %c0_285 = arith.constant 0 : index
      %310 = vector.load %arg21[%309, %c0_284, %c0_285] : memref<26x26x16xbf16, #tpu.memory_space<vmem>>, vector<1x24x16xbf16>
      %311 = vector.shape_cast %310 : vector<1x24x16xbf16> to vector<24x16xbf16>
      %cst_286 = arith.constant dense<0.000000e+00> : vector<24x8xf32>
      %312 = tpu.matmul %311, %27, %cst_286 {dimension_numbers = #tpu.dot_dimension_numbers<[1], [0], [0], [1], [0, 0, 1, 1], [], []>} : vector<24x16xbf16>, vector<16x8xbf16>, vector<24x8xf32> -> vector<24x8xf32>
      %313 = arith.addf %307, %312 : vector<24x8xf32>
      %c2_i32_287 = arith.constant 2 : i32
      %314 = arith.addi %arg27, %c2_i32_287 : i32
      %315 = arith.index_cast %314 : i32 to index
      %c1_288 = arith.constant 1 : index
      %c0_289 = arith.constant 0 : index
      %316 = vector.load %arg21[%315, %c1_288, %c0_289] : memref<26x26x16xbf16, #tpu.memory_space<vmem>>, vector<1x24x16xbf16>
      %317 = vector.shape_cast %316 : vector<1x24x16xbf16> to vector<24x16xbf16>
      %cst_290 = arith.constant dense<0.000000e+00> : vector<24x8xf32>
      %318 = tpu.matmul %317, %28, %cst_290 {dimension_numbers = #tpu.dot_dimension_numbers<[1], [0], [0], [1], [0, 0, 1, 1], [], []>} : vector<24x16xbf16>, vector<16x8xbf16>, vector<24x8xf32> -> vector<24x8xf32>
      %319 = arith.addf %313, %318 : vector<24x8xf32>
      %c2_i32_291 = arith.constant 2 : i32
      %320 = arith.addi %arg27, %c2_i32_291 : i32
      %321 = arith.index_cast %320 : i32 to index
      %c2_292 = arith.constant 2 : index
      %c0_293 = arith.constant 0 : index
      %322 = vector.load %arg21[%321, %c2_292, %c0_293] : memref<26x26x16xbf16, #tpu.memory_space<vmem>>, vector<1x24x16xbf16>
      %323 = vector.shape_cast %322 : vector<1x24x16xbf16> to vector<24x16xbf16>
      %cst_294 = arith.constant dense<0.000000e+00> : vector<24x8xf32>
      %324 = tpu.matmul %323, %29, %cst_294 {dimension_numbers = #tpu.dot_dimension_numbers<[1], [0], [0], [1], [0, 0, 1, 1], [], []>} : vector<24x16xbf16>, vector<16x8xbf16>, vector<24x8xf32> -> vector<24x8xf32>
      %325 = arith.addf %319, %324 : vector<24x8xf32>
      %cst_295 = arith.constant 0.000000e+00 : f32
      %326 = vector.broadcast %cst_295 : f32 to vector<24x8xf32>
      %327 = arith.maximumf %325, %326 : vector<24x8xf32>
      %328 = vector.broadcast %30 : vector<1x8xf32> to vector<24x8xf32>
      %329 = arith.mulf %327, %328 : vector<24x8xf32>
      %330 = vector.broadcast %31 : vector<1x8xf32> to vector<24x8xf32>
      %331 = arith.addf %329, %330 : vector<24x8xf32>
      %332 = arith.truncf %331 : vector<24x8xf32> to vector<24x8xbf16>
      %cst_296 = arith.constant dense<0.000000e+00> : vector<24x16xf32>
      %333 = tpu.matmul %332, %32, %cst_296 {dimension_numbers = #tpu.dot_dimension_numbers<[1], [0], [0], [1], [0, 0, 1, 1], [], []>} : vector<24x8xbf16>, vector<8x16xbf16>, vector<24x16xf32> -> vector<24x16xf32>
      %334 = arith.truncf %333 : vector<24x16xf32> to vector<24x16xbf16>
      %335 = arith.index_cast %arg27 : i32 to index
      %c0_297 = arith.constant 0 : index
      %c0_298 = arith.constant 0 : index
      %336 = vector.load %arg22[%335, %c0_297, %c0_298] : memref<24x24x16xbf16, #tpu.memory_space<vmem>>, vector<1x24x16xbf16>
      %337 = vector.shape_cast %336 : vector<1x24x16xbf16> to vector<24x16xbf16>
      %338 = vector.shape_cast %334 : vector<24x16xbf16> to vector<1x24x16xbf16>
      tpu.vector_store %arg22[%335, %c0_297, %c0_298], %338 {strides = array<i32>} : memref<24x24x16xbf16, #tpu.memory_space<vmem>>, vector<1x24x16xbf16>,
    }
    %c24_i32_32 = arith.constant 24 : i32
    %34 = tpu.iota {dimensions = array<i32: 0>} : vector<12x24xi32>
    %35 = tpu.iota {dimensions = array<i32: 1>} : vector<12x24xi32>
    %c2_i32 = arith.constant 2 : i32
    %36 = vector.broadcast %c2_i32 : i32 to vector<12x24xi32>
    %37 = arith.muli %36, %34 : vector<12x24xi32>
    %38 = arith.cmpi eq, %35, %37 : vector<12x24xi32>
    %39 = arith.extui %38 : vector<12x24xi1> to vector<12x24xi32>
    %40 = arith.sitofp %39 : vector<12x24xi32> to vector<12x24xf32>
    %41 = arith.truncf %40 : vector<12x24xf32> to vector<12x24xbf16>
    %c2_i32_33 = arith.constant 2 : i32
    %42 = vector.broadcast %c2_i32_33 : i32 to vector<12x24xi32>
    %43 = arith.muli %42, %34 : vector<12x24xi32>
    %c1_i32_34 = arith.constant 1 : i32
    %44 = vector.broadcast %c1_i32_34 : i32 to vector<12x24xi32>
    %45 = arith.addi %43, %44 : vector<12x24xi32>
    %46 = arith.cmpi eq, %35, %45 : vector<12x24xi32>
    %47 = arith.extui %46 : vector<12x24xi1> to vector<12x24xi32>
    %48 = arith.sitofp %47 : vector<12x24xi32> to vector<12x24xf32>
    %49 = arith.truncf %48 : vector<12x24xf32> to vector<12x24xbf16>
    %c0_35 = arith.constant 0 : index
    %c0_36 = arith.constant 0 : index
    %c0_37 = arith.constant 0 : index
    %50 = vector.load %arg22[%c0_35, %c0_36, %c0_37] : memref<24x24x16xbf16, #tpu.memory_space<vmem>>, vector<1x24x16xbf16>
    %51 = vector.shape_cast %50 : vector<1x24x16xbf16> to vector<24x16xbf16>
    %c1_38 = arith.constant 1 : index
    %c0_39 = arith.constant 0 : index
    %c0_40 = arith.constant 0 : index
    %52 = vector.load %arg22[%c1_38, %c0_39, %c0_40] : memref<24x24x16xbf16, #tpu.memory_space<vmem>>, vector<1x24x16xbf16>
    %53 = vector.shape_cast %52 : vector<1x24x16xbf16> to vector<24x16xbf16>
    %54 = arith.maximumf %51, %53 : vector<24x16xbf16>
    %cst = arith.constant dense<0.000000e+00> : vector<12x16xf32>
    %55 = tpu.matmul %41, %54, %cst {dimension_numbers = #tpu.dot_dimension_numbers<[1], [0], [0], [1], [0, 0, 1, 1], [], []>} : vector<12x24xbf16>, vector<24x16xbf16>, vector<12x16xf32> -> vector<12x16xf32>
    %cst_41 = arith.constant dense<0.000000e+00> : vector<12x16xf32>
    %56 = tpu.matmul %49, %54, %cst_41 {dimension_numbers = #tpu.dot_dimension_numbers<[1], [0], [0], [1], [0, 0, 1, 1], [], []>} : vector<12x24xbf16>, vector<24x16xbf16>, vector<12x16xf32> -> vector<12x16xf32>
    %57 = arith.maximumf %55, %56 : vector<12x16xf32>
    %58 = arith.truncf %57 : vector<12x16xf32> to vector<12x16xbf16>
    %c0_42 = arith.constant 0 : index
    %c0_43 = arith.constant 0 : index
    %c0_44 = arith.constant 0 : index
    %59 = vector.load %arg23[%c0_42, %c0_43, %c0_44] : memref<12x12x16xbf16, #tpu.memory_space<vmem>>, vector<1x12x16xbf16>
    %60 = vector.shape_cast %59 : vector<1x12x16xbf16> to vector<12x16xbf16>
    %61 = vector.shape_cast %58 : vector<12x16xbf16> to vector<1x12x16xbf16>
    tpu.vector_store %arg23[%c0_42, %c0_43, %c0_44], %61 {strides = array<i32>} : memref<12x12x16xbf16, #tpu.memory_space<vmem>>, vector<1x12x16xbf16>,
    %c2_45 = arith.constant 2 : index
    %c0_46 = arith.constant 0 : index
    %c0_47 = arith.constant 0 : index
    %62 = vector.load %arg22[%c2_45, %c0_46, %c0_47] : memref<24x24x16xbf16, #tpu.memory_space<vmem>>, vector<1x24x16xbf16>
    %63 = vector.shape_cast %62 : vector<1x24x16xbf16> to vector<24x16xbf16>
    %c3_48 = arith.constant 3 : index
    %c0_49 = arith.constant 0 : index
    %c0_50 = arith.constant 0 : index
    %64 = vector.load %arg22[%c3_48, %c0_49, %c0_50] : memref<24x24x16xbf16, #tpu.memory_space<vmem>>, vector<1x24x16xbf16>
    %65 = vector.shape_cast %64 : vector<1x24x16xbf16> to vector<24x16xbf16>
    %66 = arith.maximumf %63, %65 : vector<24x16xbf16>
    %cst_51 = arith.constant dense<0.000000e+00> : vector<12x16xf32>
    %67 = tpu.matmul %41, %66, %cst_51 {dimension_numbers = #tpu.dot_dimension_numbers<[1], [0], [0], [1], [0, 0, 1, 1], [], []>} : vector<12x24xbf16>, vector<24x16xbf16>, vector<12x16xf32> -> vector<12x16xf32>
    %cst_52 = arith.constant dense<0.000000e+00> : vector<12x16xf32>
    %68 = tpu.matmul %49, %66, %cst_52 {dimension_numbers = #tpu.dot_dimension_numbers<[1], [0], [0], [1], [0, 0, 1, 1], [], []>} : vector<12x24xbf16>, vector<24x16xbf16>, vector<12x16xf32> -> vector<12x16xf32>
    %69 = arith.maximumf %67, %68 : vector<12x16xf32>
    %70 = arith.truncf %69 : vector<12x16xf32> to vector<12x16xbf16>
    %c1_53 = arith.constant 1 : index
    %c0_54 = arith.constant 0 : index
    %c0_55 = arith.constant 0 : index
    %71 = vector.load %arg23[%c1_53, %c0_54, %c0_55] : memref<12x12x16xbf16, #tpu.memory_space<vmem>>, vector<1x12x16xbf16>
    %72 = vector.shape_cast %71 : vector<1x12x16xbf16> to vector<12x16xbf16>
    %73 = vector.shape_cast %70 : vector<12x16xbf16> to vector<1x12x16xbf16>
    tpu.vector_store %arg23[%c1_53, %c0_54, %c0_55], %73 {strides = array<i32>} : memref<12x12x16xbf16, #tpu.memory_space<vmem>>, vector<1x12x16xbf16>,
    %c4_56 = arith.constant 4 : index
    %c0_57 = arith.constant 0 : index
    %c0_58 = arith.constant 0 : index
    %74 = vector.load %arg22[%c4_56, %c0_57, %c0_58] : memref<24x24x16xbf16, #tpu.memory_space<vmem>>, vector<1x24x16xbf16>
    %75 = vector.shape_cast %74 : vector<1x24x16xbf16> to vector<24x16xbf16>
    %c5_59 = arith.constant 5 : index
    %c0_60 = arith.constant 0 : index
    %c0_61 = arith.constant 0 : index
    %76 = vector.load %arg22[%c5_59, %c0_60, %c0_61] : memref<24x24x16xbf16, #tpu.memory_space<vmem>>, vector<1x24x16xbf16>
    %77 = vector.shape_cast %76 : vector<1x24x16xbf16> to vector<24x16xbf16>
    %78 = arith.maximumf %75, %77 : vector<24x16xbf16>
    %cst_62 = arith.constant dense<0.000000e+00> : vector<12x16xf32>
    %79 = tpu.matmul %41, %78, %cst_62 {dimension_numbers = #tpu.dot_dimension_numbers<[1], [0], [0], [1], [0, 0, 1, 1], [], []>} : vector<12x24xbf16>, vector<24x16xbf16>, vector<12x16xf32> -> vector<12x16xf32>
    %cst_63 = arith.constant dense<0.000000e+00> : vector<12x16xf32>
    %80 = tpu.matmul %49, %78, %cst_63 {dimension_numbers = #tpu.dot_dimension_numbers<[1], [0], [0], [1], [0, 0, 1, 1], [], []>} : vector<12x24xbf16>, vector<24x16xbf16>, vector<12x16xf32> -> vector<12x16xf32>
    %81 = arith.maximumf %79, %80 : vector<12x16xf32>
    %82 = arith.truncf %81 : vector<12x16xf32> to vector<12x16xbf16>
    %c2_64 = arith.constant 2 : index
    %c0_65 = arith.constant 0 : index
    %c0_66 = arith.constant 0 : index
    %83 = vector.load %arg23[%c2_64, %c0_65, %c0_66] : memref<12x12x16xbf16, #tpu.memory_space<vmem>>, vector<1x12x16xbf16>
    %84 = vector.shape_cast %83 : vector<1x12x16xbf16> to vector<12x16xbf16>
    %85 = vector.shape_cast %82 : vector<12x16xbf16> to vector<1x12x16xbf16>
    tpu.vector_store %arg23[%c2_64, %c0_65, %c0_66], %85 {strides = array<i32>} : memref<12x12x16xbf16, #tpu.memory_space<vmem>>, vector<1x12x16xbf16>,
    %c6_67 = arith.constant 6 : index
    %c0_68 = arith.constant 0 : index
    %c0_69 = arith.constant 0 : index
    %86 = vector.load %arg22[%c6_67, %c0_68, %c0_69] : memref<24x24x16xbf16, #tpu.memory_space<vmem>>, vector<1x24x16xbf16>
    %87 = vector.shape_cast %86 : vector<1x24x16xbf16> to vector<24x16xbf16>
    %c7_70 = arith.constant 7 : index
    %c0_71 = arith.constant 0 : index
    %c0_72 = arith.constant 0 : index
    %88 = vector.load %arg22[%c7_70, %c0_71, %c0_72] : memref<24x24x16xbf16, #tpu.memory_space<vmem>>, vector<1x24x16xbf16>
    %89 = vector.shape_cast %88 : vector<1x24x16xbf16> to vector<24x16xbf16>
    %90 = arith.maximumf %87, %89 : vector<24x16xbf16>
    %cst_73 = arith.constant dense<0.000000e+00> : vector<12x16xf32>
    %91 = tpu.matmul %41, %90, %cst_73 {dimension_numbers = #tpu.dot_dimension_numbers<[1], [0], [0], [1], [0, 0, 1, 1], [], []>} : vector<12x24xbf16>, vector<24x16xbf16>, vector<12x16xf32> -> vector<12x16xf32>
    %cst_74 = arith.constant dense<0.000000e+00> : vector<12x16xf32>
    %92 = tpu.matmul %49, %90, %cst_74 {dimension_numbers = #tpu.dot_dimension_numbers<[1], [0], [0], [1], [0, 0, 1, 1], [], []>} : vector<12x24xbf16>, vector<24x16xbf16>, vector<12x16xf32> -> vector<12x16xf32>
    %93 = arith.maximumf %91, %92 : vector<12x16xf32>
    %94 = arith.truncf %93 : vector<12x16xf32> to vector<12x16xbf16>
    %c3_75 = arith.constant 3 : index
    %c0_76 = arith.constant 0 : index
    %c0_77 = arith.constant 0 : index
    %95 = vector.load %arg23[%c3_75, %c0_76, %c0_77] : memref<12x12x16xbf16, #tpu.memory_space<vmem>>, vector<1x12x16xbf16>
    %96 = vector.shape_cast %95 : vector<1x12x16xbf16> to vector<12x16xbf16>
    %97 = vector.shape_cast %94 : vector<12x16xbf16> to vector<1x12x16xbf16>
    tpu.vector_store %arg23[%c3_75, %c0_76, %c0_77], %97 {strides = array<i32>} : memref<12x12x16xbf16, #tpu.memory_space<vmem>>, vector<1x12x16xbf16>,
    %c8_78 = arith.constant 8 : index
    %c0_79 = arith.constant 0 : index
    %c0_80 = arith.constant 0 : index
    %98 = vector.load %arg22[%c8_78, %c0_79, %c0_80] : memref<24x24x16xbf16, #tpu.memory_space<vmem>>, vector<1x24x16xbf16>
    %99 = vector.shape_cast %98 : vector<1x24x16xbf16> to vector<24x16xbf16>
    %c9 = arith.constant 9 : index
    %c0_81 = arith.constant 0 : index
    %c0_82 = arith.constant 0 : index
    %100 = vector.load %arg22[%c9, %c0_81, %c0_82] : memref<24x24x16xbf16, #tpu.memory_space<vmem>>, vector<1x24x16xbf16>
    %101 = vector.shape_cast %100 : vector<1x24x16xbf16> to vector<24x16xbf16>
    %102 = arith.maximumf %99, %101 : vector<24x16xbf16>
    %cst_83 = arith.constant dense<0.000000e+00> : vector<12x16xf32>
    %103 = tpu.matmul %41, %102, %cst_83 {dimension_numbers = #tpu.dot_dimension_numbers<[1], [0], [0], [1], [0, 0, 1, 1], [], []>} : vector<12x24xbf16>, vector<24x16xbf16>, vector<12x16xf32> -> vector<12x16xf32>
    %cst_84 = arith.constant dense<0.000000e+00> : vector<12x16xf32>
    %104 = tpu.matmul %49, %102, %cst_84 {dimension_numbers = #tpu.dot_dimension_numbers<[1], [0], [0], [1], [0, 0, 1, 1], [], []>} : vector<12x24xbf16>, vector<24x16xbf16>, vector<12x16xf32> -> vector<12x16xf32>
    %105 = arith.maximumf %103, %104 : vector<12x16xf32>
    %106 = arith.truncf %105 : vector<12x16xf32> to vector<12x16xbf16>
    %c4_85 = arith.constant 4 : index
    %c0_86 = arith.constant 0 : index
    %c0_87 = arith.constant 0 : index
    %107 = vector.load %arg23[%c4_85, %c0_86, %c0_87] : memref<12x12x16xbf16, #tpu.memory_space<vmem>>, vector<1x12x16xbf16>
    %108 = vector.shape_cast %107 : vector<1x12x16xbf16> to vector<12x16xbf16>
    %109 = vector.shape_cast %106 : vector<12x16xbf16> to vector<1x12x16xbf16>
    tpu.vector_store %arg23[%c4_85, %c0_86, %c0_87], %109 {strides = array<i32>} : memref<12x12x16xbf16, #tpu.memory_space<vmem>>, vector<1x12x16xbf16>,
    %c10 = arith.constant 10 : index
    %c0_88 = arith.constant 0 : index
    %c0_89 = arith.constant 0 : index
    %110 = vector.load %arg22[%c10, %c0_88, %c0_89] : memref<24x24x16xbf16, #tpu.memory_space<vmem>>, vector<1x24x16xbf16>
    %111 = vector.shape_cast %110 : vector<1x24x16xbf16> to vector<24x16xbf16>
    %c11 = arith.constant 11 : index
    %c0_90 = arith.constant 0 : index
    %c0_91 = arith.constant 0 : index
    %112 = vector.load %arg22[%c11, %c0_90, %c0_91] : memref<24x24x16xbf16, #tpu.memory_space<vmem>>, vector<1x24x16xbf16>
    %113 = vector.shape_cast %112 : vector<1x24x16xbf16> to vector<24x16xbf16>
    %114 = arith.maximumf %111, %113 : vector<24x16xbf16>
    %cst_92 = arith.constant dense<0.000000e+00> : vector<12x16xf32>
    %115 = tpu.matmul %41, %114, %cst_92 {dimension_numbers = #tpu.dot_dimension_numbers<[1], [0], [0], [1], [0, 0, 1, 1], [], []>} : vector<12x24xbf16>, vector<24x16xbf16>, vector<12x16xf32> -> vector<12x16xf32>
    %cst_93 = arith.constant dense<0.000000e+00> : vector<12x16xf32>
    %116 = tpu.matmul %49, %114, %cst_93 {dimension_numbers = #tpu.dot_dimension_numbers<[1], [0], [0], [1], [0, 0, 1, 1], [], []>} : vector<12x24xbf16>, vector<24x16xbf16>, vector<12x16xf32> -> vector<12x16xf32>
    %117 = arith.maximumf %115, %116 : vector<12x16xf32>
    %118 = arith.truncf %117 : vector<12x16xf32> to vector<12x16xbf16>
    %c5_94 = arith.constant 5 : index
    %c0_95 = arith.constant 0 : index
    %c0_96 = arith.constant 0 : index
    %119 = vector.load %arg23[%c5_94, %c0_95, %c0_96] : memref<12x12x16xbf16, #tpu.memory_space<vmem>>, vector<1x12x16xbf16>
    %120 = vector.shape_cast %119 : vector<1x12x16xbf16> to vector<12x16xbf16>
    %121 = vector.shape_cast %118 : vector<12x16xbf16> to vector<1x12x16xbf16>
    tpu.vector_store %arg23[%c5_94, %c0_95, %c0_96], %121 {strides = array<i32>} : memref<12x12x16xbf16, #tpu.memory_space<vmem>>, vector<1x12x16xbf16>,
    %c12 = arith.constant 12 : index
    %c0_97 = arith.constant 0 : index
    %c0_98 = arith.constant 0 : index
    %122 = vector.load %arg22[%c12, %c0_97, %c0_98] : memref<24x24x16xbf16, #tpu.memory_space<vmem>>, vector<1x24x16xbf16>
    %123 = vector.shape_cast %122 : vector<1x24x16xbf16> to vector<24x16xbf16>
    %c13 = arith.constant 13 : index
    %c0_99 = arith.constant 0 : index
    %c0_100 = arith.constant 0 : index
    %124 = vector.load %arg22[%c13, %c0_99, %c0_100] : memref<24x24x16xbf16, #tpu.memory_space<vmem>>, vector<1x24x16xbf16>
    %125 = vector.shape_cast %124 : vector<1x24x16xbf16> to vector<24x16xbf16>
    %126 = arith.maximumf %123, %125 : vector<24x16xbf16>
    %cst_101 = arith.constant dense<0.000000e+00> : vector<12x16xf32>
    %127 = tpu.matmul %41, %126, %cst_101 {dimension_numbers = #tpu.dot_dimension_numbers<[1], [0], [0], [1], [0, 0, 1, 1], [], []>} : vector<12x24xbf16>, vector<24x16xbf16>, vector<12x16xf32> -> vector<12x16xf32>
    %cst_102 = arith.constant dense<0.000000e+00> : vector<12x16xf32>
    %128 = tpu.matmul %49, %126, %cst_102 {dimension_numbers = #tpu.dot_dimension_numbers<[1], [0], [0], [1], [0, 0, 1, 1], [], []>} : vector<12x24xbf16>, vector<24x16xbf16>, vector<12x16xf32> -> vector<12x16xf32>
    %129 = arith.maximumf %127, %128 : vector<12x16xf32>
    %130 = arith.truncf %129 : vector<12x16xf32> to vector<12x16xbf16>
    %c6_103 = arith.constant 6 : index
    %c0_104 = arith.constant 0 : index
    %c0_105 = arith.constant 0 : index
    %131 = vector.load %arg23[%c6_103, %c0_104, %c0_105] : memref<12x12x16xbf16, #tpu.memory_space<vmem>>, vector<1x12x16xbf16>
    %132 = vector.shape_cast %131 : vector<1x12x16xbf16> to vector<12x16xbf16>
    %133 = vector.shape_cast %130 : vector<12x16xbf16> to vector<1x12x16xbf16>
    tpu.vector_store %arg23[%c6_103, %c0_104, %c0_105], %133 {strides = array<i32>} : memref<12x12x16xbf16, #tpu.memory_space<vmem>>, vector<1x12x16xbf16>,
    %c14 = arith.constant 14 : index
    %c0_106 = arith.constant 0 : index
    %c0_107 = arith.constant 0 : index
    %134 = vector.load %arg22[%c14, %c0_106, %c0_107] : memref<24x24x16xbf16, #tpu.memory_space<vmem>>, vector<1x24x16xbf16>
    %135 = vector.shape_cast %134 : vector<1x24x16xbf16> to vector<24x16xbf16>
    %c15 = arith.constant 15 : index
    %c0_108 = arith.constant 0 : index
    %c0_109 = arith.constant 0 : index
    %136 = vector.load %arg22[%c15, %c0_108, %c0_109] : memref<24x24x16xbf16, #tpu.memory_space<vmem>>, vector<1x24x16xbf16>
    %137 = vector.shape_cast %136 : vector<1x24x16xbf16> to vector<24x16xbf16>
    %138 = arith.maximumf %135, %137 : vector<24x16xbf16>
    %cst_110 = arith.constant dense<0.000000e+00> : vector<12x16xf32>
    %139 = tpu.matmul %41, %138, %cst_110 {dimension_numbers = #tpu.dot_dimension_numbers<[1], [0], [0], [1], [0, 0, 1, 1], [], []>} : vector<12x24xbf16>, vector<24x16xbf16>, vector<12x16xf32> -> vector<12x16xf32>
    %cst_111 = arith.constant dense<0.000000e+00> : vector<12x16xf32>
    %140 = tpu.matmul %49, %138, %cst_111 {dimension_numbers = #tpu.dot_dimension_numbers<[1], [0], [0], [1], [0, 0, 1, 1], [], []>} : vector<12x24xbf16>, vector<24x16xbf16>, vector<12x16xf32> -> vector<12x16xf32>
    %141 = arith.maximumf %139, %140 : vector<12x16xf32>
    %142 = arith.truncf %141 : vector<12x16xf32> to vector<12x16xbf16>
    %c7_112 = arith.constant 7 : index
    %c0_113 = arith.constant 0 : index
    %c0_114 = arith.constant 0 : index
    %143 = vector.load %arg23[%c7_112, %c0_113, %c0_114] : memref<12x12x16xbf16, #tpu.memory_space<vmem>>, vector<1x12x16xbf16>
    %144 = vector.shape_cast %143 : vector<1x12x16xbf16> to vector<12x16xbf16>
    %145 = vector.shape_cast %142 : vector<12x16xbf16> to vector<1x12x16xbf16>
    tpu.vector_store %arg23[%c7_112, %c0_113, %c0_114], %145 {strides = array<i32>} : memref<12x12x16xbf16, #tpu.memory_space<vmem>>, vector<1x12x16xbf16>,
    %c16_115 = arith.constant 16 : index
    %c0_116 = arith.constant 0 : index
    %c0_117 = arith.constant 0 : index
    %146 = vector.load %arg22[%c16_115, %c0_116, %c0_117] : memref<24x24x16xbf16, #tpu.memory_space<vmem>>, vector<1x24x16xbf16>
    %147 = vector.shape_cast %146 : vector<1x24x16xbf16> to vector<24x16xbf16>
    %c17 = arith.constant 17 : index
    %c0_118 = arith.constant 0 : index
    %c0_119 = arith.constant 0 : index
    %148 = vector.load %arg22[%c17, %c0_118, %c0_119] : memref<24x24x16xbf16, #tpu.memory_space<vmem>>, vector<1x24x16xbf16>
    %149 = vector.shape_cast %148 : vector<1x24x16xbf16> to vector<24x16xbf16>
    %150 = arith.maximumf %147, %149 : vector<24x16xbf16>
    %cst_120 = arith.constant dense<0.000000e+00> : vector<12x16xf32>
    %151 = tpu.matmul %41, %150, %cst_120 {dimension_numbers = #tpu.dot_dimension_numbers<[1], [0], [0], [1], [0, 0, 1, 1], [], []>} : vector<12x24xbf16>, vector<24x16xbf16>, vector<12x16xf32> -> vector<12x16xf32>
    %cst_121 = arith.constant dense<0.000000e+00> : vector<12x16xf32>
    %152 = tpu.matmul %49, %150, %cst_121 {dimension_numbers = #tpu.dot_dimension_numbers<[1], [0], [0], [1], [0, 0, 1, 1], [], []>} : vector<12x24xbf16>, vector<24x16xbf16>, vector<12x16xf32> -> vector<12x16xf32>
    %153 = arith.maximumf %151, %152 : vector<12x16xf32>
    %154 = arith.truncf %153 : vector<12x16xf32> to vector<12x16xbf16>
    %c8_122 = arith.constant 8 : index
    %c0_123 = arith.constant 0 : index
    %c0_124 = arith.constant 0 : index
    %155 = vector.load %arg23[%c8_122, %c0_123, %c0_124] : memref<12x12x16xbf16, #tpu.memory_space<vmem>>, vector<1x12x16xbf16>
    %156 = vector.shape_cast %155 : vector<1x12x16xbf16> to vector<12x16xbf16>
    %157 = vector.shape_cast %154 : vector<12x16xbf16> to vector<1x12x16xbf16>
    tpu.vector_store %arg23[%c8_122, %c0_123, %c0_124], %157 {strides = array<i32>} : memref<12x12x16xbf16, #tpu.memory_space<vmem>>, vector<1x12x16xbf16>,
    %c18 = arith.constant 18 : index
    %c0_125 = arith.constant 0 : index
    %c0_126 = arith.constant 0 : index
    %158 = vector.load %arg22[%c18, %c0_125, %c0_126] : memref<24x24x16xbf16, #tpu.memory_space<vmem>>, vector<1x24x16xbf16>
    %159 = vector.shape_cast %158 : vector<1x24x16xbf16> to vector<24x16xbf16>
    %c19 = arith.constant 19 : index
    %c0_127 = arith.constant 0 : index
    %c0_128 = arith.constant 0 : index
    %160 = vector.load %arg22[%c19, %c0_127, %c0_128] : memref<24x24x16xbf16, #tpu.memory_space<vmem>>, vector<1x24x16xbf16>
    %161 = vector.shape_cast %160 : vector<1x24x16xbf16> to vector<24x16xbf16>
    %162 = arith.maximumf %159, %161 : vector<24x16xbf16>
    %cst_129 = arith.constant dense<0.000000e+00> : vector<12x16xf32>
    %163 = tpu.matmul %41, %162, %cst_129 {dimension_numbers = #tpu.dot_dimension_numbers<[1], [0], [0], [1], [0, 0, 1, 1], [], []>} : vector<12x24xbf16>, vector<24x16xbf16>, vector<12x16xf32> -> vector<12x16xf32>
    %cst_130 = arith.constant dense<0.000000e+00> : vector<12x16xf32>
    %164 = tpu.matmul %49, %162, %cst_130 {dimension_numbers = #tpu.dot_dimension_numbers<[1], [0], [0], [1], [0, 0, 1, 1], [], []>} : vector<12x24xbf16>, vector<24x16xbf16>, vector<12x16xf32> -> vector<12x16xf32>
    %165 = arith.maximumf %163, %164 : vector<12x16xf32>
    %166 = arith.truncf %165 : vector<12x16xf32> to vector<12x16xbf16>
    %c9_131 = arith.constant 9 : index
    %c0_132 = arith.constant 0 : index
    %c0_133 = arith.constant 0 : index
    %167 = vector.load %arg23[%c9_131, %c0_132, %c0_133] : memref<12x12x16xbf16, #tpu.memory_space<vmem>>, vector<1x12x16xbf16>
    %168 = vector.shape_cast %167 : vector<1x12x16xbf16> to vector<12x16xbf16>
    %169 = vector.shape_cast %166 : vector<12x16xbf16> to vector<1x12x16xbf16>
    tpu.vector_store %arg23[%c9_131, %c0_132, %c0_133], %169 {strides = array<i32>} : memref<12x12x16xbf16, #tpu.memory_space<vmem>>, vector<1x12x16xbf16>,
    %c20 = arith.constant 20 : index
    %c0_134 = arith.constant 0 : index
    %c0_135 = arith.constant 0 : index
    %170 = vector.load %arg22[%c20, %c0_134, %c0_135] : memref<24x24x16xbf16, #tpu.memory_space<vmem>>, vector<1x24x16xbf16>
    %171 = vector.shape_cast %170 : vector<1x24x16xbf16> to vector<24x16xbf16>
    %c21 = arith.constant 21 : index
    %c0_136 = arith.constant 0 : index
    %c0_137 = arith.constant 0 : index
    %172 = vector.load %arg22[%c21, %c0_136, %c0_137] : memref<24x24x16xbf16, #tpu.memory_space<vmem>>, vector<1x24x16xbf16>
    %173 = vector.shape_cast %172 : vector<1x24x16xbf16> to vector<24x16xbf16>
    %174 = arith.maximumf %171, %173 : vector<24x16xbf16>
    %cst_138 = arith.constant dense<0.000000e+00> : vector<12x16xf32>
    %175 = tpu.matmul %41, %174, %cst_138 {dimension_numbers = #tpu.dot_dimension_numbers<[1], [0], [0], [1], [0, 0, 1, 1], [], []>} : vector<12x24xbf16>, vector<24x16xbf16>, vector<12x16xf32> -> vector<12x16xf32>
    %cst_139 = arith.constant dense<0.000000e+00> : vector<12x16xf32>
    %176 = tpu.matmul %49, %174, %cst_139 {dimension_numbers = #tpu.dot_dimension_numbers<[1], [0], [0], [1], [0, 0, 1, 1], [], []>} : vector<12x24xbf16>, vector<24x16xbf16>, vector<12x16xf32> -> vector<12x16xf32>
    %177 = arith.maximumf %175, %176 : vector<12x16xf32>
    %178 = arith.truncf %177 : vector<12x16xf32> to vector<12x16xbf16>
    %c10_140 = arith.constant 10 : index
    %c0_141 = arith.constant 0 : index
    %c0_142 = arith.constant 0 : index
    %179 = vector.load %arg23[%c10_140, %c0_141, %c0_142] : memref<12x12x16xbf16, #tpu.memory_space<vmem>>, vector<1x12x16xbf16>
    %180 = vector.shape_cast %179 : vector<1x12x16xbf16> to vector<12x16xbf16>
    %181 = vector.shape_cast %178 : vector<12x16xbf16> to vector<1x12x16xbf16>
    tpu.vector_store %arg23[%c10_140, %c0_141, %c0_142], %181 {strides = array<i32>} : memref<12x12x16xbf16, #tpu.memory_space<vmem>>, vector<1x12x16xbf16>,
    %c22 = arith.constant 22 : index
    %c0_143 = arith.constant 0 : index
    %c0_144 = arith.constant 0 : index
    %182 = vector.load %arg22[%c22, %c0_143, %c0_144] : memref<24x24x16xbf16, #tpu.memory_space<vmem>>, vector<1x24x16xbf16>
    %183 = vector.shape_cast %182 : vector<1x24x16xbf16> to vector<24x16xbf16>
    %c23 = arith.constant 23 : index
    %c0_145 = arith.constant 0 : index
    %c0_146 = arith.constant 0 : index
    %184 = vector.load %arg22[%c23, %c0_145, %c0_146] : memref<24x24x16xbf16, #tpu.memory_space<vmem>>, vector<1x24x16xbf16>
    %185 = vector.shape_cast %184 : vector<1x24x16xbf16> to vector<24x16xbf16>
    %186 = arith.maximumf %183, %185 : vector<24x16xbf16>
    %cst_147 = arith.constant dense<0.000000e+00> : vector<12x16xf32>
    %187 = tpu.matmul %41, %186, %cst_147 {dimension_numbers = #tpu.dot_dimension_numbers<[1], [0], [0], [1], [0, 0, 1, 1], [], []>} : vector<12x24xbf16>, vector<24x16xbf16>, vector<12x16xf32> -> vector<12x16xf32>
    %cst_148 = arith.constant dense<0.000000e+00> : vector<12x16xf32>
    %188 = tpu.matmul %49, %186, %cst_148 {dimension_numbers = #tpu.dot_dimension_numbers<[1], [0], [0], [1], [0, 0, 1, 1], [], []>} : vector<12x24xbf16>, vector<24x16xbf16>, vector<12x16xf32> -> vector<12x16xf32>
    %189 = arith.maximumf %187, %188 : vector<12x16xf32>
    %190 = arith.truncf %189 : vector<12x16xf32> to vector<12x16xbf16>
    %c11_149 = arith.constant 11 : index
    %c0_150 = arith.constant 0 : index
    %c0_151 = arith.constant 0 : index
    %191 = vector.load %arg23[%c11_149, %c0_150, %c0_151] : memref<12x12x16xbf16, #tpu.memory_space<vmem>>, vector<1x12x16xbf16>
    %192 = vector.shape_cast %191 : vector<1x12x16xbf16> to vector<12x16xbf16>
    %193 = vector.shape_cast %190 : vector<12x16xbf16> to vector<1x12x16xbf16>
    tpu.vector_store %arg23[%c11_149, %c0_150, %c0_151], %193 {strides = array<i32>} : memref<12x12x16xbf16, #tpu.memory_space<vmem>>, vector<1x12x16xbf16>,
    %c0_152 = arith.constant 0 : index
    %c0_153 = arith.constant 0 : index
    %194 = vector.load %arg9[%c0_152, %c0_153] : memref<144x16xbf16, #tpu.memory_space<vmem>>, vector<16x16xbf16>
    %c16_154 = arith.constant 16 : index
    %c0_155 = arith.constant 0 : index
    %195 = vector.load %arg9[%c16_154, %c0_155] : memref<144x16xbf16, #tpu.memory_space<vmem>>, vector<16x16xbf16>
    %c32_156 = arith.constant 32 : index
    %c0_157 = arith.constant 0 : index
    %196 = vector.load %arg9[%c32_156, %c0_157] : memref<144x16xbf16, #tpu.memory_space<vmem>>, vector<16x16xbf16>
    %c48_158 = arith.constant 48 : index
    %c0_159 = arith.constant 0 : index
    %197 = vector.load %arg9[%c48_158, %c0_159] : memref<144x16xbf16, #tpu.memory_space<vmem>>, vector<16x16xbf16>
    %c64_160 = arith.constant 64 : index
    %c0_161 = arith.constant 0 : index
    %198 = vector.load %arg9[%c64_160, %c0_161] : memref<144x16xbf16, #tpu.memory_space<vmem>>, vector<16x16xbf16>
    %c80_162 = arith.constant 80 : index
    %c0_163 = arith.constant 0 : index
    %199 = vector.load %arg9[%c80_162, %c0_163] : memref<144x16xbf16, #tpu.memory_space<vmem>>, vector<16x16xbf16>
    %c96_164 = arith.constant 96 : index
    %c0_165 = arith.constant 0 : index
    %200 = vector.load %arg9[%c96_164, %c0_165] : memref<144x16xbf16, #tpu.memory_space<vmem>>, vector<16x16xbf16>
    %c112_166 = arith.constant 112 : index
    %c0_167 = arith.constant 0 : index
    %201 = vector.load %arg9[%c112_166, %c0_167] : memref<144x16xbf16, #tpu.memory_space<vmem>>, vector<16x16xbf16>
    %c128_168 = arith.constant 128 : index
    %c0_169 = arith.constant 0 : index
    %202 = vector.load %arg9[%c128_168, %c0_169] : memref<144x16xbf16, #tpu.memory_space<vmem>>, vector<16x16xbf16>
    %c0_170 = arith.constant 0 : index
    %c0_171 = arith.constant 0 : index
    %203 = vector.load %arg10[%c0_170, %c0_171] : memref<1x16xf32, #tpu.memory_space<vmem>>, vector<1x16xf32>
    %c0_172 = arith.constant 0 : index
    %c0_173 = arith.constant 0 : index
    %204 = vector.load %arg11[%c0_172, %c0_173] : memref<1x16xf32, #tpu.memory_space<vmem>>, vector<1x16xf32>
    %c0_i32_174 = arith.constant 0 : i32
    %c10_i32 = arith.constant 10 : i32
    %205 = arith.addi %c0_i32_174, %c10_i32 : i32
    %c1_i32_175 = arith.constant 1 : i32
    scf.for %arg27 = %c0_i32_174 to %205 step %c1_i32_175  : i32 {
      %cst_258 = arith.constant 0.000000e+00 : f32
      %271 = vector.broadcast %cst_258 : f32 to vector<10x16xf32>
      %c0_i32_259 = arith.constant 0 : i32
      %272 = arith.addi %arg27, %c0_i32_259 : i32
      %273 = arith.index_cast %272 : i32 to index
      %c0_260 = arith.constant 0 : index
      %c0_261 = arith.constant 0 : index
      %274 = vector.load %arg23[%273, %c0_260, %c0_261] : memref<12x12x16xbf16, #tpu.memory_space<vmem>>, vector<1x10x16xbf16>
      %275 = vector.shape_cast %274 : vector<1x10x16xbf16> to vector<10x16xbf16>
      %cst_262 = arith.constant dense<0.000000e+00> : vector<10x16xf32>
      %276 = tpu.matmul %275, %194, %cst_262 {dimension_numbers = #tpu.dot_dimension_numbers<[1], [0], [0], [1], [0, 0, 1, 1], [], []>} : vector<10x16xbf16>, vector<16x16xbf16>, vector<10x16xf32> -> vector<10x16xf32>
      %277 = arith.addf %271, %276 : vector<10x16xf32>
      %c0_i32_263 = arith.constant 0 : i32
      %278 = arith.addi %arg27, %c0_i32_263 : i32
      %279 = arith.index_cast %278 : i32 to index
      %c1_264 = arith.constant 1 : index
      %c0_265 = arith.constant 0 : index
      %280 = vector.load %arg23[%279, %c1_264, %c0_265] : memref<12x12x16xbf16, #tpu.memory_space<vmem>>, vector<1x10x16xbf16>
      %281 = vector.shape_cast %280 : vector<1x10x16xbf16> to vector<10x16xbf16>
      %cst_266 = arith.constant dense<0.000000e+00> : vector<10x16xf32>
      %282 = tpu.matmul %281, %195, %cst_266 {dimension_numbers = #tpu.dot_dimension_numbers<[1], [0], [0], [1], [0, 0, 1, 1], [], []>} : vector<10x16xbf16>, vector<16x16xbf16>, vector<10x16xf32> -> vector<10x16xf32>
      %283 = arith.addf %277, %282 : vector<10x16xf32>
      %c0_i32_267 = arith.constant 0 : i32
      %284 = arith.addi %arg27, %c0_i32_267 : i32
      %285 = arith.index_cast %284 : i32 to index
      %c2_268 = arith.constant 2 : index
      %c0_269 = arith.constant 0 : index
      %286 = vector.load %arg23[%285, %c2_268, %c0_269] : memref<12x12x16xbf16, #tpu.memory_space<vmem>>, vector<1x10x16xbf16>
      %287 = vector.shape_cast %286 : vector<1x10x16xbf16> to vector<10x16xbf16>
      %cst_270 = arith.constant dense<0.000000e+00> : vector<10x16xf32>
      %288 = tpu.matmul %287, %196, %cst_270 {dimension_numbers = #tpu.dot_dimension_numbers<[1], [0], [0], [1], [0, 0, 1, 1], [], []>} : vector<10x16xbf16>, vector<16x16xbf16>, vector<10x16xf32> -> vector<10x16xf32>
      %289 = arith.addf %283, %288 : vector<10x16xf32>
      %c1_i32_271 = arith.constant 1 : i32
      %290 = arith.addi %arg27, %c1_i32_271 : i32
      %291 = arith.index_cast %290 : i32 to index
      %c0_272 = arith.constant 0 : index
      %c0_273 = arith.constant 0 : index
      %292 = vector.load %arg23[%291, %c0_272, %c0_273] : memref<12x12x16xbf16, #tpu.memory_space<vmem>>, vector<1x10x16xbf16>
      %293 = vector.shape_cast %292 : vector<1x10x16xbf16> to vector<10x16xbf16>
      %cst_274 = arith.constant dense<0.000000e+00> : vector<10x16xf32>
      %294 = tpu.matmul %293, %197, %cst_274 {dimension_numbers = #tpu.dot_dimension_numbers<[1], [0], [0], [1], [0, 0, 1, 1], [], []>} : vector<10x16xbf16>, vector<16x16xbf16>, vector<10x16xf32> -> vector<10x16xf32>
      %295 = arith.addf %289, %294 : vector<10x16xf32>
      %c1_i32_275 = arith.constant 1 : i32
      %296 = arith.addi %arg27, %c1_i32_275 : i32
      %297 = arith.index_cast %296 : i32 to index
      %c1_276 = arith.constant 1 : index
      %c0_277 = arith.constant 0 : index
      %298 = vector.load %arg23[%297, %c1_276, %c0_277] : memref<12x12x16xbf16, #tpu.memory_space<vmem>>, vector<1x10x16xbf16>
      %299 = vector.shape_cast %298 : vector<1x10x16xbf16> to vector<10x16xbf16>
      %cst_278 = arith.constant dense<0.000000e+00> : vector<10x16xf32>
      %300 = tpu.matmul %299, %198, %cst_278 {dimension_numbers = #tpu.dot_dimension_numbers<[1], [0], [0], [1], [0, 0, 1, 1], [], []>} : vector<10x16xbf16>, vector<16x16xbf16>, vector<10x16xf32> -> vector<10x16xf32>
      %301 = arith.addf %295, %300 : vector<10x16xf32>
      %c1_i32_279 = arith.constant 1 : i32
      %302 = arith.addi %arg27, %c1_i32_279 : i32
      %303 = arith.index_cast %302 : i32 to index
      %c2_280 = arith.constant 2 : index
      %c0_281 = arith.constant 0 : index
      %304 = vector.load %arg23[%303, %c2_280, %c0_281] : memref<12x12x16xbf16, #tpu.memory_space<vmem>>, vector<1x10x16xbf16>
      %305 = vector.shape_cast %304 : vector<1x10x16xbf16> to vector<10x16xbf16>
      %cst_282 = arith.constant dense<0.000000e+00> : vector<10x16xf32>
      %306 = tpu.matmul %305, %199, %cst_282 {dimension_numbers = #tpu.dot_dimension_numbers<[1], [0], [0], [1], [0, 0, 1, 1], [], []>} : vector<10x16xbf16>, vector<16x16xbf16>, vector<10x16xf32> -> vector<10x16xf32>
      %307 = arith.addf %301, %306 : vector<10x16xf32>
      %c2_i32_283 = arith.constant 2 : i32
      %308 = arith.addi %arg27, %c2_i32_283 : i32
      %309 = arith.index_cast %308 : i32 to index
      %c0_284 = arith.constant 0 : index
      %c0_285 = arith.constant 0 : index
      %310 = vector.load %arg23[%309, %c0_284, %c0_285] : memref<12x12x16xbf16, #tpu.memory_space<vmem>>, vector<1x10x16xbf16>
      %311 = vector.shape_cast %310 : vector<1x10x16xbf16> to vector<10x16xbf16>
      %cst_286 = arith.constant dense<0.000000e+00> : vector<10x16xf32>
      %312 = tpu.matmul %311, %200, %cst_286 {dimension_numbers = #tpu.dot_dimension_numbers<[1], [0], [0], [1], [0, 0, 1, 1], [], []>} : vector<10x16xbf16>, vector<16x16xbf16>, vector<10x16xf32> -> vector<10x16xf32>
      %313 = arith.addf %307, %312 : vector<10x16xf32>
      %c2_i32_287 = arith.constant 2 : i32
      %314 = arith.addi %arg27, %c2_i32_287 : i32
      %315 = arith.index_cast %314 : i32 to index
      %c1_288 = arith.constant 1 : index
      %c0_289 = arith.constant 0 : index
      %316 = vector.load %arg23[%315, %c1_288, %c0_289] : memref<12x12x16xbf16, #tpu.memory_space<vmem>>, vector<1x10x16xbf16>
      %317 = vector.shape_cast %316 : vector<1x10x16xbf16> to vector<10x16xbf16>
      %cst_290 = arith.constant dense<0.000000e+00> : vector<10x16xf32>
      %318 = tpu.matmul %317, %201, %cst_290 {dimension_numbers = #tpu.dot_dimension_numbers<[1], [0], [0], [1], [0, 0, 1, 1], [], []>} : vector<10x16xbf16>, vector<16x16xbf16>, vector<10x16xf32> -> vector<10x16xf32>
      %319 = arith.addf %313, %318 : vector<10x16xf32>
      %c2_i32_291 = arith.constant 2 : i32
      %320 = arith.addi %arg27, %c2_i32_291 : i32
      %321 = arith.index_cast %320 : i32 to index
      %c2_292 = arith.constant 2 : index
      %c0_293 = arith.constant 0 : index
      %322 = vector.load %arg23[%321, %c2_292, %c0_293] : memref<12x12x16xbf16, #tpu.memory_space<vmem>>, vector<1x10x16xbf16>
      %323 = vector.shape_cast %322 : vector<1x10x16xbf16> to vector<10x16xbf16>
      %cst_294 = arith.constant dense<0.000000e+00> : vector<10x16xf32>
      %324 = tpu.matmul %323, %202, %cst_294 {dimension_numbers = #tpu.dot_dimension_numbers<[1], [0], [0], [1], [0, 0, 1, 1], [], []>} : vector<10x16xbf16>, vector<16x16xbf16>, vector<10x16xf32> -> vector<10x16xf32>
      %325 = arith.addf %319, %324 : vector<10x16xf32>
      %cst_295 = arith.constant 0.000000e+00 : f32
      %326 = vector.broadcast %cst_295 : f32 to vector<10x16xf32>
      %327 = arith.maximumf %325, %326 : vector<10x16xf32>
      %328 = vector.broadcast %203 : vector<1x16xf32> to vector<10x16xf32>
      %329 = arith.mulf %327, %328 : vector<10x16xf32>
      %330 = vector.broadcast %204 : vector<1x16xf32> to vector<10x16xf32>
      %331 = arith.addf %329, %330 : vector<10x16xf32>
      %332 = arith.truncf %331 : vector<10x16xf32> to vector<10x16xbf16>
      %333 = arith.index_cast %arg27 : i32 to index
      %c0_296 = arith.constant 0 : index
      %c0_297 = arith.constant 0 : index
      %334 = vector.load %arg24[%333, %c0_296, %c0_297] : memref<10x10x16xbf16, #tpu.memory_space<vmem>>, vector<1x10x16xbf16>
      %335 = vector.shape_cast %334 : vector<1x10x16xbf16> to vector<10x16xbf16>
      %336 = vector.shape_cast %332 : vector<10x16xbf16> to vector<1x10x16xbf16>
      tpu.vector_store %arg24[%333, %c0_296, %c0_297], %336 {strides = array<i32>} : memref<10x10x16xbf16, #tpu.memory_space<vmem>>, vector<1x10x16xbf16>,
    }
    %c10_i32_176 = arith.constant 10 : i32
    %c0_177 = arith.constant 0 : index
    %c0_178 = arith.constant 0 : index
    %206 = vector.load %arg12[%c0_177, %c0_178] : memref<144x16xbf16, #tpu.memory_space<vmem>>, vector<16x16xbf16>
    %c16_179 = arith.constant 16 : index
    %c0_180 = arith.constant 0 : index
    %207 = vector.load %arg12[%c16_179, %c0_180] : memref<144x16xbf16, #tpu.memory_space<vmem>>, vector<16x16xbf16>
    %c32_181 = arith.constant 32 : index
    %c0_182 = arith.constant 0 : index
    %208 = vector.load %arg12[%c32_181, %c0_182] : memref<144x16xbf16, #tpu.memory_space<vmem>>, vector<16x16xbf16>
    %c48_183 = arith.constant 48 : index
    %c0_184 = arith.constant 0 : index
    %209 = vector.load %arg12[%c48_183, %c0_184] : memref<144x16xbf16, #tpu.memory_space<vmem>>, vector<16x16xbf16>
    %c64_185 = arith.constant 64 : index
    %c0_186 = arith.constant 0 : index
    %210 = vector.load %arg12[%c64_185, %c0_186] : memref<144x16xbf16, #tpu.memory_space<vmem>>, vector<16x16xbf16>
    %c80_187 = arith.constant 80 : index
    %c0_188 = arith.constant 0 : index
    %211 = vector.load %arg12[%c80_187, %c0_188] : memref<144x16xbf16, #tpu.memory_space<vmem>>, vector<16x16xbf16>
    %c96_189 = arith.constant 96 : index
    %c0_190 = arith.constant 0 : index
    %212 = vector.load %arg12[%c96_189, %c0_190] : memref<144x16xbf16, #tpu.memory_space<vmem>>, vector<16x16xbf16>
    %c112_191 = arith.constant 112 : index
    %c0_192 = arith.constant 0 : index
    %213 = vector.load %arg12[%c112_191, %c0_192] : memref<144x16xbf16, #tpu.memory_space<vmem>>, vector<16x16xbf16>
    %c128_193 = arith.constant 128 : index
    %c0_194 = arith.constant 0 : index
    %214 = vector.load %arg12[%c128_193, %c0_194] : memref<144x16xbf16, #tpu.memory_space<vmem>>, vector<16x16xbf16>
    %c0_195 = arith.constant 0 : index
    %c0_196 = arith.constant 0 : index
    %215 = vector.load %arg13[%c0_195, %c0_196] : memref<1x16xf32, #tpu.memory_space<vmem>>, vector<1x16xf32>
    %c0_197 = arith.constant 0 : index
    %c0_198 = arith.constant 0 : index
    %216 = vector.load %arg14[%c0_197, %c0_198] : memref<1x16xf32, #tpu.memory_space<vmem>>, vector<1x16xf32>
    %c0_i32_199 = arith.constant 0 : i32
    %c8_i32 = arith.constant 8 : i32
    %217 = arith.addi %c0_i32_199, %c8_i32 : i32
    %c1_i32_200 = arith.constant 1 : i32
    scf.for %arg27 = %c0_i32_199 to %217 step %c1_i32_200  : i32 {
      %cst_258 = arith.constant 0.000000e+00 : f32
      %271 = vector.broadcast %cst_258 : f32 to vector<8x16xf32>
      %c0_i32_259 = arith.constant 0 : i32
      %272 = arith.addi %arg27, %c0_i32_259 : i32
      %273 = arith.index_cast %272 : i32 to index
      %c0_260 = arith.constant 0 : index
      %c0_261 = arith.constant 0 : index
      %274 = vector.load %arg24[%273, %c0_260, %c0_261] : memref<10x10x16xbf16, #tpu.memory_space<vmem>>, vector<1x8x16xbf16>
      %275 = vector.shape_cast %274 : vector<1x8x16xbf16> to vector<8x16xbf16>
      %cst_262 = arith.constant dense<0.000000e+00> : vector<8x16xf32>
      %276 = tpu.matmul %275, %206, %cst_262 {dimension_numbers = #tpu.dot_dimension_numbers<[1], [0], [0], [1], [0, 0, 1, 1], [], []>} : vector<8x16xbf16>, vector<16x16xbf16>, vector<8x16xf32> -> vector<8x16xf32>
      %277 = arith.addf %271, %276 : vector<8x16xf32>
      %c0_i32_263 = arith.constant 0 : i32
      %278 = arith.addi %arg27, %c0_i32_263 : i32
      %279 = arith.index_cast %278 : i32 to index
      %c1_264 = arith.constant 1 : index
      %c0_265 = arith.constant 0 : index
      %280 = vector.load %arg24[%279, %c1_264, %c0_265] : memref<10x10x16xbf16, #tpu.memory_space<vmem>>, vector<1x8x16xbf16>
      %281 = vector.shape_cast %280 : vector<1x8x16xbf16> to vector<8x16xbf16>
      %cst_266 = arith.constant dense<0.000000e+00> : vector<8x16xf32>
      %282 = tpu.matmul %281, %207, %cst_266 {dimension_numbers = #tpu.dot_dimension_numbers<[1], [0], [0], [1], [0, 0, 1, 1], [], []>} : vector<8x16xbf16>, vector<16x16xbf16>, vector<8x16xf32> -> vector<8x16xf32>
      %283 = arith.addf %277, %282 : vector<8x16xf32>
      %c0_i32_267 = arith.constant 0 : i32
      %284 = arith.addi %arg27, %c0_i32_267 : i32
      %285 = arith.index_cast %284 : i32 to index
      %c2_268 = arith.constant 2 : index
      %c0_269 = arith.constant 0 : index
      %286 = vector.load %arg24[%285, %c2_268, %c0_269] : memref<10x10x16xbf16, #tpu.memory_space<vmem>>, vector<1x8x16xbf16>
      %287 = vector.shape_cast %286 : vector<1x8x16xbf16> to vector<8x16xbf16>
      %cst_270 = arith.constant dense<0.000000e+00> : vector<8x16xf32>
      %288 = tpu.matmul %287, %208, %cst_270 {dimension_numbers = #tpu.dot_dimension_numbers<[1], [0], [0], [1], [0, 0, 1, 1], [], []>} : vector<8x16xbf16>, vector<16x16xbf16>, vector<8x16xf32> -> vector<8x16xf32>
      %289 = arith.addf %283, %288 : vector<8x16xf32>
      %c1_i32_271 = arith.constant 1 : i32
      %290 = arith.addi %arg27, %c1_i32_271 : i32
      %291 = arith.index_cast %290 : i32 to index
      %c0_272 = arith.constant 0 : index
      %c0_273 = arith.constant 0 : index
      %292 = vector.load %arg24[%291, %c0_272, %c0_273] : memref<10x10x16xbf16, #tpu.memory_space<vmem>>, vector<1x8x16xbf16>
      %293 = vector.shape_cast %292 : vector<1x8x16xbf16> to vector<8x16xbf16>
      %cst_274 = arith.constant dense<0.000000e+00> : vector<8x16xf32>
      %294 = tpu.matmul %293, %209, %cst_274 {dimension_numbers = #tpu.dot_dimension_numbers<[1], [0], [0], [1], [0, 0, 1, 1], [], []>} : vector<8x16xbf16>, vector<16x16xbf16>, vector<8x16xf32> -> vector<8x16xf32>
      %295 = arith.addf %289, %294 : vector<8x16xf32>
      %c1_i32_275 = arith.constant 1 : i32
      %296 = arith.addi %arg27, %c1_i32_275 : i32
      %297 = arith.index_cast %296 : i32 to index
      %c1_276 = arith.constant 1 : index
      %c0_277 = arith.constant 0 : index
      %298 = vector.load %arg24[%297, %c1_276, %c0_277] : memref<10x10x16xbf16, #tpu.memory_space<vmem>>, vector<1x8x16xbf16>
      %299 = vector.shape_cast %298 : vector<1x8x16xbf16> to vector<8x16xbf16>
      %cst_278 = arith.constant dense<0.000000e+00> : vector<8x16xf32>
      %300 = tpu.matmul %299, %210, %cst_278 {dimension_numbers = #tpu.dot_dimension_numbers<[1], [0], [0], [1], [0, 0, 1, 1], [], []>} : vector<8x16xbf16>, vector<16x16xbf16>, vector<8x16xf32> -> vector<8x16xf32>
      %301 = arith.addf %295, %300 : vector<8x16xf32>
      %c1_i32_279 = arith.constant 1 : i32
      %302 = arith.addi %arg27, %c1_i32_279 : i32
      %303 = arith.index_cast %302 : i32 to index
      %c2_280 = arith.constant 2 : index
      %c0_281 = arith.constant 0 : index
      %304 = vector.load %arg24[%303, %c2_280, %c0_281] : memref<10x10x16xbf16, #tpu.memory_space<vmem>>, vector<1x8x16xbf16>
      %305 = vector.shape_cast %304 : vector<1x8x16xbf16> to vector<8x16xbf16>
      %cst_282 = arith.constant dense<0.000000e+00> : vector<8x16xf32>
      %306 = tpu.matmul %305, %211, %cst_282 {dimension_numbers = #tpu.dot_dimension_numbers<[1], [0], [0], [1], [0, 0, 1, 1], [], []>} : vector<8x16xbf16>, vector<16x16xbf16>, vector<8x16xf32> -> vector<8x16xf32>
      %307 = arith.addf %301, %306 : vector<8x16xf32>
      %c2_i32_283 = arith.constant 2 : i32
      %308 = arith.addi %arg27, %c2_i32_283 : i32
      %309 = arith.index_cast %308 : i32 to index
      %c0_284 = arith.constant 0 : index
      %c0_285 = arith.constant 0 : index
      %310 = vector.load %arg24[%309, %c0_284, %c0_285] : memref<10x10x16xbf16, #tpu.memory_space<vmem>>, vector<1x8x16xbf16>
      %311 = vector.shape_cast %310 : vector<1x8x16xbf16> to vector<8x16xbf16>
      %cst_286 = arith.constant dense<0.000000e+00> : vector<8x16xf32>
      %312 = tpu.matmul %311, %212, %cst_286 {dimension_numbers = #tpu.dot_dimension_numbers<[1], [0], [0], [1], [0, 0, 1, 1], [], []>} : vector<8x16xbf16>, vector<16x16xbf16>, vector<8x16xf32> -> vector<8x16xf32>
      %313 = arith.addf %307, %312 : vector<8x16xf32>
      %c2_i32_287 = arith.constant 2 : i32
      %314 = arith.addi %arg27, %c2_i32_287 : i32
      %315 = arith.index_cast %314 : i32 to index
      %c1_288 = arith.constant 1 : index
      %c0_289 = arith.constant 0 : index
      %316 = vector.load %arg24[%315, %c1_288, %c0_289] : memref<10x10x16xbf16, #tpu.memory_space<vmem>>, vector<1x8x16xbf16>
      %317 = vector.shape_cast %316 : vector<1x8x16xbf16> to vector<8x16xbf16>
      %cst_290 = arith.constant dense<0.000000e+00> : vector<8x16xf32>
      %318 = tpu.matmul %317, %213, %cst_290 {dimension_numbers = #tpu.dot_dimension_numbers<[1], [0], [0], [1], [0, 0, 1, 1], [], []>} : vector<8x16xbf16>, vector<16x16xbf16>, vector<8x16xf32> -> vector<8x16xf32>
      %319 = arith.addf %313, %318 : vector<8x16xf32>
      %c2_i32_291 = arith.constant 2 : i32
      %320 = arith.addi %arg27, %c2_i32_291 : i32
      %321 = arith.index_cast %320 : i32 to index
      %c2_292 = arith.constant 2 : index
      %c0_293 = arith.constant 0 : index
      %322 = vector.load %arg24[%321, %c2_292, %c0_293] : memref<10x10x16xbf16, #tpu.memory_space<vmem>>, vector<1x8x16xbf16>
      %323 = vector.shape_cast %322 : vector<1x8x16xbf16> to vector<8x16xbf16>
      %cst_294 = arith.constant dense<0.000000e+00> : vector<8x16xf32>
      %324 = tpu.matmul %323, %214, %cst_294 {dimension_numbers = #tpu.dot_dimension_numbers<[1], [0], [0], [1], [0, 0, 1, 1], [], []>} : vector<8x16xbf16>, vector<16x16xbf16>, vector<8x16xf32> -> vector<8x16xf32>
      %325 = arith.addf %319, %324 : vector<8x16xf32>
      %cst_295 = arith.constant 0.000000e+00 : f32
      %326 = vector.broadcast %cst_295 : f32 to vector<8x16xf32>
      %327 = arith.maximumf %325, %326 : vector<8x16xf32>
      %328 = vector.broadcast %215 : vector<1x16xf32> to vector<8x16xf32>
      %329 = arith.mulf %327, %328 : vector<8x16xf32>
      %330 = vector.broadcast %216 : vector<1x16xf32> to vector<8x16xf32>
      %331 = arith.addf %329, %330 : vector<8x16xf32>
      %332 = arith.truncf %331 : vector<8x16xf32> to vector<8x16xbf16>
      %333 = arith.index_cast %arg27 : i32 to index
      %c0_296 = arith.constant 0 : index
      %c0_297 = arith.constant 0 : index
      %334 = vector.load %arg25[%333, %c0_296, %c0_297] : memref<8x8x16xbf16, #tpu.memory_space<vmem>>, vector<1x8x16xbf16>
      %335 = vector.shape_cast %334 : vector<1x8x16xbf16> to vector<8x16xbf16>
      %336 = vector.shape_cast %332 : vector<8x16xbf16> to vector<1x8x16xbf16>
      tpu.vector_store %arg25[%333, %c0_296, %c0_297], %336 {strides = array<i32>} : memref<8x8x16xbf16, #tpu.memory_space<vmem>>, vector<1x8x16xbf16>,
    }
    %c8_i32_201 = arith.constant 8 : i32
    %c0_202 = arith.constant 0 : index
    %c0_203 = arith.constant 0 : index
    %218 = vector.load %arg15[%c0_202, %c0_203] : memref<144x16xbf16, #tpu.memory_space<vmem>>, vector<16x16xbf16>
    %c16_204 = arith.constant 16 : index
    %c0_205 = arith.constant 0 : index
    %219 = vector.load %arg15[%c16_204, %c0_205] : memref<144x16xbf16, #tpu.memory_space<vmem>>, vector<16x16xbf16>
    %c32_206 = arith.constant 32 : index
    %c0_207 = arith.constant 0 : index
    %220 = vector.load %arg15[%c32_206, %c0_207] : memref<144x16xbf16, #tpu.memory_space<vmem>>, vector<16x16xbf16>
    %c48_208 = arith.constant 48 : index
    %c0_209 = arith.constant 0 : index
    %221 = vector.load %arg15[%c48_208, %c0_209] : memref<144x16xbf16, #tpu.memory_space<vmem>>, vector<16x16xbf16>
    %c64_210 = arith.constant 64 : index
    %c0_211 = arith.constant 0 : index
    %222 = vector.load %arg15[%c64_210, %c0_211] : memref<144x16xbf16, #tpu.memory_space<vmem>>, vector<16x16xbf16>
    %c80_212 = arith.constant 80 : index
    %c0_213 = arith.constant 0 : index
    %223 = vector.load %arg15[%c80_212, %c0_213] : memref<144x16xbf16, #tpu.memory_space<vmem>>, vector<16x16xbf16>
    %c96_214 = arith.constant 96 : index
    %c0_215 = arith.constant 0 : index
    %224 = vector.load %arg15[%c96_214, %c0_215] : memref<144x16xbf16, #tpu.memory_space<vmem>>, vector<16x16xbf16>
    %c112_216 = arith.constant 112 : index
    %c0_217 = arith.constant 0 : index
    %225 = vector.load %arg15[%c112_216, %c0_217] : memref<144x16xbf16, #tpu.memory_space<vmem>>, vector<16x16xbf16>
    %c128_218 = arith.constant 128 : index
    %c0_219 = arith.constant 0 : index
    %226 = vector.load %arg15[%c128_218, %c0_219] : memref<144x16xbf16, #tpu.memory_space<vmem>>, vector<16x16xbf16>
    %c0_220 = arith.constant 0 : index
    %c0_221 = arith.constant 0 : index
    %227 = vector.load %arg16[%c0_220, %c0_221] : memref<1x16xf32, #tpu.memory_space<vmem>>, vector<1x16xf32>
    %c0_222 = arith.constant 0 : index
    %c0_223 = arith.constant 0 : index
    %228 = vector.load %arg17[%c0_222, %c0_223] : memref<1x16xf32, #tpu.memory_space<vmem>>, vector<1x16xf32>
    %c0_i32_224 = arith.constant 0 : i32
    %c6_i32 = arith.constant 6 : i32
    %229 = arith.addi %c0_i32_224, %c6_i32 : i32
    %c1_i32_225 = arith.constant 1 : i32
    scf.for %arg27 = %c0_i32_224 to %229 step %c1_i32_225  : i32 {
      %cst_258 = arith.constant 0.000000e+00 : f32
      %271 = vector.broadcast %cst_258 : f32 to vector<6x16xf32>
      %c0_i32_259 = arith.constant 0 : i32
      %272 = arith.addi %arg27, %c0_i32_259 : i32
      %273 = arith.index_cast %272 : i32 to index
      %c0_260 = arith.constant 0 : index
      %c0_261 = arith.constant 0 : index
      %274 = vector.load %arg25[%273, %c0_260, %c0_261] : memref<8x8x16xbf16, #tpu.memory_space<vmem>>, vector<1x6x16xbf16>
      %275 = vector.shape_cast %274 : vector<1x6x16xbf16> to vector<6x16xbf16>
      %cst_262 = arith.constant dense<0.000000e+00> : vector<6x16xf32>
      %276 = tpu.matmul %275, %218, %cst_262 {dimension_numbers = #tpu.dot_dimension_numbers<[1], [0], [0], [1], [0, 0, 1, 1], [], []>} : vector<6x16xbf16>, vector<16x16xbf16>, vector<6x16xf32> -> vector<6x16xf32>
      %277 = arith.addf %271, %276 : vector<6x16xf32>
      %c0_i32_263 = arith.constant 0 : i32
      %278 = arith.addi %arg27, %c0_i32_263 : i32
      %279 = arith.index_cast %278 : i32 to index
      %c1_264 = arith.constant 1 : index
      %c0_265 = arith.constant 0 : index
      %280 = vector.load %arg25[%279, %c1_264, %c0_265] : memref<8x8x16xbf16, #tpu.memory_space<vmem>>, vector<1x6x16xbf16>
      %281 = vector.shape_cast %280 : vector<1x6x16xbf16> to vector<6x16xbf16>
      %cst_266 = arith.constant dense<0.000000e+00> : vector<6x16xf32>
      %282 = tpu.matmul %281, %219, %cst_266 {dimension_numbers = #tpu.dot_dimension_numbers<[1], [0], [0], [1], [0, 0, 1, 1], [], []>} : vector<6x16xbf16>, vector<16x16xbf16>, vector<6x16xf32> -> vector<6x16xf32>
      %283 = arith.addf %277, %282 : vector<6x16xf32>
      %c0_i32_267 = arith.constant 0 : i32
      %284 = arith.addi %arg27, %c0_i32_267 : i32
      %285 = arith.index_cast %284 : i32 to index
      %c2_268 = arith.constant 2 : index
      %c0_269 = arith.constant 0 : index
      %286 = vector.load %arg25[%285, %c2_268, %c0_269] : memref<8x8x16xbf16, #tpu.memory_space<vmem>>, vector<1x6x16xbf16>
      %287 = vector.shape_cast %286 : vector<1x6x16xbf16> to vector<6x16xbf16>
      %cst_270 = arith.constant dense<0.000000e+00> : vector<6x16xf32>
      %288 = tpu.matmul %287, %220, %cst_270 {dimension_numbers = #tpu.dot_dimension_numbers<[1], [0], [0], [1], [0, 0, 1, 1], [], []>} : vector<6x16xbf16>, vector<16x16xbf16>, vector<6x16xf32> -> vector<6x16xf32>
      %289 = arith.addf %283, %288 : vector<6x16xf32>
      %c1_i32_271 = arith.constant 1 : i32
      %290 = arith.addi %arg27, %c1_i32_271 : i32
      %291 = arith.index_cast %290 : i32 to index
      %c0_272 = arith.constant 0 : index
      %c0_273 = arith.constant 0 : index
      %292 = vector.load %arg25[%291, %c0_272, %c0_273] : memref<8x8x16xbf16, #tpu.memory_space<vmem>>, vector<1x6x16xbf16>
      %293 = vector.shape_cast %292 : vector<1x6x16xbf16> to vector<6x16xbf16>
      %cst_274 = arith.constant dense<0.000000e+00> : vector<6x16xf32>
      %294 = tpu.matmul %293, %221, %cst_274 {dimension_numbers = #tpu.dot_dimension_numbers<[1], [0], [0], [1], [0, 0, 1, 1], [], []>} : vector<6x16xbf16>, vector<16x16xbf16>, vector<6x16xf32> -> vector<6x16xf32>
      %295 = arith.addf %289, %294 : vector<6x16xf32>
      %c1_i32_275 = arith.constant 1 : i32
      %296 = arith.addi %arg27, %c1_i32_275 : i32
      %297 = arith.index_cast %296 : i32 to index
      %c1_276 = arith.constant 1 : index
      %c0_277 = arith.constant 0 : index
      %298 = vector.load %arg25[%297, %c1_276, %c0_277] : memref<8x8x16xbf16, #tpu.memory_space<vmem>>, vector<1x6x16xbf16>
      %299 = vector.shape_cast %298 : vector<1x6x16xbf16> to vector<6x16xbf16>
      %cst_278 = arith.constant dense<0.000000e+00> : vector<6x16xf32>
      %300 = tpu.matmul %299, %222, %cst_278 {dimension_numbers = #tpu.dot_dimension_numbers<[1], [0], [0], [1], [0, 0, 1, 1], [], []>} : vector<6x16xbf16>, vector<16x16xbf16>, vector<6x16xf32> -> vector<6x16xf32>
      %301 = arith.addf %295, %300 : vector<6x16xf32>
      %c1_i32_279 = arith.constant 1 : i32
      %302 = arith.addi %arg27, %c1_i32_279 : i32
      %303 = arith.index_cast %302 : i32 to index
      %c2_280 = arith.constant 2 : index
      %c0_281 = arith.constant 0 : index
      %304 = vector.load %arg25[%303, %c2_280, %c0_281] : memref<8x8x16xbf16, #tpu.memory_space<vmem>>, vector<1x6x16xbf16>
      %305 = vector.shape_cast %304 : vector<1x6x16xbf16> to vector<6x16xbf16>
      %cst_282 = arith.constant dense<0.000000e+00> : vector<6x16xf32>
      %306 = tpu.matmul %305, %223, %cst_282 {dimension_numbers = #tpu.dot_dimension_numbers<[1], [0], [0], [1], [0, 0, 1, 1], [], []>} : vector<6x16xbf16>, vector<16x16xbf16>, vector<6x16xf32> -> vector<6x16xf32>
      %307 = arith.addf %301, %306 : vector<6x16xf32>
      %c2_i32_283 = arith.constant 2 : i32
      %308 = arith.addi %arg27, %c2_i32_283 : i32
      %309 = arith.index_cast %308 : i32 to index
      %c0_284 = arith.constant 0 : index
      %c0_285 = arith.constant 0 : index
      %310 = vector.load %arg25[%309, %c0_284, %c0_285] : memref<8x8x16xbf16, #tpu.memory_space<vmem>>, vector<1x6x16xbf16>
      %311 = vector.shape_cast %310 : vector<1x6x16xbf16> to vector<6x16xbf16>
      %cst_286 = arith.constant dense<0.000000e+00> : vector<6x16xf32>
      %312 = tpu.matmul %311, %224, %cst_286 {dimension_numbers = #tpu.dot_dimension_numbers<[1], [0], [0], [1], [0, 0, 1, 1], [], []>} : vector<6x16xbf16>, vector<16x16xbf16>, vector<6x16xf32> -> vector<6x16xf32>
      %313 = arith.addf %307, %312 : vector<6x16xf32>
      %c2_i32_287 = arith.constant 2 : i32
      %314 = arith.addi %arg27, %c2_i32_287 : i32
      %315 = arith.index_cast %314 : i32 to index
      %c1_288 = arith.constant 1 : index
      %c0_289 = arith.constant 0 : index
      %316 = vector.load %arg25[%315, %c1_288, %c0_289] : memref<8x8x16xbf16, #tpu.memory_space<vmem>>, vector<1x6x16xbf16>
      %317 = vector.shape_cast %316 : vector<1x6x16xbf16> to vector<6x16xbf16>
      %cst_290 = arith.constant dense<0.000000e+00> : vector<6x16xf32>
      %318 = tpu.matmul %317, %225, %cst_290 {dimension_numbers = #tpu.dot_dimension_numbers<[1], [0], [0], [1], [0, 0, 1, 1], [], []>} : vector<6x16xbf16>, vector<16x16xbf16>, vector<6x16xf32> -> vector<6x16xf32>
      %319 = arith.addf %313, %318 : vector<6x16xf32>
      %c2_i32_291 = arith.constant 2 : i32
      %320 = arith.addi %arg27, %c2_i32_291 : i32
      %321 = arith.index_cast %320 : i32 to index
      %c2_292 = arith.constant 2 : index
      %c0_293 = arith.constant 0 : index
      %322 = vector.load %arg25[%321, %c2_292, %c0_293] : memref<8x8x16xbf16, #tpu.memory_space<vmem>>, vector<1x6x16xbf16>
      %323 = vector.shape_cast %322 : vector<1x6x16xbf16> to vector<6x16xbf16>
      %cst_294 = arith.constant dense<0.000000e+00> : vector<6x16xf32>
      %324 = tpu.matmul %323, %226, %cst_294 {dimension_numbers = #tpu.dot_dimension_numbers<[1], [0], [0], [1], [0, 0, 1, 1], [], []>} : vector<6x16xbf16>, vector<16x16xbf16>, vector<6x16xf32> -> vector<6x16xf32>
      %325 = arith.addf %319, %324 : vector<6x16xf32>
      %cst_295 = arith.constant 0.000000e+00 : f32
      %326 = vector.broadcast %cst_295 : f32 to vector<6x16xf32>
      %327 = arith.maximumf %325, %326 : vector<6x16xf32>
      %328 = vector.broadcast %227 : vector<1x16xf32> to vector<6x16xf32>
      %329 = arith.mulf %327, %328 : vector<6x16xf32>
      %330 = vector.broadcast %228 : vector<1x16xf32> to vector<6x16xf32>
      %331 = arith.addf %329, %330 : vector<6x16xf32>
      %332 = arith.index_cast %arg27 : i32 to index
      %c0_296 = arith.constant 0 : index
      %c0_297 = arith.constant 0 : index
      %333 = vector.load %arg26[%332, %c0_296, %c0_297] : memref<6x6x16xf32, #tpu.memory_space<vmem>>, vector<1x6x16xf32>
      %334 = vector.shape_cast %333 : vector<1x6x16xf32> to vector<6x16xf32>
      %335 = vector.shape_cast %331 : vector<6x16xf32> to vector<1x6x16xf32>
      tpu.vector_store %arg26[%332, %c0_296, %c0_297], %335 {strides = array<i32>} : memref<6x6x16xf32, #tpu.memory_space<vmem>>, vector<1x6x16xf32>,
    }
    %c6_i32_226 = arith.constant 6 : i32
    %c0_227 = arith.constant 0 : index
    %c0_228 = arith.constant 0 : index
    %c0_229 = arith.constant 0 : index
    %230 = vector.load %arg26[%c0_227, %c0_228, %c0_229] : memref<6x6x16xf32, #tpu.memory_space<vmem>>, vector<1x6x16xf32>
    %231 = vector.shape_cast %230 : vector<1x6x16xf32> to vector<6x16xf32>
    %c1_230 = arith.constant 1 : index
    %c0_231 = arith.constant 0 : index
    %c0_232 = arith.constant 0 : index
    %232 = vector.load %arg26[%c1_230, %c0_231, %c0_232] : memref<6x6x16xf32, #tpu.memory_space<vmem>>, vector<1x6x16xf32>
    %233 = vector.shape_cast %232 : vector<1x6x16xf32> to vector<6x16xf32>
    %234 = arith.addf %231, %233 : vector<6x16xf32>
    %c2_233 = arith.constant 2 : index
    %c0_234 = arith.constant 0 : index
    %c0_235 = arith.constant 0 : index
    %235 = vector.load %arg26[%c2_233, %c0_234, %c0_235] : memref<6x6x16xf32, #tpu.memory_space<vmem>>, vector<1x6x16xf32>
    %236 = vector.shape_cast %235 : vector<1x6x16xf32> to vector<6x16xf32>
    %237 = arith.addf %234, %236 : vector<6x16xf32>
    %c3_236 = arith.constant 3 : index
    %c0_237 = arith.constant 0 : index
    %c0_238 = arith.constant 0 : index
    %238 = vector.load %arg26[%c3_236, %c0_237, %c0_238] : memref<6x6x16xf32, #tpu.memory_space<vmem>>, vector<1x6x16xf32>
    %239 = vector.shape_cast %238 : vector<1x6x16xf32> to vector<6x16xf32>
    %240 = arith.addf %237, %239 : vector<6x16xf32>
    %c4_239 = arith.constant 4 : index
    %c0_240 = arith.constant 0 : index
    %c0_241 = arith.constant 0 : index
    %241 = vector.load %arg26[%c4_239, %c0_240, %c0_241] : memref<6x6x16xf32, #tpu.memory_space<vmem>>, vector<1x6x16xf32>
    %242 = vector.shape_cast %241 : vector<1x6x16xf32> to vector<6x16xf32>
    %243 = arith.addf %240, %242 : vector<6x16xf32>
    %c5_242 = arith.constant 5 : index
    %c0_243 = arith.constant 0 : index
    %c0_244 = arith.constant 0 : index
    %244 = vector.load %arg26[%c5_242, %c0_243, %c0_244] : memref<6x6x16xf32, #tpu.memory_space<vmem>>, vector<1x6x16xf32>
    %245 = vector.shape_cast %244 : vector<1x6x16xf32> to vector<6x16xf32>
    %246 = arith.addf %243, %245 : vector<6x16xf32>
    %cst_245 = arith.constant dense<0.000000e+00> : vector<16xf32>
    %247 = vector.multi_reduction <add>, %246, %cst_245 [0] : vector<6x16xf32> to vector<16xf32>
    %248 = vector.shape_cast %247 : vector<16xf32> to vector<1x16xf32>
    %cst_246 = arith.constant 0.027777778 : f32
    %249 = vector.broadcast %cst_246 : f32 to vector<1x16xf32>
    %250 = arith.mulf %248, %249 : vector<1x16xf32>
    %251 = arith.truncf %250 : vector<1x16xf32> to vector<1x16xbf16>
    %c0_247 = arith.constant 0 : index
    %c0_248 = arith.constant 0 : index
    %252 = vector.load %arg18[%c0_247, %c0_248] : memref<16x16xbf16, #tpu.memory_space<vmem>>, vector<16x16xbf16>
    %cst_249 = arith.constant dense<0.000000e+00> : vector<1x16xf32>
    %253 = tpu.matmul %251, %252, %cst_249 {dimension_numbers = #tpu.dot_dimension_numbers<[1], [0], [0], [1], [0, 0, 1, 1], [], []>} : vector<1x16xbf16>, vector<16x16xbf16>, vector<1x16xf32> -> vector<1x16xf32>
    %254 = arith.truncf %253 : vector<1x16xf32> to vector<1x16xbf16>
    %c0_250 = arith.constant 0 : index
    %c0_251 = arith.constant 0 : index
    %255 = vector.load %arg19[%c0_250, %c0_251] : memref<16x10xbf16, #tpu.memory_space<vmem>>, vector<16x10xbf16>
    %cst_252 = arith.constant dense<0.000000e+00> : vector<1x10xf32>
    %256 = tpu.matmul %254, %255, %cst_252 {dimension_numbers = #tpu.dot_dimension_numbers<[1], [0], [0], [1], [0, 0, 1, 1], [], []>} : vector<1x16xbf16>, vector<16x10xbf16>, vector<1x10xf32> -> vector<1x10xf32>
    %cst_253 = arith.constant dense<0xFF800000> : vector<1xf32>
    %257 = vector.multi_reduction <maximumf>, %256, %cst_253 [1] : vector<1x10xf32> to vector<1xf32>
    %258 = vector.shape_cast %257 : vector<1xf32> to vector<1x1xf32>
    %259 = vector.broadcast %258 : vector<1x1xf32> to vector<1x10xf32>
    %260 = arith.subf %256, %259 : vector<1x10xf32>
    %261 = math.exp %260 : vector<1x10xf32>
    %cst_254 = arith.constant dense<0.000000e+00> : vector<1xf32>
    %262 = vector.multi_reduction <add>, %261, %cst_254 [1] : vector<1x10xf32> to vector<1xf32>
    %263 = vector.shape_cast %262 : vector<1xf32> to vector<1x1xf32>
    %264 = math.log %263 : vector<1x1xf32>
    %265 = arith.addf %258, %264 : vector<1x1xf32>
    %266 = vector.broadcast %265 : vector<1x1xf32> to vector<1x10xf32>
    %267 = arith.subf %256, %266 : vector<1x10xf32>
    %c0_255 = arith.constant 0 : index
    %c0_256 = arith.constant 0 : index
    %c0_257 = arith.constant 0 : index
    %268 = vector.load %arg20[%c0_255, %c0_256, %c0_257] : memref<1x1x10xf32, #tpu.memory_space<vmem>>, vector<1x1x10xf32>
    %269 = vector.shape_cast %268 : vector<1x1x10xf32> to vector<1x10xf32>
    %270 = vector.shape_cast %267 : vector<1x10xf32> to vector<1x1x10xf32>
    tpu.vector_store %arg20[%c0_255, %c0_256, %c0_257], %270 {strides = array<i32>} : memref<1x1x10xf32, #tpu.memory_space<vmem>>, vector<1x1x10xf32>,
    return
  }
  func.func @transform_0(%arg0: i32) -> (i32, i32, i32, i32) {
    %c0_i32 = arith.constant 0 : i32
    %c0_i32_0 = arith.constant 0 : i32
    %c0_i32_1 = arith.constant 0 : i32
    %c0_i32_2 = arith.constant 0 : i32
    return %arg0, %c0_i32, %c0_i32_0, %c0_i32_1 : i32, i32, i32, i32
  }
  func.func @transform_1(%arg0: i32) -> (i32, i32) {
    %c0_i32 = arith.constant 0 : i32
    %c0_i32_0 = arith.constant 0 : i32
    %c0_i32_1 = arith.constant 0 : i32
    return %c0_i32, %c0_i32_0 : i32, i32
  }
  func.func @transform_2(%arg0: i32) -> (i32, i32) {
    %c0_i32 = arith.constant 0 : i32
    %c0_i32_0 = arith.constant 0 : i32
    %c0_i32_1 = arith.constant 0 : i32
    return %c0_i32, %c0_i32_0 : i32, i32
  }
  func.func @transform_3(%arg0: i32) -> (i32, i32) {
    %c0_i32 = arith.constant 0 : i32
    %c0_i32_0 = arith.constant 0 : i32
    %c0_i32_1 = arith.constant 0 : i32
    return %c0_i32, %c0_i32_0 : i32, i32
  }
  func.func @transform_4(%arg0: i32) -> (i32, i32) {
    %c0_i32 = arith.constant 0 : i32
    %c0_i32_0 = arith.constant 0 : i32
    %c0_i32_1 = arith.constant 0 : i32
    return %c0_i32, %c0_i32_0 : i32, i32
  }
  func.func @transform_5(%arg0: i32) -> (i32, i32) {
    %c0_i32 = arith.constant 0 : i32
    %c0_i32_0 = arith.constant 0 : i32
    %c0_i32_1 = arith.constant 0 : i32
    return %c0_i32, %c0_i32_0 : i32, i32
  }
  func.func @transform_6(%arg0: i32) -> (i32, i32) {
    %c0_i32 = arith.constant 0 : i32
    %c0_i32_0 = arith.constant 0 : i32
    %c0_i32_1 = arith.constant 0 : i32
    return %c0_i32, %c0_i32_0 : i32, i32
  }
  func.func @transform_7(%arg0: i32) -> (i32, i32) {
    %c0_i32 = arith.constant 0 : i32
    %c0_i32_0 = arith.constant 0 : i32
    %c0_i32_1 = arith.constant 0 : i32
    return %c0_i32, %c0_i32_0 : i32, i32
  }
  func.func @transform_8(%arg0: i32) -> (i32, i32) {
    %c0_i32 = arith.constant 0 : i32
    %c0_i32_0 = arith.constant 0 : i32
    %c0_i32_1 = arith.constant 0 : i32
    return %c0_i32, %c0_i32_0 : i32, i32
  }
  func.func @transform_9(%arg0: i32) -> (i32, i32) {
    %c0_i32 = arith.constant 0 : i32
    %c0_i32_0 = arith.constant 0 : i32
    %c0_i32_1 = arith.constant 0 : i32
    return %c0_i32, %c0_i32_0 : i32, i32
  }
  func.func @transform_10(%arg0: i32) -> (i32, i32) {
    %c0_i32 = arith.constant 0 : i32
    %c0_i32_0 = arith.constant 0 : i32
    %c0_i32_1 = arith.constant 0 : i32
    return %c0_i32, %c0_i32_0 : i32, i32
  }
  func.func @transform_11(%arg0: i32) -> (i32, i32) {
    %c0_i32 = arith.constant 0 : i32
    %c0_i32_0 = arith.constant 0 : i32
    %c0_i32_1 = arith.constant 0 : i32
    return %c0_i32, %c0_i32_0 : i32, i32
  }
  func.func @transform_12(%arg0: i32) -> (i32, i32) {
    %c0_i32 = arith.constant 0 : i32
    %c0_i32_0 = arith.constant 0 : i32
    %c0_i32_1 = arith.constant 0 : i32
    return %c0_i32, %c0_i32_0 : i32, i32
  }
  func.func @transform_13(%arg0: i32) -> (i32, i32) {
    %c0_i32 = arith.constant 0 : i32
    %c0_i32_0 = arith.constant 0 : i32
    %c0_i32_1 = arith.constant 0 : i32
    return %c0_i32, %c0_i32_0 : i32, i32
  }
  func.func @transform_14(%arg0: i32) -> (i32, i32) {
    %c0_i32 = arith.constant 0 : i32
    %c0_i32_0 = arith.constant 0 : i32
    %c0_i32_1 = arith.constant 0 : i32
    return %c0_i32, %c0_i32_0 : i32, i32
  }
  func.func @transform_15(%arg0: i32) -> (i32, i32) {
    %c0_i32 = arith.constant 0 : i32
    %c0_i32_0 = arith.constant 0 : i32
    %c0_i32_1 = arith.constant 0 : i32
    return %c0_i32, %c0_i32_0 : i32, i32
  }
  func.func @transform_16(%arg0: i32) -> (i32, i32) {
    %c0_i32 = arith.constant 0 : i32
    %c0_i32_0 = arith.constant 0 : i32
    %c0_i32_1 = arith.constant 0 : i32
    return %c0_i32, %c0_i32_0 : i32, i32
  }
  func.func @transform_17(%arg0: i32) -> (i32, i32) {
    %c0_i32 = arith.constant 0 : i32
    %c0_i32_0 = arith.constant 0 : i32
    %c0_i32_1 = arith.constant 0 : i32
    return %c0_i32, %c0_i32_0 : i32, i32
  }
  func.func @transform_18(%arg0: i32) -> (i32, i32) {
    %c0_i32 = arith.constant 0 : i32
    %c0_i32_0 = arith.constant 0 : i32
    %c0_i32_1 = arith.constant 0 : i32
    return %c0_i32, %c0_i32_0 : i32, i32
  }
  func.func @transform_19(%arg0: i32) -> (i32, i32, i32) {
    %c0_i32 = arith.constant 0 : i32
    %c0_i32_0 = arith.constant 0 : i32
    %c0_i32_1 = arith.constant 0 : i32
    return %arg0, %c0_i32, %c0_i32_0 : i32, i32, i32
  }
}

</mosaic_0001>

<bundles_post_ra>
// kernel: model2_forward.1
= control target key start
LH: loop header
LB: loop body
LE: loop exit
PB: predicated region body
PF: predicated region fallthrough
CT: control target
= control target key end

     0   :  { %s7835_s0 = inlined_call_operand.vmem [shape: bf16[2,28,28,1], index: 0, kind: input, shape index: {}]   ;;  %s7836_s1 = inlined_call_operand.vmem [shape: bf16[9,16], index: 1, kind: input, shape index: {}]   ;;  %s7837_s2 = inlined_call_operand.vmem [shape: f32[1,16], index: 2, kind: input, shape index: {}]   ;;  %s7838_s3 = inlined_call_operand.vmem [shape: f32[1,16], index: 3, kind: input, shape index: {}]   ;;  %s7839_s4 = inlined_call_operand.vmem [shape: bf16[144,8], index: 4, kind: input, shape index: {}]   ;;  %s7840_s5 = inlined_call_operand.vmem [shape: f32[1,8], index: 5, kind: input, shape index: {}]   ;;  %s7841_s6 = inlined_call_operand.vmem [shape: f32[1,8], index: 6, kind: input, shape index: {}]   ;;  %s7842_s7 = inlined_call_operand.vmem [shape: bf16[8,16], index: 7, kind: input, shape index: {}]   ;;  %s7843_s8 = inlined_call_operand.vmem [shape: bf16[144,16], index: 8, kind: input, shape index: {}]   ;;  %s7844_s9 = inlined_call_operand.vmem [shape: f32[1,16], index: 9, kind: input, shape index: {}]   ;;  %s7845_s10 = inlined_call_operand.vmem [shape: f32[1,16], index: 10, kind: input, shape index: {}]   ;;  %s7846_s11 = inlined_call_operand.vmem [shape: bf16[144,16], index: 11, kind: input, shape index: {}]   ;;  %s7847_s12 = inlined_call_operand.vmem [shape: f32[1,16], index: 12, kind: input, shape index: {}]   ;;  %s7848_s13 = inlined_call_operand.vmem [shape: f32[1,16], index: 13, kind: input, shape index: {}]   ;;  %s7849_s14 = inlined_call_operand.vmem [shape: bf16[144,16], index: 14, kind: input, shape index: {}]   ;;  %s7850_s15 = inlined_call_operand.vmem [shape: f32[1,16], index: 15, kind: input, shape index: {}]   ;;  %s7851_s16 = inlined_call_operand.vmem [shape: f32[1,16], index: 16, kind: input, shape index: {}]   ;;  %s7852_s17 = inlined_call_operand.vmem [shape: bf16[16,16], index: 17, kind: input, shape index: {}]   ;;  %s7853_s18 = inlined_call_operand.vmem [shape: bf16[16,10], index: 18, kind: input, shape index: {}]   ;;  %s7854_s19 = inlined_call_operand.hbm [shape: f32[2,1,10], index: 19, kind: output, shape index: {}]  }
   0x1   :  { %7867 = sst [smem:[#allocation19_spill]] %s7835_s0 }
   0x2   :  { %7868 = sst [smem:[#allocation20_spill]] %s7836_s1 }
   0x3   :  { %7869 = sst [smem:[#allocation21_spill]] %s7837_s2 }
   0x4   :  { %7870 = sst [smem:[#allocation22_spill]] %s7838_s3 }
   0x5   :  { %7871 = sst [smem:[#allocation23_spill]] %s7854_s19 }
   0x6   :  { %24 = vsyncpa [#allocation9], 0 }
   0x7   :  { %26 = vsyncpa [#allocation9 + $0x1], 0  ;;  %s6621_s0 = smov 0   ;;  %s6623_s30 = smov 0  }
   0x8   :  { %s6625_s20 = smov 0   ;;  %s6627_s21 = smov 0  }
   0x9 LB: > { %7872 = sst [smem:[#allocation11_spill]] %s6477_s0  ;;  %s6642_s1 = sadd.s32 4294967295, %s6489_s21   ;;  %s6489_s21 = sphi %s6627_s21, %s7894_s21   ;;  %s6485_s20 = sphi %s6625_s20, %s7896_s20   ;;  %s6481_s30 = sphi %s6623_s30, %s7898_s30   ;;  %s6477_s0 = sphi %s6621_s0, %s7897_s0  }
   0xa   : > { %7873 = sst [smem:[#allocation12_spill]] %s6485_s20  ;;  %s5292_s22 = sadd.s32 4294967294, %s6489_s21  }
   0xb   : > { %7874 = sst [smem:[#allocation13_spill]] %s6489_s21  ;;  %s6646_s2 = sadd.s32 1, %s6489_s21  }
   0xc   : > { %7875 = sst [smem:[#allocation14_spill]] %s6642_s1  ;;  %s443_s23 = sadd.s32 1, %s6485_s20 }
   0xd   : > { %7876 = sst [smem:[#allocation15_spill]] %s6646_s2  ;;  %s440_s24 = ssub.s32 %s6489_s21, %s6646_s2 }
   0xe   : > { %p453_p0 = scmp.ne.s32.totalorder %s6485_s20, %s6481_s30  ;;  %p441_p1 = scmp.eq.s32.totalorder %s440_s24, 0 }
   0xf   : > { %p454_p2 = scmp.eq.s32.totalorder %s6642_s1, 1  ;;  %p459_p3 = scmp.ne.s32.totalorder %s6481_s30, %s6477_s0 }
  0x10   : > { %p460_p4 = scmp.eq.s32.totalorder %s5292_s22, 1  ;;  %p5295_p7 = scmp.ge.s32.totalorder %s6489_s21, 1 }
  0x11   : > { %s6657_s25 = scalar_select %p441_p1, %s6485_s20, %s443_s23  }
  0x12   : > { %p6659_p5 = por %p454_p2, %p453_p0  ;;  %p6663_p6 = por %p460_p4, %p459_p3 }
  0x13   : > { %7877 = sst [smem:[#allocation16_spill]] %s6657_s25  ;;  %p540_p8 = scmp.lt.s32.totalorder %s6489_s21, 3 }
  0x14   : > { %s7878_s3 = scalar_select %p6659_p5, 1, 0 }
  0x15   : > { %s7880_s26 = scalar_select %p6663_p6, 1, 0 }
  0x16   : > { %7879 = sst [smem:[#allocation17_spill]] %s7878_s3  ;;  %p541_p9 = pnand %p5295_p7, %p540_p8 }
  0x17   : > { %7881 = sst [smem:[#allocation18_spill]] %s7880_s26  ;;  %p595_p10 = scmp.lt.s32.totalorder (!%p541_p9), %s6642_s1, 1 }
  0x18   : > { %544 = sbr.rel (%p541_p9) target bundleno = 2486 (0x9b6), region = 96  ;;  %s7882_s22 = sld [smem:[#allocation20_spill]] (!%p541_p9) }
  0x19   : > { %s7883_s20 = sld [smem:[#allocation21_spill]] (!%p541_p9)  ;;  %s7886_s29 = sand.u32 (!%p541_p9), 1, %s6481_s30  }
  0x1a   : > { %s7884_s27 = sld [smem:[#allocation22_spill]] (!%p541_p9)  ;;  %s6719_s23 = scalar_lea.vmem (!%p541_p9), [#allocation8], %s7886_s29 }
  0x1b   : > { %s7885_s3 = sld [smem:[#allocation19_spill]] (!%p541_p9) }
  0x1d   : > { %s596_s28 = scalar_select %p595_p10, %s6642_s1, 1 }
  0x1e   : > { %v6674_v0 = vld [vmem:[%s7882_s22] sm:$0x1]  ;;  %v6679_v1 = vld [vmem:[%s7882_s22] sm:$0x2]  ;;  %v6686_v4 = vld [vmem:[%s7882_s22] sm:$0x4] }
  0x1f   : > { %v602_v2 = vunpack.c.l.bf16 %v6674_v0  ;;  %v604_v3 = vunpack.c.l.bf16 %v6679_v1  ;;  %v6691_v5 = vld [vmem:[%s7882_s22] sm:$0x8]  ;;  %v606_v6 = vunpack.c.l.bf16 %v6686_v4  ;;  %v6699_v8 = vld [vmem:[%s7882_s22 + $0x4] sm:$0x1]  ;;  %v6704_v9 = vld [vmem:[%s7883_s20] ss:$0 sm:$0xff] }
  0x20   : > { %v608_v7 = vunpack.c.l.bf16 %v6691_v5  ;;  %v610_v10 = vunpack.c.l.bf16 %v6699_v8  ;;  %v6710_v11 = vld [vmem:[%s7884_s27] ss:$0 sm:$0xff]  ;;  %s6232_s0 = smul.u32 448, %s596_s28  ;;  %s6721_s22 = smov 0  }
  0x22   : > { %s6715_s1 = scalar_lea.vmem %s7885_s3, %s6232_s0 }
  0x23 LB: >> { %v6511_v12 = vmov 0   ;;  %s5591_s26 = sshll.u32 %s6493_s22, 4  ;;  %v650_v54 = vlaneseq  ;;  %vm681_vm0 = vcmask 1046528   ;;  %vm716_vm1 = vcmask 1045504   ;;  %s618_s22 = sadd.s32 1, %s6493_s22   ;;  %s6493_s22 = sphi %s6721_s22, %s618_s22  }
  0x24   : >> { %6332 = vset.pattern.permute.xlu1 %v6511_v12  ;;  %6321 = vset.pattern.permute.xlu0 %v6511_v12  ;;  %s6730_s19 = scalar_lea.vmem %s6715_s1, %s5591_s26  ;;  %vm998_vm2 = vcmask 125952   ;;  %s997_s0 = scalar_lea.vmem [#allocation2], %s5591_s26  ;;  %vm1002_vm3 = vcmask 122880  }
  0x25   : >> { %v625_v13 = vld [vmem:[%s6730_s19 + $0xc] sm:$0x1]  ;;  %v697_v14 = vld [vmem:[%s6730_s19] sm:$0xe]  ;;  %v5643_v20 = vld [vmem:[%s6730_s19 + $0x10] sm:$0xff]   ;;  %v6747_v55 = vshrl.u32 %v650_v54, 7 }
  0x26   : >> { %v5632_v15 = vld [vmem:[%s6730_s19] sm:$0xff]   ;;  %v629_v16 = vunpack.c.l.bf16 %v625_v13  ;;  %v698_v17 = vunpack.c.l.bf16 %v697_v14  ;;  %v624_v21 = vld [vmem:[%s6730_s19 + $0x8] ss:$16 sps:$4 sm:$0xff]   ;;  %v662_v22 = vld [vmem:[%s6730_s19 + $0xc] sm:$0x3]  ;;  %v5637_v23 = vunpack.c.l.bf16 %v5643_v20  ;;  %v5638_v24 = vunpack.c.h.bf16 %v5643_v20  ;;  %p615_p11 = scmp.ge.s32.totalorder %s618_s22, 26  }
  0x27   : >> { %v5633_v18 = vunpack.c.l.bf16 %v5632_v15  ;;  %v5634_v19 = vunpack.c.h.bf16 %v5632_v15  ;;  %v628_v25 = vunpack.c.l.bf16 %v624_v21  ;;  %v663_v26 = vunpack.c.l.bf16 %v662_v22  ;;  %v5303_v27 = vld [vmem:[%s6730_s19 + $0x1c] sm:$0x1]  ;;  %v5305_v28 = vld [vmem:[%s6730_s19 + $0x10] sm:$0xe]  ;;  %v5309_v38 = vld [vmem:[%s6730_s19 + $0x28] sm:$0xf] }
  0x28   : >> { %v5304_v29 = vld [vmem:[%s6730_s19 + $0x1c] sm:$0x3]  ;;  %v6333_v30 = vpack.i.bf16 %v629_v16, %v698_v17  ;;  %v743_v32 = vunpack.c.l.bf16 %v5303_v27  ;;  %v811_v33 = vunpack.c.l.bf16 %v5305_v28  ;;  %v6338_v34 = vpack.i.bf16 %v5638_v24, %v5637_v23  ;;  %v5311_v39 = vld [vmem:[%s6730_s19 + $0x2c] sm:$0x3]  ;;  %v5644_v40 = vld [vmem:[%s6730_s19 + $0x20] sm:$0xff]   ;;  %s6960_s21 = smov (%p615_p11), 0  }
  0x29   : >> { %v6322_v31 = vpack.i.bf16 %v5634_v19, %v5633_v18  ;;  %v6327_v35 = vpack.i.bf16 %v663_v26, %v628_v25  ;;  %v742_v36 = vunpack.c.h.bf16 %v624_v21  ;;  %v777_v37 = vunpack.c.l.bf16 %v5304_v29  ;;  %v5310_v47 = vld [vmem:[%s6730_s19 + $0x2c] sm:$0x1]  ;;  %v5312_v48 = vld [vmem:[%s6730_s19 + $0x20] sm:$0xe]  ;;  %v6878_v0 = vld [vmem:[%s7839_s4 + $0x10] sm:$0xf] (%p615_p11) }
  0x2a   : >> { %6334 = vperm.xlu1 %6332, %v6333_v30   ;;  %v6348_v41 = vpack.i.bf16 %v811_v33, %v743_v32  ;;  %v854_v42 = vunpack.c.l.bf16 %v5309_v38  ;;  %v889_v44 = vunpack.c.l.bf16 %v5311_v39  ;;  %v5641_v45 = vunpack.c.l.bf16 %v5644_v40  ;;  %v6883_v1 = vld [vmem:[%s7839_s4 + $0x14] sm:$0xf] (%p615_p11)  ;;  %v6898_v4 = vld [vmem:[%s7839_s4 + $0x20] sm:$0xf] (%p615_p11)  ;;  %v6903_v5 = vld [vmem:[%s7839_s4 + $0x24] sm:$0xf] (%p615_p11) }
  0x2b   : >> { %6323 = vperm.xlu0 %6321, %v6322_v31   ;;  %v6343_v43 = vpack.i.bf16 %v777_v37, %v742_v36  ;;  %v5642_v46 = vunpack.c.h.bf16 %v5644_v40  ;;  %v855_v51 = vunpack.c.l.bf16 %v5310_v47  ;;  %v923_v52 = vunpack.c.l.bf16 %v5312_v48  ;;  %v6918_v8 = vld [vmem:[%s7839_s4 + $0x30] sm:$0xf] (%p615_p11) }
  0x2c   : >> { %v6358_v49 = vpack.i.bf16 %v889_v44, %v854_v42  ;;  %v706_v56 = vsub.s32 2, %v6747_v55  ;;  %v671_v57 = vsub.s32 1, %v6747_v55  ;;  %v652_v58 = vsub.s32 0, %v6747_v55 }
  0x2d   : >> { %v6353_v50 = vpack.i.bf16 %v5642_v46, %v5641_v45  ;;  %v6363_v53 = vpack.i.bf16 %v923_v52, %v855_v51  ;;  %v766_v59 = vsub.s32 3, %v6747_v55  ;;  %v785_v60 = vsub.s32 4, %v6747_v55 }
  0x2e   : >> { %6339 = vperm.xlu1 %6332, %v6338_v34   ;;  %v819_v61 = vsub.s32 5, %v6747_v55  ;;  %v707_v62 = vrot.slane %v604_v3, %v706_v56  ;;  %v672_v63 = vrot.slane %v602_v2, %v671_v57  ;;  %v878_v12 = vsub.s32 6, %v6747_v55 }
  0x2f   : >> { %6328 = vperm.xlu0 %6321, %v6327_v35   ;;  %v897_v13 = vsub.s32 7, %v6747_v55  ;;  %v653_v14 = vrot.slane %v602_v2, %v652_v58  ;;  %v6765_v21 = vrot.slane %v604_v3, %v766_v59  ;;  %v6769_v22 = vrot.slane %v606_v6, %v785_v60  ;;  %v6888_v2 = vld [vmem:[%s7839_s4 + $0x18] sm:$0xf] (%p615_p11)  ;;  %v6893_v3 = vld [vmem:[%s7839_s4 + $0x1c] sm:$0xf] (%p615_p11) }
  0x30   : >> { %v6773_v23 = vrot.slane %v606_v6, %v819_v61  ;;  %v6777_v26 = vrot.slane %v608_v7, %v878_v12  ;;  %v6785_v33 = vrot.slane %v610_v10, %v652_v58  ;;  %v6908_v6 = vld [vmem:[%s7839_s4 + $0x28] sm:$0xf] (%p615_p11)  ;;  %v6928_v10 = vld [vmem:[%s7839_s4 + $0x38] sm:$0xf] (%p615_p11) }
  0x31   : >> { %v6781_v27 = vrot.slane %v608_v7, %v897_v13  ;;  %v6913_v7 = vld [vmem:[%s7839_s4 + $0x2c] sm:$0xf] (%p615_p11) }
  0x32   : >> { %6349 = vperm.xlu1 %6332, %v6348_v41  }
  0x33   : >> { %6344 = vperm.xlu0 %6321, %v6343_v43  }
  0x36   : >> { %6359 = vperm.xlu1 %6332, %v6358_v49  }
  0x37   : >> { %6354 = vperm.xlu0 %6321, %v6353_v50  }
  0x3b   : >> { %6364 = vperm.xlu0 %6321, %v6363_v53  }
  0xa5   : >> { %v6335_v15 = vpop.permute.xlu1 %6334 }
  0xa6   : >> { %v6324_v16 = vpop.permute.xlu0 %6323  ;;  %v6337_v17 = vunpack.i.h.bf16 %v6335_v15  ;;  %v6336_v18 = vunpack.i.l.bf16 %v6335_v15 }
  0xa7   : >> { %v6326_v19 = vunpack.i.h.bf16 %v6324_v16  ;;  %v6325_v20 = vunpack.i.l.bf16 %v6324_v16 }
  0xa8   : >> { %v708_v24 = vmul.f32 %v6336_v18, %v707_v62  ;;  %v657_v28 = vmul.f32 %v6337_v17, %v653_v14 }
  0xa9   : >> { %v674_v25 = vmul.f32 %v6326_v19, %v672_v63  ;;  %v709_v29 = vmul.f32 %v6326_v19, %v707_v62  ;;  %v673_v30 = vmul.f32 %v6325_v20, %v672_v63  ;;  %v6340_v31 = vpop.permute.xlu1 %6339  ;;  %v655_v42 = vmul.f32 %v6326_v19, %v653_v14 }
  0xaa   : >> { %v6329_v32 = vpop.permute.xlu0 %6328  ;;  %v717_v34 = vrot.slane %v708_v24, 2  ;;  %v6342_v36 = vunpack.i.h.bf16 %v6340_v31  ;;  %v6341_v37 = vunpack.i.l.bf16 %v6340_v31  ;;  %v654_v43 = vmul.f32 %v6325_v20, %v653_v14 }
  0xab   : >> { %v683_v35 = vrot.slane %v674_v25, 1  ;;  %v718_v38 = vrot.slane %v709_v29, 2  ;;  %v682_v39 = vrot.slane %v673_v30, 1  ;;  %v6331_v40 = vunpack.i.h.bf16 %v6329_v32 }
  0xac   : >> { %v6330_v41 = vunpack.i.l.bf16 %v6329_v32  ;;  %v6788_v44 = vmul.f32 %v6342_v36, %v6765_v21  ;;  %v6791_v45 = vmul.f32 %v6342_v36, %v6769_v22  ;;  %v6795_v47 = vmul.f32 %v6342_v36, %v6773_v23 }
  0xad   : >> { %v684_v46 = vsel %vm681_vm0, %v682_v39, %v683_v35  ;;  %v787_v48 = vmul.f32 %v6341_v37, %v6769_v22  ;;  %v676_v49 = vmul.f32 %v6331_v40, %v672_v63  ;;  %v6350_v50 = vpop.permute.xlu1 %6349  ;;  %v719_v52 = vsel %vm716_vm1, %v717_v34, %v718_v38 }
  0xae   : >> { %v693_v51 = vadd.f32 %v684_v46, %v654_v43  ;;  %v768_v53 = vmul.f32 %v6341_v37, %v6765_v21  ;;  %v711_v56 = vmul.f32 %v6331_v40, %v707_v62  ;;  %v796_v57 = vrot.slane %v6791_v45, 1  ;;  %v6345_v61 = vpop.permute.xlu0 %6344 }
  0xaf   : >> { %v795_v58 = vrot.slane %v787_v48, 1  ;;  %v687_v59 = vrot.slane %v676_v49, 1  ;;  %v675_v60 = vmul.f32 %v6330_v41, %v672_v63  ;;  %v656_v13 = vmul.f32 %v6330_v41, %v653_v14 }
  0xb0   : >> { %v728_v12 = vadd.f32 %v719_v52, %v693_v51  ;;  %v710_v15 = vmul.f32 %v6330_v41, %v707_v62  ;;  %v6352_v16 = vunpack.i.h.bf16 %v6350_v50  ;;  %v722_v18 = vrot.slane %v711_v56, 2 }
  0xb1   : >> { %v696_v17 = vadd.f32 %v687_v59, %v657_v28  ;;  %v685_v19 = vrot.slane %v675_v60, 1  ;;  %v6351_v20 = vunpack.i.l.bf16 %v6350_v50  ;;  %v6347_v30 = vunpack.i.h.bf16 %v6345_v61  ;;  %v6360_v37 = vpop.permute.xlu1 %6359 }
  0xb2   : >> { %v772_v24 = vadd.f32 %v768_v53, %v728_v12  ;;  %v720_v25 = vrot.slane %v710_v15, 2  ;;  %v821_v29 = vmul.f32 %v6352_v16, %v6773_v23  ;;  %v830_v14 = vrot.slane %v6795_v47, 2 }
  0xb3   : >> { %v731_v31 = vadd.f32 %v722_v18, %v696_v17  ;;  %v686_v32 = vsel %vm681_vm0, %v683_v35, %v685_v19  ;;  %v688_v34 = vsel %vm681_vm0, %v685_v19, %v687_v59  ;;  %v771_v63 = vmul.f32 %v6351_v20, %v6765_v21 }
  0xb4   : >> { %v797_v62 = vsel %vm681_vm0, %v795_v58, %v796_v57  ;;  %v694_v28 = vadd.f32 %v686_v32, %v655_v42  ;;  %v695_v36 = vadd.f32 %v688_v34, %v656_v13  ;;  %v723_v40 = vsel %vm716_vm1, %v720_v25, %v722_v18  ;;  %v6355_v58 = vpop.permute.xlu0 %6354 }
  0xb5   : >> { %v806_v39 = vadd.f32 %v797_v62, %v772_v24  ;;  %v775_v41 = vadd.f32 %v771_v63, %v731_v31  ;;  %v790_v43 = vmul.f32 %v6347_v30, %v6769_v22  ;;  %v721_v45 = vsel %vm716_vm1, %v718_v38, %v720_v25 }
  0xb6   : >> { %v730_v35 = vadd.f32 %v723_v40, %v695_v36  ;;  %v824_v46 = vmul.f32 %v6347_v30, %v6773_v23  ;;  %v6346_v48 = vunpack.i.l.bf16 %v6345_v61  ;;  %v829_v49 = vrot.slane %v821_v29, 2 }
  0xb7   : >> { %v800_v50 = vrot.slane %v790_v43, 1  ;;  %v6362_v47 = vunpack.i.h.bf16 %v6360_v37  ;;  %v6361_v51 = vunpack.i.l.bf16 %v6360_v37  ;;  %v729_v52 = vadd.f32 %v721_v45, %v694_v28 }
  0xb8   : >> { %v770_v42 = vmul.f32 %v6346_v48, %v6765_v21  ;;  %v789_v53 = vmul.f32 %v6346_v48, %v6769_v22  ;;  %v823_v56 = vmul.f32 %v6346_v48, %v6773_v23  ;;  %v834_v59 = vrot.slane %v824_v46, 2  ;;  %v6365_v28 = vpop.permute.xlu0 %6364 }
  0xb9   : >> { %v809_v60 = vadd.f32 %v800_v50, %v775_v41  ;;  %v902_v38 = vmul.f32 %v6362_v47, %v6781_v27  ;;  %v936_v12 = vmul.f32 %v6362_v47, %v6785_v33  ;;  %v901_v16 = vmul.f32 %v6361_v51, %v6781_v27 }
  0xba   : >> { %v774_v13 = vadd.f32 %v770_v42, %v730_v35  ;;  %v798_v61 = vrot.slane %v789_v53, 1  ;;  %v832_v15 = vrot.slane %v823_v56, 2  ;;  %v882_v18 = vmul.f32 %v6361_v51, %v6777_v26 }
  0xbb   : >> { %v912_v17 = vrot.slane %v902_v38, 1  ;;  %v935_v21 = vmul.f32 %v6361_v51, %v6785_v33  ;;  %v831_v22 = vsel %vm716_vm1, %v829_v49, %v830_v14  ;;  %v843_v19 = vadd.f32 %v834_v59, %v809_v60 }
  0xbc   : >> { %v801_v23 = vsel %vm681_vm0, %v798_v61, %v800_v50  ;;  %v946_v20 = vrot.slane %v936_v12, 2  ;;  %v910_v24 = vrot.slane %v901_v16, 1  ;;  %v799_v25 = vsel %vm681_vm0, %v796_v57, %v798_v61 }
  0xbd   : >> { %v808_v29 = vadd.f32 %v801_v23, %v774_v13  ;;  %v6357_v30 = vunpack.i.h.bf16 %v6355_v58  ;;  %v6356_v31 = vunpack.i.l.bf16 %v6355_v58  ;;  %v835_v32 = vsel %vm716_vm1, %v832_v15, %v834_v59 }
  0xbe   : >> { %v944_v34 = vrot.slane %v935_v21, 2  ;;  %v773_v63 = vadd.f32 %v6788_v44, %v729_v52  ;;  %v840_v62 = vadd.f32 %v831_v22, %v806_v39  ;;  %v913_v37 = vsel %vm681_vm0, %v910_v24, %v912_v17 }
  0xbf   : >> { %v842_v36 = vadd.f32 %v835_v32, %v808_v29  ;;  %v900_v40 = vmul.f32 %v6357_v30, %v6781_v27  ;;  %v833_v41 = vsel %vm716_vm1, %v830_v14, %v832_v15  ;;  %v934_v43 = vmul.f32 %v6357_v30, %v6785_v33 }
  0xc0   : >> { %v807_v57 = vadd.f32 %v799_v25, %v773_v63  ;;  %v880_v45 = vmul.f32 %v6356_v31, %v6777_v26  ;;  %v899_v35 = vmul.f32 %v6356_v31, %v6781_v27  ;;  %v6367_v49 = vunpack.i.h.bf16 %v6365_v28 }
  0xc1   : >> { %v886_v46 = vadd.f32 %v882_v18, %v842_v36  ;;  %v908_v48 = vrot.slane %v900_v40, 1  ;;  %v6366_v44 = vunpack.i.l.bf16 %v6365_v28  ;;  %v881_v39 = vmul.f32 %v6357_v30, %v6777_v26  ;;  %v6863_v40 = vld [vmem:[%s7839_s4 + $0x4] sm:$0xf] (%p615_p11) }
  0xc2   : >> { %v841_v50 = vadd.f32 %v833_v41, %v807_v57  ;;  %v884_v47 = vadd.f32 %v880_v45, %v840_v62  ;;  %v907_v51 = vrot.slane %v899_v35, 1  ;;  %v942_v42 = vrot.slane %v934_v43, 2  ;;  %v6868_v41 = vld [vmem:[%s7839_s4 + $0x8] sm:$0xf] (%p615_p11)  ;;  %v6873_v43 = vld [vmem:[%s7839_s4 + $0xc] sm:$0xf] (%p615_p11) }
  0xc3   : >> { %v920_v52 = vadd.f32 %v913_v37, %v886_v46  ;;  %v933_v14 = vmul.f32 %v6367_v49, %v6785_v33  ;;  %v883_v53 = vmul.f32 %v6366_v44, %v6777_v26  ;;  %v947_v56 = vsel %vm716_vm1, %v944_v34, %v946_v20  ;;  %v6858_v37 = vld [vmem:[%s7839_s4] sm:$0xf] (%p615_p11)  ;;  %v6943_v45 = vld [vmem:[%s7839_s4 + $0x44] sm:$0xf] (%p615_p11) }
  0xc4   : >> { %v885_v58 = vadd.f32 %v881_v39, %v841_v50  ;;  %v909_v27 = vsel %vm681_vm0, %v907_v51, %v908_v48  ;;  %v911_v60 = vsel %vm681_vm0, %v908_v48, %v910_v24  ;;  %v945_v16 = vsel %vm716_vm1, %v942_v42, %v944_v34  ;;  %v6938_v57 = vld [vmem:[%s7839_s4 + $0x40] sm:$0xf] (%p615_p11) }
  0xc5   : >> { %v954_v59 = vadd.f32 %v947_v56, %v920_v52  ;;  %v941_v38 = vrot.slane %v933_v14, 2  ;;  %v887_v12 = vadd.f32 %v883_v53, %v843_v19  ;;  %v918_v13 = vadd.f32 %v909_v27, %v884_v47  ;;  %v6948_v35 = vld [vmem:[%s7840_s5] ss:$0 sm:$0xff] (%p615_p11) }
  0xc6   : >> { %v919_v61 = vadd.f32 %v911_v60, %v885_v58  ;;  %v6953_v46 = vld [vmem:[%s7841_s6] ss:$0 sm:$0xff] (%p615_p11) }
  0xc7   : >> { %v958_v15 = vmax.f32 %v954_v59, 0.0  ;;  %v921_v18 = vadd.f32 %v912_v17, %v887_v12  ;;  %v943_v33 = vsel %vm716_vm1, %v941_v38, %v942_v42  ;;  %v6958_v48 = vld [vmem:[%s7842_s7] sm:$0xf] (%p615_p11) }
  0xc8   : >> { %v953_v26 = vadd.f32 %v945_v16, %v919_v61  ;;  %v952_v21 = vadd.f32 %v943_v33, %v918_v13 }
  0xc9   : >> { %v968_v22 = vmul.f32 %v6704_v9, %v958_v15  ;;  %v955_v23 = vadd.f32 %v946_v20, %v921_v18 }
  0xca   : >> { %v957_v25 = vmax.f32 %v953_v26, 0.0  ;;  %v956_v29 = vmax.f32 %v952_v21, 0.0 }
  0xcb   : >> { %v978_v24 = vadd.f32 %v6710_v11, %v968_v22  ;;  %v959_v30 = vmax.f32 %v955_v23, 0.0 }
  0xcc   : >> { %v967_v19 = vmul.f32 %v6704_v9, %v957_v25  ;;  %v966_v31 = vmul.f32 %v6704_v9, %v956_v29 }
  0xcd   : >> { %v5594_v32 = vpack.c.bf16 %v978_v24, %v978_v24  ;;  %v969_v17 = vmul.f32 %v6704_v9, %v959_v30  ;;  %v6923_v9 = vld [vmem:[%s7839_s4 + $0x34] sm:$0xf] (%p615_p11) }
  0xce   : >> { %v977_v34 = vadd.f32 %v6710_v11, %v967_v19  ;;  %v976_v63 = vadd.f32 %v6710_v11, %v966_v31 }
  0xcf   : >> { %1001 = vst.msk [vmem:[%s997_s0 + $0x8] sm:$0xf] %vm998_vm2, %v5594_v32  ;;  %v979_v20 = vadd.f32 %v6710_v11, %v969_v17  ;;  %617 = sbr.rel (!%p615_p11) target bundleno = 35 (0x23), region = 225  ;;  %v6933_v11 = vld [vmem:[%s7839_s4 + $0x3c] sm:$0xf] (%p615_p11) }
  0xd0   : >> { %v5593_v62 = vpack.c.bf16 %v977_v34, %v977_v34  ;;  %v5592_v28 = vpack.c.bf16 %v976_v63, %v976_v63 }
  0xd1   : >> { %v5595_v36 = vpack.c.bf16 %v979_v20, %v979_v20 }
  0xd2   : >> { %1000 = vst.msk [vmem:[%s997_s0 + $0x4] sm:$0xf] %vm998_vm2, %v5593_v62  ;;  %999 = vst.msk [vmem:[%s997_s0] sm:$0xf] %vm998_vm2, %v5592_v28 }
  0xd3   : >> { %1003 = vst.msk [vmem:[%s997_s0 + $0xc] sm:$0x1] %vm1002_vm3, %v5595_v36 }
  0xd4 LB: >> { %v5324_v49 = vcombine.low %v6868_v41, %v6873_v43  ;;  %v5328_v44 = vcombine.low %v6858_v37, %v6863_v40  ;;  %v5332_v39 = vcombine.low %v6878_v0, %v6883_v1  ;;  %v5341_v50 = vcombine.low %v6888_v2, %v6893_v3  ;;  %s5597_s3 = sshll.u32 %s6497_s21, 4  ;;  %s5601_s24 = smul.u32 12, %s6497_s21  ;;  %s6497_s21 = sphi %s6960_s21, %s1030_s21  }
  0xd5   : >> { %vm1070_vm4 = vcmask 130048   ;;  %s6974_s28 = scalar_lea.vmem [#allocation2], %s5597_s3  ;;  %v5355_v60 = vcombine.low %v6908_v6, %v6913_v7  ;;  %vm1048_vm5 = vsmask.f32 7424  ;;  %v5350_v24 = vcombine.low %v6898_v4, %v6903_v5  ;;  %s1030_s21 = sadd.s32 1, %s6497_s21  }
  0xd6   : >> { %5805 = vmatprep.subr.bf16.mxu0 %v5324_v49  ;;  %5811 = vmatprep.subr.bf16.mxu1 %v5328_v44  ;;  %vm1766_vm6 = vcmask 1043456   ;;  %vm1759_vm7 = vcmask 64512   ;;  %s1833_s20 = scalar_lea.vmem [#allocation3], %s5601_s24  ;;  %p1027_p12 = scmp.ge.s32.totalorder %s1030_s21, 24  }
  0xd7   : >> { %5806 = vmatpush3.bf16.msra.mxu0 %v5324_v49  ;;  %5812 = vmatpush3.bf16.msra.mxu1 %v5328_v44  ;;  %vm6513_vm8 = vmmov (%p1027_p12), 0   ;;  %v1840_v37 = vadd.s32 (%p1027_p12), 8, %v6747_v55  ;;  %v1842_v40 = vand.u32 (%p1027_p12), 127, %v650_v54  ;;  %v1843_v41 = vmul.u32 (%p1027_p12), 2, %v6747_v55  ;;  %s7335_s24 = smov (%p1027_p12), 0  }
  0xd8   : >> { %5817 = vmatprep.subr.bf16.mxu0 %v5332_v39  ;;  %5823 = vmatprep.subr.bf16.mxu1 %v5341_v50  ;;  %vm1880_vm13 = vcmask (%p1027_p12), 195584   ;;  %vm1985_vm14 = vcmask (%p1027_p12), 123904  }
  0xd9   : > { %v1844_v3 = vmul.u32 (%p1027_p12), 2, %v1840_v37  ;;  %vm1845_vm9 = vcmp.eq.s32.totalorder (%p1027_p12), %v1842_v40, %v1843_v41  ;;  %v1852_v4 = vadd.s32 (%p1027_p12), 1, %v1843_v41 }
  0xda   : >> { %v1034_v47 = vld [vmem:[%s6974_s28] sm:$0xf]  ;;  %v1035_v51 = vld [vmem:[%s6974_s28 + $0x4] sm:$0xf]  ;;  %v1036_v52 = vld [vmem:[%s6974_s28 + $0x8] sm:$0xf] }
  0xdb   : >> { %v1037_v42 = vld [vmem:[%s6974_s28 + $0xc] sm:$0x1]  ;;  %v5322_v14 = vcombine.low %v1034_v47, %v1035_v51  ;;  %v5327_v53 = vcombine.low %v1036_v52, %v1036_v52  ;;  %v1185_v56 = vld [vmem:[%s6974_s28] sm:$0xe]  ;;  %v6372_v59 = vld [vmem:[%s6974_s28 + $0x10] sm:$0xff]   ;;  %vm1846_vm10 = vcmp.eq.s32.totalorder (%p1027_p12), %v1842_v40, %v1844_v3  ;;  %vm1854_vm11 = vcmp.eq.s32.totalorder (%p1027_p12), %v1842_v40, %v1852_v4 }
  0xdc   : >> { %v5323_v58 = vcombine.low %v1036_v52, %v1037_v42  ;;  %v5331_v27 = vcombine.low %v1185_v56, %v1035_v51  ;;  %v5344_v13 = vld [vmem:[%s6974_s28 + $0x10] sm:$0xf]  ;;  %v5345_v18 = vld [vmem:[%s6974_s28 + $0x14] sm:$0xf]  ;;  %v6375_v23 = vld [vmem:[%s6974_s28 + $0x18] sm:$0x1f]   ;;  %v5373_v52 = vcombine.low %v6928_v10, %v6933_v11 }
  0xdd   : >> { %v1050_v38 = vshrl.u32 %v5322_v14, 16  ;;  %v1052_v12 = vshll.u32 %v5322_v14, 16  ;;  %5813 = vmatprep.mubr.msk.bf16.mxu1 %vm1070_vm4, %v5322_v14  ;;  %v5348_v21 = vcombine.low %v5344_v13, %v5345_v18  ;;  %v5353_v25 = vld [vmem:[%s6974_s28 + $0x10] sm:$0xe]  ;;  %v6373_v30 = vld [vmem:[%s6974_s28 + $0x18] ss:$0 sps:$4 sm:$0xff]  }
  0xde   : >> { %v1057_v61 = vshll.u32 %v5323_v58, 16  ;;  %v1061_v15 = vshrl.u32 %v5323_v58, 16  ;;  %5814 = vmatmul.mubr.msk.bf16.vlgmr.msra.gmra.mxu1 %vm1070_vm4, %v5327_v53  ;;  %v1190_v16 = vrot.slane %v5331_v27, 1  ;;  %v1191_v26 = vrot.slane %v5323_v58, 1  ;;  %v5367_v20 = vld [vmem:[%s6974_s28 + $0x20] sm:$0xf] }
  0xdf   : >> { %v1054_v33 = vrot.slane %v1052_v12, 1  ;;  %5824 = vmatpush3.bf16.msra.mxu1 %v5341_v50  ;;  %5825 = vmatprep.mubr.msk.bf16.mxu1 %vm1070_vm4, %v6372_v59  ;;  %v1351_v19 = vshll.u32 %v5348_v21, 16  ;;  %v5354_v31 = vcombine.low %v5353_v25, %v5345_v18  ;;  %v1349_v17 = vshrl.u32 %v5348_v21, 16  ;;  %v5368_v44 = vld [vmem:[%s6974_s28 + $0x24] sm:$0xf] }
  0xe0   : >> { %v1059_v22 = vrot.slane %v1057_v61, 1  ;;  %5835 = vmatprep.subr.bf16.mxu1 %v5355_v60  ;;  %v1356_v34 = vshll.u32 %v6375_v23, 16  ;;  %v1431_v63 = vrot.slane %v6375_v23, 1  ;;  %v1192_v28 = vsel %vm681_vm0, %v1190_v16, %v1191_v26  ;;  %v6379_v47 = vld [vmem:[%s6974_s28 + $0x28] sm:$0x1f]   ;;  %v6377_v18 = vld [vmem:[%s6974_s28 + $0x20] sm:$0xff]  }
  0xe1   : >> { %v1055_v29 = vor.u32 %v1054_v33, %v1050_v38  ;;  %v1353_v36 = vrot.slane %v1351_v19, 1  ;;  %v1430_v49 = vrot.slane %v5354_v31, 1  ;;  %v5371_v50 = vcombine.low %v5367_v20, %v5368_v44  ;;  %v6380_v25 = vld [vmem:[%s6974_s28 + $0x28] ss:$0 sps:$4 sm:$0xff]  }
  0xe2   : >> { %v1063_v32 = vor.u32 %v1061_v15, %v1059_v22  ;;  %v1596_v53 = vshll.u32 %v6379_v47, 16  ;;  %v1358_v58 = vrot.slane %v1356_v34, 1  ;;  %v5364_v12 = vcombine.low %v6918_v8, %v6923_v9  ;;  %v5376_v15 = vld [vmem:[%s6974_s28 + $0x20] sm:$0xe] }
  0xe3   : >> { %v1060_v62 = vsel %vm1048_vm5, %v1055_v29, %v1059_v22  ;;  %v1432_v51 = vsel %vm681_vm0, %v1430_v49, %v1431_v63  ;;  %v1589_v42 = vshrl.u32 %v5371_v50, 16  ;;  %v1591_v14 = vshll.u32 %v5371_v50, 16 }
  0xe4   : >> { %5807 = vmatprep.mubr.msk.bf16.mxu0 %vm1070_vm4, %v1060_v62  ;;  %v1354_v56 = vor.u32 %v1353_v36, %v1349_v17  ;;  %v1598_v59 = vrot.slane %v1596_v53, 1  ;;  %v1360_v13 = vshrl.u32 %v6375_v23, 16  ;;  %v5377_v21 = vcombine.low %v5376_v15, %v5368_v44 }
  0xe5   : >> { %5808 = vmatmul.mubr.msk.bf16.vlgmr.msra.gmra.mxu0 %vm1070_vm4, %v1063_v32  ;;  %v1593_v27 = vrot.slane %v1591_v14, 1  ;;  %v1671_v23 = vrot.slane %v6379_v47, 1  ;;  %v1853_v9 = vadd.s32 (%p1027_p12), 1, %v1844_v3 }
  0xe6   : >> { %5818 = vmatpush3.bf16.msra.mxu0 %v5332_v39  ;;  %5819 = vmatprep.mubr.msk.bf16.mxu0 %vm1070_vm4, %v1192_v28  ;;  %v1359_v39 = vsel %vm1048_vm5, %v1354_v56, %v1358_v58  ;;  %v1362_v16 = vor.u32 %v1360_v13, %v1358_v58  ;;  %v1670_v22 = vrot.slane %v5377_v21, 1 }
  0xe7   : >> { %5829 = vmatprep.subr.bf16.mxu0 %v5350_v24  ;;  %5826 = vmatmul.mubr.msk.bf16.vlgmr.msra.gmra.mxu1 %vm1070_vm4, %v6373_v30  ;;  %v1594_v38 = vor.u32 %v1593_v27, %v1589_v42  ;;  %vm1855_vm12 = vcmp.eq.s32.totalorder (%p1027_p12), %v1842_v40, %v1853_v9 }
  0xe8   : >> { %5836 = vmatpush3.bf16.msra.mxu1 %v5355_v60  ;;  %5837 = vmatprep.mubr.msk.bf16.mxu1 %vm1070_vm4, %v1432_v51  ;;  %v1600_v60 = vshrl.u32 %v6379_v47, 16  ;;  %v1672_v29 = vsel %vm681_vm0, %v1670_v22, %v1671_v23 }
  0xe9   : >> { %5847 = vmatprep.subr.bf16.mxu1 %v5373_v52  ;;  %v1599_v61 = vsel %vm1048_vm5, %v1594_v38, %v1598_v59 }
  0xea   : >> { %v1602_v33 = vor.u32 %v1600_v60, %v1598_v59 }
  0xed   : >> { %5820 = vmatmul.mubr.msk.bf16.vlgmr.msra.gmra.mxu0 %vm1070_vm4, %v1191_v26  ;;  %v5378_v26 = vcombine.low %v6938_v57, %v6943_v45 }
  0xee   : >> { %5830 = vmatpush3.bf16.msra.mxu0 %v5350_v24  ;;  %5831 = vmatprep.mubr.msk.bf16.mxu0 %vm1070_vm4, %v1359_v39  ;;  %v1768_v24 = vsel %vm1766_vm6, %v6958_v48, 0 }
  0xef   : >> { %5841 = vmatprep.subr.bf16.mxu0 %v5364_v12  ;;  %5838 = vmatmul.mubr.msk.bf16.vlgmr.msra.gmra.mxu1 %vm1070_vm4, %v1431_v63 }
  0xf0   : >> { %5848 = vmatpush3.bf16.msra.mxu1 %v5373_v52  ;;  %5849 = vmatprep.mubr.msk.bf16.mxu1 %vm1070_vm4, %v1599_v61 }
  0xf1   : >> { %6231 = vmatprep.subr.msk.bf16.mxu1 %vm1766_vm6, %v6958_v48 }
  0xf5   : >> { %5832 = vmatmul.mubr.msk.bf16.vlgmr.msra.gmra.mxu0 %vm1070_vm4, %v1362_v16 }
  0xf6   : >> { %5842 = vmatpush3.bf16.msra.mxu0 %v5364_v12  ;;  %5843 = vmatprep.mubr.msk.bf16.mxu0 %vm1070_vm4, %v6377_v18 }
  0xf7   : >> { %5853 = vmatprep.subr.bf16.mxu0 %v5378_v26  ;;  %5850 = vmatmul.mubr.msk.bf16.vlgmr.msra.gmra.mxu1 %vm1070_vm4, %v1602_v33 }
  0xf8   : >> { %5860 = vmatpush3.bf16.msra.mxu1 %v1768_v24 }
  0xfd   : >> { %5844 = vmatmul.mubr.msk.bf16.vlgmr.msra.gmra.mxu0 %vm1070_vm4, %v6380_v25 }
  0xfe   : >> { %5854 = vmatpush3.bf16.msra.mxu0 %v5378_v26  ;;  %5855 = vmatprep.mubr.msk.bf16.mxu0 %vm1070_vm4, %v1672_v29 }
 0x105   : >> { %5856 = vmatmul.mubr.msk.bf16.vlgmr.msra.gmra.mxu0 %vm1070_vm4, %v1671_v23 }
 0x19e   : >> { %v5815_v30 = vpop.f32.mrf.mxu1 }
 0x1a0   : >> { %v1171_v19 = vpop.f32.mrf.mxu1 }
 0x1a2   : >> { %v5816_v31 = vpop.f32.mrf.mxu1 }
 0x1a4   : >> { %v1174_v32 = vpop.f32.mrf.mxu1 }
 0x1a5   : >> { %v5809_v17 = vpop.f32.mrf.mxu0 }
 0x1a6   : >> { %v1180_v42 = vadd.f32 %v5815_v30, %v5809_v17 }
 0x1a7   : >> { %v1111_v34 = vpop.f32.mrf.mxu0  ;;  %v5827_v63 = vpop.f32.mrf.mxu1 }
 0x1a8   : >> { %v1172_v56 = vadd.f32 %v1171_v19, %v1111_v34 }
 0x1a9   : >> { %v5810_v20 = vpop.f32.mrf.mxu0  ;;  %v1317_v62 = vpop.f32.mrf.mxu1 }
 0x1ab   : >> { %v1114_v28 = vpop.f32.mrf.mxu0  ;;  %v5828_v36 = vpop.f32.mrf.mxu1 }
 0x1ac   : >> { %v1175_v13 = vadd.f32 %v1174_v32, %v1114_v28 }
 0x1ad   : >> { %v5821_v49 = vpop.f32.mrf.mxu0  ;;  %v1320_v44 = vpop.f32.mrf.mxu1 }
 0x1ae   : >> { %v1255_v58 = vadd.f32 %v5821_v49, %v1180_v42 }
 0x1af   : >> { %v1239_v50 = vpop.f32.mrf.mxu0  ;;  %v5839_v47 = vpop.f32.mrf.mxu1 }
 0x1b0   : >> { %v1253_v38 = vadd.f32 %v1239_v50, %v1172_v56  ;;  %v1333_v61 = vadd.f32 %v5827_v63, %v1255_v58 }
 0x1b1   : >> { %v5822_v51 = vpop.f32.mrf.mxu0  ;;  %v1479_v52 = vpop.f32.mrf.mxu1 }
 0x1b2   : >> { %v1331_v16 = vadd.f32 %v1317_v62, %v1253_v38 }
 0x1b3   : >> { %v1242_v14 = vpop.f32.mrf.mxu0  ;;  %v5840_v53 = vpop.f32.mrf.mxu1 }
 0x1b4   : >> { %v1254_v18 = vadd.f32 %v1242_v14, %v1175_v13 }
 0x1b5   : >> { %v5833_v27 = vpop.f32.mrf.mxu0  ;;  %v1482_v59 = vpop.f32.mrf.mxu1 }
 0x1b6   : >> { %v1425_v33 = vadd.f32 %v5833_v27, %v1333_v61  ;;  %v1332_v25 = vadd.f32 %v1320_v44, %v1254_v18 }
 0x1b7   : >> { %v1409_v39 = vpop.f32.mrf.mxu0  ;;  %v5851_v12 = vpop.f32.mrf.mxu1 }
 0x1b8   : >> { %v1423_v22 = vadd.f32 %v1409_v39, %v1331_v16  ;;  %v1495_v29 = vadd.f32 %v5839_v47, %v1425_v33 }
 0x1b9   : >> { %v5834_v60 = vpop.f32.mrf.mxu0  ;;  %v1649_v15 = vpop.f32.mrf.mxu1 }
 0x1ba   : >> { %v1493_v30 = vadd.f32 %v1479_v52, %v1423_v22 }
 0x1bb   : >> { %v1412_v26 = vpop.f32.mrf.mxu0  ;;  %v5852_v21 = vpop.f32.mrf.mxu1 }
 0x1bc   : >> { %v1424_v19 = vadd.f32 %v1412_v26, %v1332_v25 }
 0x1bd   : >> { %v5845_v23 = vpop.f32.mrf.mxu0  ;;  %v1652_v42 = vpop.f32.mrf.mxu1 }
 0x1be   : >> { %v1573_v31 = vadd.f32 %v5845_v23, %v1495_v29  ;;  %v1494_v32 = vadd.f32 %v1482_v59, %v1424_v19  ;;  %v6512_v29 = vmov (%p1027_p12), 0.0  }
 0x1bf   : >> { %v1557_v24 = vpop.f32.mrf.mxu0  ;;  %5865 = vmatprep.subr.bf16.mxu0 (%p1027_p12), %v6512_v29  ;;  %5873 = vmatprep.subr.bf16.mxu1 (%p1027_p12), %v6512_v29  ;;  %v5389_v8 = vsel (%p1027_p12), %vm1845_vm9, 1.0, %v6512_v29  ;;  %v5390_v10 = vsel (%p1027_p12), %vm1846_vm10, 1.0, %v6512_v29  ;;  %v5391_v11 = vsel (%p1027_p12), %vm1854_vm11, 1.0, %v6512_v29 }
 0x1c0   : >> { %v1571_v34 = vadd.f32 %v1557_v24, %v1493_v30  ;;  %v1665_v63 = vadd.f32 %v5851_v12, %v1573_v31  ;;  %5869 = vmatprep.mubr.msk.bf16.mxu0 (%p1027_p12), %vm6513_vm8, %v6512_v29 }
 0x1c1   : >> { %v5846_v17 = vpop.f32.mrf.mxu0 }
 0x1c2   : >> { %v1663_v36 = vadd.f32 %v1649_v15, %v1571_v34 }
 0x1c3   : >> { %v1560_v20 = vpop.f32.mrf.mxu0 }
 0x1c4   : >> { %v1572_v62 = vadd.f32 %v1560_v20, %v1494_v32  ;;  %v7059_v20 = vpack.c.bf16 (%p1027_p12), %v5390_v10, %v5389_v8  ;;  %v5392_v32 = vsel (%p1027_p12), %vm1855_vm12, 1.0, %v6512_v29 }
 0x1c5   : >> { %v5857_v28 = vpop.f32.mrf.mxu0 }
 0x1c6   : >> { %v1735_v49 = vadd.f32 %v5857_v28, %v1665_v63  ;;  %v1664_v44 = vadd.f32 %v1652_v42, %v1572_v62  ;;  %v7062_v63 = vpack.c.bf16 (%p1027_p12), %v5392_v32, %v5391_v11 }
 0x1c7   : >> { %v1719_v50 = vpop.f32.mrf.mxu0 }
 0x1c8   : >> { %v1733_v51 = vadd.f32 %v1719_v50, %v1663_v36  ;;  %v1738_v14 = vmax.f32 %v1735_v49, 0.0 }
 0x1c9   : >> { %v5858_v53 = vpop.f32.mrf.mxu0 }
 0x1ca   : >> { %v1736_v47 = vmax.f32 %v1733_v51, 0.0  ;;  %v1747_v58 = vmul.f32 %v6948_v35, %v1738_v14 }
 0x1cb   : >> { %v1722_v52 = vpop.f32.mrf.mxu0 }
 0x1cc   : >> { %v1734_v56 = vadd.f32 %v1722_v52, %v1664_v44  ;;  %v1745_v27 = vmul.f32 %v6948_v35, %v1736_v47  ;;  %v1756_v39 = vadd.f32 %v6953_v46, %v1747_v58 }
 0x1ce   : >> { %v1737_v59 = vmax.f32 %v1734_v56, 0.0  ;;  %v1754_v12 = vadd.f32 %v6953_v46, %v1745_v27  ;;  %v1758_v60 = vpack.c.bf16 %v1756_v39, %v1756_v39 }
 0x1d0   : >> { %v1746_v38 = vmul.f32 %v6948_v35, %v1737_v59 }
 0x1d2   : >> { %v1755_v13 = vadd.f32 %v6953_v46, %v1746_v38 }
 0x1d4   : >> { %v1757_v61 = vpack.c.bf16 %v1755_v13, %v1754_v12 }
 0x1d6   : >> { %5861 = vmatprep.mubr.msk.bf16.mxu1 %vm1759_vm7, %v1757_v61 }
 0x1d7   : >> { %5862 = vmatmul.mubr.msk.bf16.vlgmr.msra.gmra.mxu1 %vm1759_vm7, %v1758_v60 }
 0x1d8   : > { %5877 = vmatprep.mubr.msk.bf16.mxu1 (%p1027_p12), %vm6513_vm8, %v6512_v29 }
 0x297   : >> { %v5863_v15 = vpop.f32.mrf.mxu1 }
 0x298   : >> { %v5600_v16 = vpack.c.bf16 %v5863_v15, %v5863_v15 }
 0x299   : >> { %v1804_v18 = vpop.f32.mrf.mxu1 }
 0x29a   : >> { %1837 = vst.msk [vmem:[%s1833_s20 + $0x8] sm:$0xf] %vm998_vm2, %v5600_v16  ;;  %v5598_v33 = vpack.c.bf16 %v1804_v18, %v1804_v18 }
 0x29b   : >> { %v5864_v26 = vpop.f32.mrf.mxu1 }
 0x29c   : >> { %1835 = vst.msk [vmem:[%s1833_s20] sm:$0xf] %vm998_vm2, %v5598_v33  ;;  %1029 = sbr.rel (!%p1027_p12) target bundleno = 212 (0xd4), region = 236 }
 0x29d   : >> { %v1807_v21 = vpop.f32.mrf.mxu1 }
 0x29e   : >> { %v5599_v22 = vpack.c.bf16 %v1807_v21, %v1807_v21 }
 0x2a0   : >> { %1836 = vst.msk [vmem:[%s1833_s20 + $0x4] sm:$0xf] %vm998_vm2, %v5599_v22 }
 0x2a7   : > { %v1863_v23 = vld [vmem:[#allocation3 + $0x8] sm:$0xf]  ;;  %v1867_v25 = vld [vmem:[#allocation3 + $0x14] sm:$0xf]  ;;  %v1861_v30 = vld [vmem:[#allocation3] sm:$0xf] }
 0x2a8   : > { %v1870_v24 = vmax.bf16 %v1867_v25, %v1863_v23  ;;  %v1862_v19 = vld [vmem:[#allocation3 + $0x4] sm:$0xf]  ;;  %v1865_v31 = vld [vmem:[#allocation3 + $0xc] sm:$0xf]  ;;  %v1866_v17 = vld [vmem:[#allocation3 + $0x10] sm:$0xf] }
 0x2a9   : > { %v1868_v34 = vmax.bf16 %v1865_v31, %v1861_v30  ;;  %v1869_v0 = vmax.bf16 %v1866_v17, %v1862_v19  ;;  %v1990_v1 = vld [vmem:[#allocation3 + $0x20] sm:$0xf]  ;;  %v1994_v2 = vld [vmem:[#allocation3 + $0x2c] sm:$0xf]  ;;  %v1988_v54 = vld [vmem:[#allocation3 + $0x18] sm:$0xf] }
 0x2aa   : > { %v5394_v43 = vcombine.low %v1870_v24, %v1870_v24  ;;  %v1997_v5 = vmax.bf16 %v1994_v2, %v1990_v1  ;;  %v1989_v55 = vld [vmem:[#allocation3 + $0x1c] sm:$0xf]  ;;  %v1992_v45 = vld [vmem:[#allocation3 + $0x24] sm:$0xf]  ;;  %v1993_v35 = vld [vmem:[#allocation3 + $0x28] sm:$0xf] }
 0x2ab   : > { %v5393_v7 = vcombine.low %v1868_v34, %v1869_v0  ;;  %v2108_v46 = vld [vmem:[#allocation3 + $0x38] sm:$0xf]  ;;  %v2112_v48 = vld [vmem:[#allocation3 + $0x44] sm:$0xf]  ;;  %v1995_v28 = vmax.bf16 %v1992_v45, %v1988_v54  ;;  %v1996_v36 = vmax.bf16 %v1993_v35, %v1989_v55  ;;  %v2106_v51 = vld [vmem:[#allocation3 + $0x30] sm:$0xf] }
 0x2ac   : > { %v1886_v6 = vsel %vm1766_vm6, %v5394_v43, 0  ;;  %v5400_v57 = vcombine.low %v1997_v5, %v1997_v5  ;;  %v2115_v49 = vmax.bf16 %v2112_v48, %v2108_v46  ;;  %v2107_v14 = vld [vmem:[#allocation3 + $0x34] sm:$0xf]  ;;  %v2110_v53 = vld [vmem:[#allocation3 + $0x3c] sm:$0xf] }
 0x2ad   : > { %5866 = vmatpush3.bf16.msra.mxu0 %v1886_v6  ;;  %5874 = vmatpush3.bf16.msra.mxu1 %v1886_v6  ;;  %v5399_v50 = vcombine.low %v1995_v28, %v1996_v36  ;;  %v2111_v44 = vld [vmem:[#allocation3 + $0x40] sm:$0xf]  ;;  %v2226_v47 = vld [vmem:[#allocation3 + $0x50] sm:$0xf]  ;;  %v2230_v52 = vld [vmem:[#allocation3 + $0x5c] sm:$0xf]  ;;  %v2113_v56 = vmax.bf16 %v2110_v53, %v2106_v51 }
 0x2ae   : > { %5867 = vmatprep.subr.bf16.mxu0 %v6512_v29  ;;  %5875 = vmatprep.subr.bf16.mxu1 %v6512_v29  ;;  %v2008_v62 = vsel %vm1766_vm6, %v5400_v57, 0  ;;  %v5406_v42 = vcombine.low %v2115_v49, %v2115_v49  ;;  %v2114_v58 = vmax.bf16 %v2111_v44, %v2107_v14  ;;  %v2233_v59 = vmax.bf16 %v2230_v52, %v2226_v47  ;;  %v2224_v39 = vld [vmem:[#allocation3 + $0x48] sm:$0xf]  ;;  %v2225_v13 = vld [vmem:[#allocation3 + $0x4c] sm:$0xf] }
 0x2af   : > { %v2228_v61 = vld [vmem:[#allocation3 + $0x54] sm:$0xf]  ;;  %v2229_v60 = vld [vmem:[#allocation3 + $0x58] sm:$0xf]  ;;  %v2344_v15 = vld [vmem:[#allocation3 + $0x68] sm:$0xf] }
 0x2b0   : > { %v2126_v27 = vsel %vm1766_vm6, %v5406_v42, 0  ;;  %v5405_v38 = vcombine.low %v2113_v56, %v2114_v58  ;;  %v5412_v12 = vcombine.low %v2233_v59, %v2233_v59  ;;  %v2348_v16 = vld [vmem:[#allocation3 + $0x74] sm:$0xf]  ;;  %v2231_v18 = vmax.bf16 %v2228_v61, %v2224_v39  ;;  %v2342_v23 = vld [vmem:[#allocation3 + $0x60] sm:$0xf] }
 0x2b1   : > { %5868 = vmatpush3.bf16.msra.mxu0 %v5393_v7  ;;  %5876 = vmatpush3.bf16.msra.mxu1 %v5393_v7  ;;  %v2232_v33 = vmax.bf16 %v2229_v60, %v2225_v13  ;;  %v2351_v21 = vmax.bf16 %v2348_v16, %v2344_v15  ;;  %v2343_v24 = vld [vmem:[#allocation3 + $0x64] sm:$0xf]  ;;  %v2346_v30 = vld [vmem:[#allocation3 + $0x6c] sm:$0xf]  ;;  %v2347_v19 = vld [vmem:[#allocation3 + $0x70] sm:$0xf] }
 0x2b2   : > { %5881 = vmatprep.subr.bf16.mxu0 %v6512_v29  ;;  %5889 = vmatprep.subr.bf16.mxu1 %v6512_v29  ;;  %v2244_v26 = vsel %vm1766_vm6, %v5412_v12, 0  ;;  %v2462_v31 = vld [vmem:[#allocation3 + $0x80] sm:$0xf]  ;;  %v2466_v17 = vld [vmem:[#allocation3 + $0x8c] sm:$0xf]  ;;  %v2349_v34 = vmax.bf16 %v2346_v30, %v2342_v23  ;;  %v2350_v37 = vmax.bf16 %v2347_v19, %v2343_v24 }
 0x2b3   : > { %v5411_v22 = vcombine.low %v2231_v18, %v2232_v33  ;;  %v5418_v25 = vcombine.low %v2351_v21, %v2351_v21  ;;  %v2469_v41 = vmax.bf16 %v2466_v17, %v2462_v31  ;;  %v2460_v0 = vld [vmem:[#allocation3 + $0x78] sm:$0xf]  ;;  %v2461_v2 = vld [vmem:[#allocation3 + $0x7c] sm:$0xf]  ;;  %v2464_v3 = vld [vmem:[#allocation3 + $0x84] sm:$0xf] }
 0x2b4   : > { %5870 = vmatmul.mubr.msk.bf16.vlgmr.msra.gmra.mxu0 %vm1880_vm13, %v7059_v20  ;;  %5878 = vmatmul.mubr.msk.bf16.vlgmr.msra.gmra.mxu1 %vm1880_vm13, %v7062_v63  ;;  %v5417_v43 = vcombine.low %v2349_v34, %v2350_v37  ;;  %v2465_v4 = vld [vmem:[#allocation3 + $0x88] sm:$0xf]  ;;  %v2580_v5 = vld [vmem:[#allocation3 + $0x98] sm:$0xf]  ;;  %v2584_v6 = vld [vmem:[#allocation3 + $0xa4] sm:$0xf]  ;;  %v2467_v7 = vmax.bf16 %v2464_v3, %v2460_v0 }
 0x2b5   : > { %5882 = vmatpush3.bf16.msra.mxu0 %v2008_v62  ;;  %5890 = vmatpush3.bf16.msra.mxu1 %v2008_v62  ;;  %v2362_v40 = vsel %vm1766_vm6, %v5418_v25, 0  ;;  %v5424_v1 = vcombine.low %v2469_v41, %v2469_v41  ;;  %v2468_v8 = vmax.bf16 %v2465_v4, %v2461_v2  ;;  %v2587_v54 = vmax.bf16 %v2584_v6, %v2580_v5  ;;  %v2578_v10 = vld [vmem:[#allocation3 + $0x90] sm:$0xf]  ;;  %v2579_v57 = vld [vmem:[#allocation3 + $0x94] sm:$0xf] }
 0x2b6   : > { %5883 = vmatprep.subr.bf16.mxu0 %v6512_v29  ;;  %5891 = vmatprep.subr.bf16.mxu1 %v6512_v29  ;;  %v2582_v45 = vld [vmem:[#allocation3 + $0x9c] sm:$0xf]  ;;  %v2583_v35 = vld [vmem:[#allocation3 + $0xa0] sm:$0xf]  ;;  %v2698_v46 = vld [vmem:[#allocation3 + $0xb0] sm:$0xf] }
 0x2b7   : > { %5885 = vmatprep.mubr.msk.bf16.mxu0 %vm6513_vm8, %v6512_v29  ;;  %5893 = vmatprep.mubr.msk.bf16.mxu1 %vm6513_vm8, %v6512_v29  ;;  %v2480_v9 = vsel %vm1766_vm6, %v5424_v1, 0  ;;  %v5423_v55 = vcombine.low %v2467_v7, %v2468_v8  ;;  %v5430_v11 = vcombine.low %v2587_v54, %v2587_v54  ;;  %v2702_v48 = vld [vmem:[#allocation3 + $0xbc] sm:$0xf]  ;;  %v2585_v32 = vmax.bf16 %v2582_v45, %v2578_v10  ;;  %v2697_v42 = vld [vmem:[#allocation3 + $0xac] sm:$0xf] }
 0x2b8   : > { %v2586_v28 = vmax.bf16 %v2583_v35, %v2579_v57  ;;  %v2705_v62 = vmax.bf16 %v2702_v48, %v2698_v46  ;;  %v2700_v14 = vld [vmem:[#allocation3 + $0xb4] sm:$0xf]  ;;  %v2701_v53 = vld [vmem:[#allocation3 + $0xb8] sm:$0xf]  ;;  %v2816_v44 = vld [vmem:[#allocation3 + $0xc8] sm:$0xf] }
 0x2b9   : > { %5884 = vmatpush3.bf16.msra.mxu0 %v5399_v50  ;;  %5892 = vmatpush3.bf16.msra.mxu1 %v5399_v50  ;;  %v2598_v36 = vsel %vm1766_vm6, %v5430_v11, 0  ;;  %v2696_v50 = vld [vmem:[#allocation3 + $0xa8] sm:$0xf]  ;;  %v2820_v47 = vld [vmem:[#allocation3 + $0xd4] sm:$0xf]  ;;  %v2704_v56 = vmax.bf16 %v2701_v53, %v2697_v42 }
 0x2ba   : > { %5897 = vmatprep.subr.bf16.mxu0 %v6512_v29  ;;  %5905 = vmatprep.subr.bf16.mxu1 %v6512_v29  ;;  %v5429_v49 = vcombine.low %v2585_v32, %v2586_v28  ;;  %v5436_v51 = vcombine.low %v2705_v62, %v2705_v62  ;;  %v2703_v52 = vmax.bf16 %v2700_v14, %v2696_v50  ;;  %v2815_v12 = vld [vmem:[#allocation3 + $0xc4] sm:$0xf]  ;;  %v2818_v13 = vld [vmem:[#allocation3 + $0xcc] sm:$0xf]  ;;  %v2819_v61 = vld [vmem:[#allocation3 + $0xd0] sm:$0xf] }
 0x2bb   : > { %v2934_v60 = vld [vmem:[#allocation3 + $0xe0] sm:$0xf]  ;;  %v2938_v15 = vld [vmem:[#allocation3 + $0xec] sm:$0xf]  ;;  %v2822_v18 = vmax.bf16 %v2819_v61, %v2815_v12  ;;  %v2933_v25 = vld [vmem:[#allocation3 + $0xdc] sm:$0xf] }
 0x2bc   : > { %5886 = vmatmul.mubr.msk.bf16.vlgmr.msra.gmra.mxu0 %vm1880_vm13, %v7059_v20  ;;  %5894 = vmatmul.mubr.msk.bf16.vlgmr.msra.gmra.mxu1 %vm1880_vm13, %v7062_v63  ;;  %v2716_v58 = vsel %vm1766_vm6, %v5436_v51, 0  ;;  %v5435_v59 = vcombine.low %v2703_v52, %v2704_v56  ;;  %v2936_v24 = vld [vmem:[#allocation3 + $0xe4] sm:$0xf]  ;;  %v2937_v30 = vld [vmem:[#allocation3 + $0xe8] sm:$0xf] }
 0x2bd   : > { %5898 = vmatpush3.bf16.msra.mxu0 %v2126_v27  ;;  %5906 = vmatpush3.bf16.msra.mxu1 %v2126_v27  ;;  %v2823_v27 = vmax.bf16 %v2820_v47, %v2816_v44  ;;  %v3052_v19 = vld [vmem:[#allocation3 + $0xf8] sm:$0xf]  ;;  %v3056_v31 = vld [vmem:[#allocation3 + $0x104] sm:$0xf]  ;;  %v2940_v34 = vmax.bf16 %v2937_v30, %v2933_v25  ;;  %v3051_v1 = vld [vmem:[#allocation3 + $0xf4] sm:$0xf] }
 0x2be   : > { %5899 = vmatprep.subr.bf16.mxu0 %v6512_v29  ;;  %5907 = vmatprep.subr.bf16.mxu1 %v6512_v29  ;;  %v3054_v2 = vld [vmem:[#allocation3 + $0xfc] sm:$0xf]  ;;  %v3055_v3 = vld [vmem:[#allocation3 + $0x100] sm:$0xf]  ;;  %v3170_v4 = vld [vmem:[#allocation3 + $0x110] sm:$0xf] }
 0x2bf   : > { %5901 = vmatprep.mubr.msk.bf16.mxu0 %vm6513_vm8, %v6512_v29  ;;  %5909 = vmatprep.mubr.msk.bf16.mxu1 %vm6513_vm8, %v6512_v29  ;;  %v5442_v39 = vcombine.low %v2823_v27, %v2823_v27  ;;  %v3174_v5 = vld [vmem:[#allocation3 + $0x11c] sm:$0xf]  ;;  %v3058_v7 = vmax.bf16 %v3055_v3, %v3051_v1  ;;  %v3169_v11 = vld [vmem:[#allocation3 + $0x10c] sm:$0xf]  ;;  %v3172_v57 = vld [vmem:[#allocation3 + $0x114] sm:$0xf] }
 0x2c0   : > { %v3173_v45 = vld [vmem:[#allocation3 + $0x118] sm:$0xf]  ;;  %v7214_v28 = vld [vmem:[%s7843_s8] sm:$0xf]  ;;  %v7224_v62 = vld [vmem:[%s7843_s8 + $0x8] sm:$0xf] }
 0x2c1   : > { %5900 = vmatpush3.bf16.msra.mxu0 %v5405_v38  ;;  %5908 = vmatpush3.bf16.msra.mxu1 %v5405_v38  ;;  %v2814_v38 = vld [vmem:[#allocation3 + $0xc0] sm:$0xf]  ;;  %v2834_v33 = vsel %vm1766_vm6, %v5442_v39, 0  ;;  %v3176_v46 = vmax.bf16 %v3173_v45, %v3169_v11  ;;  %v7244_v50 = vld [vmem:[%s7843_s8 + $0x18] sm:$0xf] }
 0x2c2   : > { %5913 = vmatprep.subr.bf16.mxu0 %v6512_v29  ;;  %5921 = vmatprep.subr.bf16.mxu1 %v6512_v29  ;;  %v2821_v16 = vmax.bf16 %v2818_v13, %v2814_v38  ;;  %v7249_v51 = vld [vmem:[%s7843_s8 + $0x1c] sm:$0xf]  ;;  %v7254_v42 = vld [vmem:[%s7843_s8 + $0x20] sm:$0xf]  ;;  %v7259_v14 = vld [vmem:[%s7843_s8 + $0x24] sm:$0xf] }
 0x2c3   : > { %v7264_v53 = vld [vmem:[%s7843_s8 + $0x28] sm:$0xf]  ;;  %v7269_v44 = vld [vmem:[%s7843_s8 + $0x2c] sm:$0xf]  ;;  %v7274_v47 = vld [vmem:[%s7843_s8 + $0x30] sm:$0xf] }
 0x2c4   : > { %5902 = vmatmul.mubr.msk.bf16.vlgmr.msra.gmra.mxu0 %vm1880_vm13, %v7059_v20  ;;  %5910 = vmatmul.mubr.msk.bf16.vlgmr.msra.gmra.mxu1 %vm1880_vm13, %v7062_v63  ;;  %v5441_v21 = vcombine.low %v2821_v16, %v2822_v18  ;;  %v7279_v52 = vld [vmem:[%s7843_s8 + $0x34] sm:$0xf]  ;;  %v7284_v56 = vld [vmem:[%s7843_s8 + $0x38] sm:$0xf]  ;;  %v7294_v27 = vld [vmem:[%s7843_s8 + $0x40] sm:$0xf] }
 0x2c5   : > { %5914 = vmatpush3.bf16.msra.mxu0 %v2244_v26  ;;  %5922 = vmatpush3.bf16.msra.mxu1 %v2244_v26  ;;  %v2941_v26 = vmax.bf16 %v2938_v15, %v2934_v60  ;;  %v7304_v38 = vld [vmem:[%s7844_s9] ss:$0 sm:$0xff] }
 0x2c6   : > { %5915 = vmatprep.subr.bf16.mxu0 %v6512_v29  ;;  %5923 = vmatprep.subr.bf16.mxu1 %v6512_v29  ;;  %v7309_v39 = vld [vmem:[%s7845_s10] ss:$0 sm:$0xff] }
 0x2c7   : > { %5917 = vmatprep.mubr.msk.bf16.mxu0 %vm6513_vm8, %v6512_v29  ;;  %5925 = vmatprep.mubr.msk.bf16.mxu1 %vm6513_vm8, %v6512_v29  ;;  %v5448_v23 = vcombine.low %v2941_v26, %v2941_v26 }
 0x2c9   : > { %5916 = vmatpush3.bf16.msra.mxu0 %v5411_v22  ;;  %5924 = vmatpush3.bf16.msra.mxu1 %v5411_v22  ;;  %v2932_v22 = vld [vmem:[#allocation3 + $0xd8] sm:$0xf]  ;;  %v2952_v37 = vsel %vm1766_vm6, %v5448_v23, 0 }
 0x2ca   : > { %5929 = vmatprep.subr.bf16.mxu0 %v6512_v29  ;;  %5937 = vmatprep.subr.bf16.mxu1 %v6512_v29  ;;  %v2939_v17 = vmax.bf16 %v2936_v24, %v2932_v22 }
 0x2cc   : > { %5918 = vmatmul.mubr.msk.bf16.vlgmr.msra.gmra.mxu0 %vm1880_vm13, %v7059_v20  ;;  %5926 = vmatmul.mubr.msk.bf16.vlgmr.msra.gmra.mxu1 %vm1880_vm13, %v7062_v63  ;;  %v5447_v41 = vcombine.low %v2939_v17, %v2940_v34 }
 0x2cd   : > { %5930 = vmatpush3.bf16.msra.mxu0 %v2362_v40  ;;  %5938 = vmatpush3.bf16.msra.mxu1 %v2362_v40  ;;  %v3059_v40 = vmax.bf16 %v3056_v31, %v3052_v19 }
 0x2ce   : > { %5931 = vmatprep.subr.bf16.mxu0 %v6512_v29  ;;  %5939 = vmatprep.subr.bf16.mxu1 %v6512_v29 }
 0x2cf   : > { %5933 = vmatprep.mubr.msk.bf16.mxu0 %vm6513_vm8, %v6512_v29  ;;  %5941 = vmatprep.mubr.msk.bf16.mxu1 %vm6513_vm8, %v6512_v29  ;;  %v5454_v0 = vcombine.low %v3059_v40, %v3059_v40 }
 0x2d1   : > { %5932 = vmatpush3.bf16.msra.mxu0 %v5417_v43  ;;  %5940 = vmatpush3.bf16.msra.mxu1 %v5417_v43  ;;  %v3050_v43 = vld [vmem:[#allocation3 + $0xf0] sm:$0xf]  ;;  %v3070_v8 = vsel %vm1766_vm6, %v5454_v0, 0 }
 0x2d2   : > { %5945 = vmatprep.subr.bf16.mxu0 %v6512_v29  ;;  %5953 = vmatprep.subr.bf16.mxu1 %v6512_v29  ;;  %v3057_v6 = vmax.bf16 %v3054_v2, %v3050_v43 }
 0x2d4   : > { %5934 = vmatmul.mubr.msk.bf16.vlgmr.msra.gmra.mxu0 %vm1880_vm13, %v7059_v20  ;;  %5942 = vmatmul.mubr.msk.bf16.vlgmr.msra.gmra.mxu1 %vm1880_vm13, %v7062_v63  ;;  %v5453_v54 = vcombine.low %v3057_v6, %v3058_v7 }
 0x2d5   : > { %5946 = vmatpush3.bf16.msra.mxu0 %v2480_v9  ;;  %5954 = vmatpush3.bf16.msra.mxu1 %v2480_v9  ;;  %v3177_v9 = vmax.bf16 %v3174_v5, %v3170_v4 }
 0x2d6   : > { %5947 = vmatprep.subr.bf16.mxu0 %v6512_v29  ;;  %5955 = vmatprep.subr.bf16.mxu1 %v6512_v29 }
 0x2d7   : > { %5949 = vmatprep.mubr.msk.bf16.mxu0 %vm6513_vm8, %v6512_v29  ;;  %5957 = vmatprep.mubr.msk.bf16.mxu1 %vm6513_vm8, %v6512_v29  ;;  %v5460_v10 = vcombine.low %v3177_v9, %v3177_v9 }
 0x2d9   : > { %5948 = vmatpush3.bf16.msra.mxu0 %v5423_v55  ;;  %5956 = vmatpush3.bf16.msra.mxu1 %v5423_v55  ;;  %v3168_v55 = vld [vmem:[#allocation3 + $0x108] sm:$0xf]  ;;  %v3188_v48 = vsel %vm1766_vm6, %v5460_v10, 0 }
 0x2da   : > { %5961 = vmatprep.subr.bf16.mxu0 %v6512_v29  ;;  %5969 = vmatprep.subr.bf16.mxu1 %v6512_v29  ;;  %v3175_v35 = vmax.bf16 %v3172_v57, %v3168_v55 }
 0x2dc   : > { %5950 = vmatmul.mubr.msk.bf16.vlgmr.msra.gmra.mxu0 %vm1880_vm13, %v7059_v20  ;;  %5958 = vmatmul.mubr.msk.bf16.vlgmr.msra.gmra.mxu1 %vm1880_vm13, %v7062_v63  ;;  %v5459_v32 = vcombine.low %v3175_v35, %v3176_v46 }
 0x2dd   : > { %5962 = vmatpush3.bf16.msra.mxu0 %v2598_v36  ;;  %5970 = vmatpush3.bf16.msra.mxu1 %v2598_v36  ;;  %v7219_v36 = vld [vmem:[%s7843_s8 + $0x4] sm:$0xf] }
 0x2de   : > { %5963 = vmatprep.subr.bf16.mxu0 %v6512_v29  ;;  %5971 = vmatprep.subr.bf16.mxu1 %v6512_v29 }
 0x2df   : > { %5965 = vmatprep.mubr.msk.bf16.mxu0 %vm6513_vm8, %v6512_v29  ;;  %5973 = vmatprep.mubr.msk.bf16.mxu1 %vm6513_vm8, %v6512_v29 }
 0x2e1   : > { %5964 = vmatpush3.bf16.msra.mxu0 %v5429_v49  ;;  %5972 = vmatpush3.bf16.msra.mxu1 %v5429_v49  ;;  %v7239_v49 = vld [vmem:[%s7843_s8 + $0x14] sm:$0xf] }
 0x2e2   : > { %5977 = vmatprep.subr.bf16.mxu0 %v6512_v29  ;;  %5985 = vmatprep.subr.bf16.mxu1 %v6512_v29 }
 0x2e4   : > { %5966 = vmatmul.mubr.msk.bf16.vlgmr.msra.gmra.mxu0 %vm1880_vm13, %v7059_v20  ;;  %5974 = vmatmul.mubr.msk.bf16.vlgmr.msra.gmra.mxu1 %vm1880_vm13, %v7062_v63 }
 0x2e5   : > { %5978 = vmatpush3.bf16.msra.mxu0 %v2716_v58  ;;  %5986 = vmatpush3.bf16.msra.mxu1 %v2716_v58  ;;  %v7289_v58 = vld [vmem:[%s7843_s8 + $0x3c] sm:$0xf] }
 0x2e6   : > { %5979 = vmatprep.subr.bf16.mxu0 %v6512_v29  ;;  %5987 = vmatprep.subr.bf16.mxu1 %v6512_v29 }
 0x2e7   : > { %5981 = vmatprep.mubr.msk.bf16.mxu0 %vm6513_vm8, %v6512_v29  ;;  %5989 = vmatprep.mubr.msk.bf16.mxu1 %vm6513_vm8, %v6512_v29 }
 0x2e9   : > { %5980 = vmatpush3.bf16.msra.mxu0 %v5435_v59  ;;  %5988 = vmatpush3.bf16.msra.mxu1 %v5435_v59  ;;  %v7299_v59 = vld [vmem:[%s7843_s8 + $0x44] sm:$0xf] }
 0x2ea   : > { %5993 = vmatprep.subr.bf16.mxu0 %v6512_v29  ;;  %6001 = vmatprep.subr.bf16.mxu1 %v6512_v29 }
 0x2ec   : > { %5982 = vmatmul.mubr.msk.bf16.vlgmr.msra.gmra.mxu0 %vm1880_vm13, %v7059_v20  ;;  %5990 = vmatmul.mubr.msk.bf16.vlgmr.msra.gmra.mxu1 %vm1880_vm13, %v7062_v63 }
 0x2ed   : > { %5994 = vmatpush3.bf16.msra.mxu0 %v2834_v33  ;;  %6002 = vmatpush3.bf16.msra.mxu1 %v2834_v33 }
 0x2ee   : > { %5995 = vmatprep.subr.bf16.mxu0 %v6512_v29  ;;  %6003 = vmatprep.subr.bf16.mxu1 %v6512_v29 }
 0x2ef   : > { %5997 = vmatprep.mubr.msk.bf16.mxu0 %vm6513_vm8, %v6512_v29  ;;  %6005 = vmatprep.mubr.msk.bf16.mxu1 %vm6513_vm8, %v6512_v29 }
 0x2f1   : > { %5996 = vmatpush3.bf16.msra.mxu0 %v5441_v21  ;;  %6004 = vmatpush3.bf16.msra.mxu1 %v5441_v21 }
 0x2f2   : > { %6009 = vmatprep.subr.bf16.mxu0 %v6512_v29  ;;  %6017 = vmatprep.subr.bf16.mxu1 %v6512_v29 }
 0x2f4   : > { %5998 = vmatmul.mubr.msk.bf16.vlgmr.msra.gmra.mxu0 %vm1880_vm13, %v7059_v20  ;;  %6006 = vmatmul.mubr.msk.bf16.vlgmr.msra.gmra.mxu1 %vm1880_vm13, %v7062_v63 }
 0x2f5   : > { %6010 = vmatpush3.bf16.msra.mxu0 %v2952_v37  ;;  %6018 = vmatpush3.bf16.msra.mxu1 %v2952_v37 }
 0x2f6   : > { %6011 = vmatprep.subr.bf16.mxu0 %v6512_v29  ;;  %6019 = vmatprep.subr.bf16.mxu1 %v6512_v29 }
 0x2f7   : > { %6013 = vmatprep.mubr.msk.bf16.mxu0 %vm6513_vm8, %v6512_v29  ;;  %6021 = vmatprep.mubr.msk.bf16.mxu1 %vm6513_vm8, %v6512_v29 }
 0x2f9   : > { %6012 = vmatpush3.bf16.msra.mxu0 %v5447_v41  ;;  %6020 = vmatpush3.bf16.msra.mxu1 %v5447_v41 }
 0x2fa   : > { %6025 = vmatprep.subr.bf16.mxu0 %v6512_v29  ;;  %6033 = vmatprep.subr.bf16.mxu1 %v6512_v29 }
 0x2fc   : > { %6014 = vmatmul.mubr.msk.bf16.vlgmr.msra.gmra.mxu0 %vm1880_vm13, %v7059_v20  ;;  %6022 = vmatmul.mubr.msk.bf16.vlgmr.msra.gmra.mxu1 %vm1880_vm13, %v7062_v63 }
 0x2fd   : > { %6026 = vmatpush3.bf16.msra.mxu0 %v3070_v8  ;;  %6034 = vmatpush3.bf16.msra.mxu1 %v3070_v8 }
 0x2fe   : > { %6027 = vmatprep.subr.bf16.mxu0 %v6512_v29  ;;  %6035 = vmatprep.subr.bf16.mxu1 %v6512_v29 }
 0x2ff   : > { %6029 = vmatprep.mubr.msk.bf16.mxu0 %vm6513_vm8, %v6512_v29  ;;  %6037 = vmatprep.mubr.msk.bf16.mxu1 %vm6513_vm8, %v6512_v29 }
 0x301   : > { %6028 = vmatpush3.bf16.msra.mxu0 %v5453_v54  ;;  %6036 = vmatpush3.bf16.msra.mxu1 %v5453_v54 }
 0x302   : > { %6041 = vmatprep.subr.bf16.mxu0 %v6512_v29  ;;  %6049 = vmatprep.subr.bf16.mxu1 %v6512_v29 }
 0x304   : > { %6030 = vmatmul.mubr.msk.bf16.vlgmr.msra.gmra.mxu0 %vm1880_vm13, %v7059_v20  ;;  %6038 = vmatmul.mubr.msk.bf16.vlgmr.msra.gmra.mxu1 %vm1880_vm13, %v7062_v63 }
 0x305   : > { %6042 = vmatpush3.bf16.msra.mxu0 %v3188_v48  ;;  %6050 = vmatpush3.bf16.msra.mxu1 %v3188_v48 }
 0x306   : > { %6043 = vmatprep.subr.bf16.mxu0 %v6512_v29  ;;  %6051 = vmatprep.subr.bf16.mxu1 %v6512_v29 }
 0x307   : > { %6045 = vmatprep.mubr.msk.bf16.mxu0 %vm6513_vm8, %v6512_v29  ;;  %6053 = vmatprep.mubr.msk.bf16.mxu1 %vm6513_vm8, %v6512_v29 }
 0x309   : > { %6044 = vmatpush3.bf16.msra.mxu0 %v5459_v32  ;;  %6052 = vmatpush3.bf16.msra.mxu1 %v5459_v32 }
 0x30c   : > { %6046 = vmatmul.mubr.msk.bf16.vlgmr.msra.gmra.mxu0 %vm1880_vm13, %v7059_v20  ;;  %6054 = vmatmul.mubr.msk.bf16.vlgmr.msra.gmra.mxu1 %vm1880_vm13, %v7062_v63  ;;  %v7229_v20 = vld [vmem:[%s7843_s8 + $0xc] sm:$0xf]  ;;  %v7234_v63 = vld [vmem:[%s7843_s8 + $0x10] sm:$0xf] }
 0x374   : > { %v1922_v12 = vpop.f32.mrf.mxu0  ;;  %v1966_v13 = vpop.f32.mrf.mxu1 }
 0x375   : > { %v1973_v61 = vmax.f32 %v1922_v12, %v1966_v13 }
 0x376   : > { %v5871_v60 = vpop.f32.mrf.mxu0  ;;  %v5879_v15 = vpop.f32.mrf.mxu1 }
 0x377   : > { %v5602_v16 = vpack.c.bf16 %v1973_v61, %v1973_v61 }
 0x378   : > { %v1925_v18 = vpop.f32.mrf.mxu0  ;;  %v1969_v33 = vpop.f32.mrf.mxu1 }
 0x379   : > { %1984 = vst.msk [vmem:[#allocation4] sm:$0xf] %vm998_vm2, %v5602_v16  ;;  %v1974_v26 = vmax.f32 %v1925_v18, %v1969_v33 }
 0x37a   : > { %v5872_v21 = vpop.f32.mrf.mxu0  ;;  %v5880_v22 = vpop.f32.mrf.mxu1 }
 0x37b   : > { %v5603_v23 = vpack.c.bf16 %v1974_v26, %v1974_v26 }
 0x37c   : > { %v2044_v25 = vpop.f32.mrf.mxu0  ;;  %v2085_v24 = vpop.f32.mrf.mxu1 }
 0x37d   : > { %1986 = vst.msk [vmem:[#allocation4 + $0x4] sm:$0x3] %vm1985_vm14, %v5603_v23  ;;  %v2092_v30 = vmax.f32 %v2044_v25, %v2085_v24 }
 0x37e   : > { %v5887_v19 = vpop.f32.mrf.mxu0  ;;  %v5895_v31 = vpop.f32.mrf.mxu1 }
 0x37f   : > { %v5604_v17 = vpack.c.bf16 %v2092_v30, %v2092_v30 }
 0x380   : > { %v2047_v34 = vpop.f32.mrf.mxu0  ;;  %v2088_v37 = vpop.f32.mrf.mxu1 }
 0x381   : > { %2103 = vst.msk [vmem:[#allocation4 + $0x8] sm:$0xf] %vm998_vm2, %v5604_v17  ;;  %v2093_v40 = vmax.f32 %v2047_v34, %v2088_v37 }
 0x382   : > { %v5888_v41 = vpop.f32.mrf.mxu0  ;;  %v5896_v43 = vpop.f32.mrf.mxu1 }
 0x383   : > { %v5605_v0 = vpack.c.bf16 %v2093_v40, %v2093_v40 }
 0x384   : > { %v2162_v1 = vpop.f32.mrf.mxu0  ;;  %v2203_v2 = vpop.f32.mrf.mxu1 }
 0x385   : > { %2104 = vst.msk [vmem:[#allocation4 + $0xc] sm:$0x3] %vm1985_vm14, %v5605_v0  ;;  %v2210_v3 = vmax.f32 %v2162_v1, %v2203_v2 }
 0x386   : > { %v5903_v4 = vpop.f32.mrf.mxu0  ;;  %v5911_v5 = vpop.f32.mrf.mxu1 }
 0x387   : > { %v5606_v6 = vpack.c.bf16 %v2210_v3, %v2210_v3 }
 0x388   : > { %v2165_v7 = vpop.f32.mrf.mxu0  ;;  %v2206_v8 = vpop.f32.mrf.mxu1 }
 0x389   : > { %2221 = vst.msk [vmem:[#allocation4 + $0x10] sm:$0xf] %vm998_vm2, %v5606_v6  ;;  %v2211_v9 = vmax.f32 %v2165_v7, %v2206_v8 }
 0x38a   : > { %v5904_v54 = vpop.f32.mrf.mxu0  ;;  %v5912_v55 = vpop.f32.mrf.mxu1 }
 0x38b   : > { %v5607_v10 = vpack.c.bf16 %v2211_v9, %v2211_v9 }
 0x38c   : > { %v2280_v11 = vpop.f32.mrf.mxu0  ;;  %v2321_v57 = vpop.f32.mrf.mxu1 }
 0x38d   : > { %2222 = vst.msk [vmem:[#allocation4 + $0x14] sm:$0x3] %vm1985_vm14, %v5607_v10  ;;  %v2328_v45 = vmax.f32 %v2280_v11, %v2321_v57 }
 0x38e   : > { %v5919_v35 = vpop.f32.mrf.mxu0  ;;  %v5927_v46 = vpop.f32.mrf.mxu1 }
 0x38f   : > { %v5608_v48 = vpack.c.bf16 %v2328_v45, %v2328_v45 }
 0x390   : > { %v2283_v32 = vpop.f32.mrf.mxu0  ;;  %v2324_v12 = vpop.f32.mrf.mxu1 }
 0x391   : > { %2339 = vst.msk [vmem:[#allocation4 + $0x18] sm:$0xf] %vm998_vm2, %v5608_v48  ;;  %v2329_v13 = vmax.f32 %v2283_v32, %v2324_v12 }
 0x392   : > { %v5920_v61 = vpop.f32.mrf.mxu0  ;;  %v5928_v60 = vpop.f32.mrf.mxu1 }
 0x393   : > { %v5609_v15 = vpack.c.bf16 %v2329_v13, %v2329_v13 }
 0x394   : > { %v2398_v16 = vpop.f32.mrf.mxu0  ;;  %v2439_v18 = vpop.f32.mrf.mxu1 }
 0x395   : > { %2340 = vst.msk [vmem:[#allocation4 + $0x1c] sm:$0x3] %vm1985_vm14, %v5609_v15  ;;  %v2446_v33 = vmax.f32 %v2398_v16, %v2439_v18 }
 0x396   : > { %v5935_v26 = vpop.f32.mrf.mxu0  ;;  %v5943_v21 = vpop.f32.mrf.mxu1 }
 0x397   : > { %v5610_v22 = vpack.c.bf16 %v2446_v33, %v2446_v33 }
 0x398   : > { %v2401_v23 = vpop.f32.mrf.mxu0  ;;  %v2442_v25 = vpop.f32.mrf.mxu1 }
 0x399   : > { %2457 = vst.msk [vmem:[#allocation4 + $0x20] sm:$0xf] %vm998_vm2, %v5610_v22  ;;  %v2447_v24 = vmax.f32 %v2401_v23, %v2442_v25 }
 0x39a   : > { %v5936_v30 = vpop.f32.mrf.mxu0  ;;  %v5944_v19 = vpop.f32.mrf.mxu1 }
 0x39b   : > { %v5611_v31 = vpack.c.bf16 %v2447_v24, %v2447_v24 }
 0x39c   : > { %v2516_v17 = vpop.f32.mrf.mxu0  ;;  %v2557_v34 = vpop.f32.mrf.mxu1 }
 0x39d   : > { %2458 = vst.msk [vmem:[#allocation4 + $0x24] sm:$0x3] %vm1985_vm14, %v5611_v31  ;;  %v2564_v37 = vmax.f32 %v2516_v17, %v2557_v34 }
 0x39e   : > { %v5951_v40 = vpop.f32.mrf.mxu0  ;;  %v5959_v41 = vpop.f32.mrf.mxu1 }
 0x39f   : > { %v5612_v43 = vpack.c.bf16 %v2564_v37, %v2564_v37 }
 0x3a0   : > { %v2519_v0 = vpop.f32.mrf.mxu0  ;;  %v2560_v1 = vpop.f32.mrf.mxu1 }
 0x3a1   : > { %2575 = vst.msk [vmem:[#allocation4 + $0x28] sm:$0xf] %vm998_vm2, %v5612_v43  ;;  %v2565_v2 = vmax.f32 %v2519_v0, %v2560_v1 }
 0x3a2   : > { %v5952_v3 = vpop.f32.mrf.mxu0  ;;  %v5960_v4 = vpop.f32.mrf.mxu1 }
 0x3a3   : > { %v5613_v5 = vpack.c.bf16 %v2565_v2, %v2565_v2 }
 0x3a4   : > { %v2634_v6 = vpop.f32.mrf.mxu0  ;;  %v2675_v7 = vpop.f32.mrf.mxu1 }
 0x3a5   : > { %2576 = vst.msk [vmem:[#allocation4 + $0x2c] sm:$0x3] %vm1985_vm14, %v5613_v5  ;;  %v2682_v8 = vmax.f32 %v2634_v6, %v2675_v7 }
 0x3a6   : > { %v5967_v9 = vpop.f32.mrf.mxu0  ;;  %v5975_v54 = vpop.f32.mrf.mxu1 }
 0x3a7   : > { %v5614_v55 = vpack.c.bf16 %v2682_v8, %v2682_v8 }
 0x3a8   : > { %v2637_v10 = vpop.f32.mrf.mxu0  ;;  %v2678_v11 = vpop.f32.mrf.mxu1 }
 0x3a9   : > { %2693 = vst.msk [vmem:[#allocation4 + $0x30] sm:$0xf] %vm998_vm2, %v5614_v55  ;;  %v2683_v57 = vmax.f32 %v2637_v10, %v2678_v11 }
 0x3aa   : > { %v5968_v45 = vpop.f32.mrf.mxu0  ;;  %v5976_v35 = vpop.f32.mrf.mxu1 }
 0x3ab   : > { %v5615_v46 = vpack.c.bf16 %v2683_v57, %v2683_v57 }
 0x3ac   : > { %v2752_v48 = vpop.f32.mrf.mxu0  ;;  %v2793_v32 = vpop.f32.mrf.mxu1 }
 0x3ad   : > { %2694 = vst.msk [vmem:[#allocation4 + $0x34] sm:$0x3] %vm1985_vm14, %v5615_v46  ;;  %v2800_v12 = vmax.f32 %v2752_v48, %v2793_v32 }
 0x3ae   : > { %v5983_v13 = vpop.f32.mrf.mxu0  ;;  %v5991_v61 = vpop.f32.mrf.mxu1 }
 0x3af   : > { %v5616_v60 = vpack.c.bf16 %v2800_v12, %v2800_v12 }
 0x3b0   : > { %v2755_v15 = vpop.f32.mrf.mxu0  ;;  %v2796_v16 = vpop.f32.mrf.mxu1 }
 0x3b1   : > { %2811 = vst.msk [vmem:[#allocation4 + $0x38] sm:$0xf] %vm998_vm2, %v5616_v60  ;;  %v2801_v18 = vmax.f32 %v2755_v15, %v2796_v16 }
 0x3b2   : > { %v5984_v33 = vpop.f32.mrf.mxu0  ;;  %v5992_v26 = vpop.f32.mrf.mxu1 }
 0x3b3   : > { %v5617_v21 = vpack.c.bf16 %v2801_v18, %v2801_v18 }
 0x3b4   : > { %v2870_v22 = vpop.f32.mrf.mxu0  ;;  %v2911_v23 = vpop.f32.mrf.mxu1 }
 0x3b5   : > { %2812 = vst.msk [vmem:[#allocation4 + $0x3c] sm:$0x3] %vm1985_vm14, %v5617_v21  ;;  %v2918_v25 = vmax.f32 %v2870_v22, %v2911_v23 }
 0x3b6   : > { %v5999_v24 = vpop.f32.mrf.mxu0  ;;  %v6007_v30 = vpop.f32.mrf.mxu1 }
 0x3b7   : > { %v5618_v19 = vpack.c.bf16 %v2918_v25, %v2918_v25 }
 0x3b8   : > { %v2873_v31 = vpop.f32.mrf.mxu0  ;;  %v2914_v17 = vpop.f32.mrf.mxu1 }
 0x3b9   : > { %2929 = vst.msk [vmem:[#allocation4 + $0x40] sm:$0xf] %vm998_vm2, %v5618_v19  ;;  %v2919_v34 = vmax.f32 %v2873_v31, %v2914_v17 }
 0x3ba   : > { %v6000_v37 = vpop.f32.mrf.mxu0  ;;  %v6008_v40 = vpop.f32.mrf.mxu1 }
 0x3bb   : > { %v5619_v41 = vpack.c.bf16 %v2919_v34, %v2919_v34 }
 0x3bc   : > { %v2988_v43 = vpop.f32.mrf.mxu0  ;;  %v3029_v0 = vpop.f32.mrf.mxu1 }
 0x3bd   : > { %2930 = vst.msk [vmem:[#allocation4 + $0x44] sm:$0x3] %vm1985_vm14, %v5619_v41  ;;  %v3036_v1 = vmax.f32 %v2988_v43, %v3029_v0 }
 0x3be   : > { %v6015_v2 = vpop.f32.mrf.mxu0  ;;  %v6023_v3 = vpop.f32.mrf.mxu1 }
 0x3bf   : > { %v5620_v4 = vpack.c.bf16 %v3036_v1, %v3036_v1 }
 0x3c0   : > { %v2991_v5 = vpop.f32.mrf.mxu0  ;;  %v3032_v6 = vpop.f32.mrf.mxu1 }
 0x3c1   : > { %3047 = vst.msk [vmem:[#allocation4 + $0x48] sm:$0xf] %vm998_vm2, %v5620_v4  ;;  %v3037_v7 = vmax.f32 %v2991_v5, %v3032_v6 }
 0x3c2   : > { %v6016_v8 = vpop.f32.mrf.mxu0  ;;  %v6024_v9 = vpop.f32.mrf.mxu1 }
 0x3c3   : > { %v5621_v54 = vpack.c.bf16 %v3037_v7, %v3037_v7 }
 0x3c4   : > { %v3106_v55 = vpop.f32.mrf.mxu0  ;;  %v3147_v10 = vpop.f32.mrf.mxu1 }
 0x3c5   : > { %3048 = vst.msk [vmem:[#allocation4 + $0x4c] sm:$0x3] %vm1985_vm14, %v5621_v54  ;;  %v3154_v11 = vmax.f32 %v3106_v55, %v3147_v10 }
 0x3c6   : > { %v6031_v57 = vpop.f32.mrf.mxu0  ;;  %v6039_v45 = vpop.f32.mrf.mxu1 }
 0x3c7   : > { %v5622_v35 = vpack.c.bf16 %v3154_v11, %v3154_v11 }
 0x3c8   : > { %v3109_v46 = vpop.f32.mrf.mxu0  ;;  %v3150_v48 = vpop.f32.mrf.mxu1 }
 0x3c9   : > { %3165 = vst.msk [vmem:[#allocation4 + $0x50] sm:$0xf] %vm998_vm2, %v5622_v35  ;;  %v3155_v32 = vmax.f32 %v3109_v46, %v3150_v48 }
 0x3ca   : > { %v6032_v12 = vpop.f32.mrf.mxu0  ;;  %v6040_v13 = vpop.f32.mrf.mxu1 }
 0x3cb   : > { %v5623_v61 = vpack.c.bf16 %v3155_v32, %v3155_v32 }
 0x3cc   : > { %v3224_v60 = vpop.f32.mrf.mxu0  ;;  %v3265_v15 = vpop.f32.mrf.mxu1 }
 0x3cd   : > { %3166 = vst.msk [vmem:[#allocation4 + $0x54] sm:$0x3] %vm1985_vm14, %v5623_v61  ;;  %v3272_v16 = vmax.f32 %v3224_v60, %v3265_v15 }
 0x3ce   : > { %v6047_v18 = vpop.f32.mrf.mxu0  ;;  %v6055_v33 = vpop.f32.mrf.mxu1 }
 0x3cf   : > { %v5624_v26 = vpack.c.bf16 %v3272_v16, %v3272_v16 }
 0x3d0   : > { %v3227_v21 = vpop.f32.mrf.mxu0  ;;  %v3268_v22 = vpop.f32.mrf.mxu1 }
 0x3d1   : > { %3283 = vst.msk [vmem:[#allocation4 + $0x58] sm:$0xf] %vm998_vm2, %v5624_v26  ;;  %v3273_v23 = vmax.f32 %v3227_v21, %v3268_v22 }
 0x3d2   : > { %v6048_v25 = vpop.f32.mrf.mxu0  ;;  %v6056_v24 = vpop.f32.mrf.mxu1 }
 0x3d3   : > { %v5625_v30 = vpack.c.bf16 %v3273_v23, %v3273_v23 }
 0x3d5   : > { %3284 = vst.msk [vmem:[#allocation4 + $0x5c] sm:$0x3] %vm1985_vm14, %v5625_v30 }
 0x3d6 LB: >> { %v5468_v19 = vcombine.low %v7224_v62, %v7229_v20  ;;  %v5471_v31 = vcombine.low %v7214_v28, %v7219_v36  ;;  %v6514_v17 = vmov 0.0   ;;  %s5626_s20 = sshll.u32 %s6501_s24, 3  ;;  %vm6515_vm15 = vmmov 0   ;;  %s3310_s24 = sadd.s32 1, %s6501_s24   ;;  %s6501_s24 = sphi %s7335_s24, %s3310_s24  }
 0x3d7   : >> { %6057 = vmatprep.subr.bf16.mxu0 %v6514_v17  ;;  %6063 = vmatprep.subr.bf16.mxu1 %v6514_v17  ;;  %s7354_s2 = scalar_lea.vmem [#allocation4], %s5626_s20  ;;  %v5480_v41 = vcombine.low %v7244_v50, %v7249_v51  ;;  %v5474_v6 = vcombine.low %v7234_v63, %v7239_v49  ;;  %v5488_v55 = vcombine.low %v7264_v53, %v7269_v44  ;;  %s3883_s25 = scalar_lea.vmem [#allocation5], %s5626_s20 }
 0x3d8   : >> { %6058 = vmatpush3.bf16.msra.mxu0 %v5468_v19  ;;  %6064 = vmatpush3.bf16.msra.mxu1 %v5471_v31  ;;  %v5484_v13 = vcombine.low %v7254_v42, %v7259_v14  ;;  %v5498_v15 = vcombine.low %v7284_v56, %v7289_v58  ;;  %v5494_v22 = vcombine.low %v7274_v47, %v7279_v52  ;;  %p3307_p13 = scmp.ge.s32.totalorder %s3310_s24, 10  }
 0x3d9   : >> { %6059 = vmatprep.mubr.msk.bf16.mxu0 %vm6515_vm15, %v6514_v17  ;;  %6065 = vmatprep.mubr.msk.bf16.mxu1 %vm6515_vm15, %v6514_v17  ;;  %v5502_v30 = vcombine.low %v7294_v27, %v7299_v59  ;;  %v7445_v28 = vld [vmem:[%s7846_s11 + $0x10] sm:$0xf] (%p3307_p13)  ;;  %v7450_v36 = vld [vmem:[%s7846_s11 + $0x14] sm:$0xf] (%p3307_p13)  ;;  %v7455_v62 = vld [vmem:[%s7846_s11 + $0x18] sm:$0xf] (%p3307_p13) }
 0x3da   : >> { %6069 = vmatprep.subr.bf16.mxu0 %v6514_v17  ;;  %6075 = vmatprep.subr.bf16.mxu1 %v6514_v17  ;;  %v7460_v20 = vld [vmem:[%s7846_s11 + $0x1c] sm:$0xf] (%p3307_p13)  ;;  %v7465_v63 = vld [vmem:[%s7846_s11 + $0x20] sm:$0xf] (%p3307_p13)  ;;  %v7470_v49 = vld [vmem:[%s7846_s11 + $0x24] sm:$0xf] (%p3307_p13) }
 0x3db   : > { %v7475_v50 = vld [vmem:[%s7846_s11 + $0x28] sm:$0xf] (%p3307_p13)  ;;  %v7480_v51 = vld [vmem:[%s7846_s11 + $0x2c] sm:$0xf] (%p3307_p13)  ;;  %v7485_v42 = vld [vmem:[%s7846_s11 + $0x30] sm:$0xf] (%p3307_p13) }
 0x3dc   : >> { %v3314_v34 = vld [vmem:[%s7354_s2] sm:$0xf]  ;;  %v3316_v37 = vld [vmem:[%s7354_s2 + $0x4] sm:$0x3]  ;;  %v5477_v3 = vld [vmem:[%s7354_s2 + $0x8] sm:$0xf] }
 0x3dd   : >> { %v3315_v40 = vld [vmem:[%s7354_s2 + $0x4] sm:$0x1]  ;;  %v5467_v43 = vcombine.low %v3314_v34, %v3316_v37  ;;  %v5478_v4 = vld [vmem:[%s7354_s2 + $0xc] sm:$0x1]  ;;  %v3433_v7 = vld [vmem:[%s7354_s2] sm:$0xe] }
 0x3de   : >> { %v5470_v0 = vcombine.low %v3314_v34, %v3315_v40  ;;  %v5482_v8 = vld [vmem:[%s7354_s2 + $0xc] sm:$0x3]  ;;  %v5479_v54 = vcombine.low %v5477_v3, %v5478_v4  ;;  %v5486_v10 = vld [vmem:[%s7354_s2 + $0x8] sm:$0xe]  ;;  %v5491_v11 = vld [vmem:[%s7354_s2 + $0x10] sm:$0xf]  ;;  %v5473_v45 = vcombine.low %v3433_v7, %v3316_v37 }
 0x3df   : >> { %v3323_v1 = vshrl.u32 %v5467_v43, 16  ;;  %v3325_v2 = vshll.u32 %v5467_v43, 16  ;;  %v5496_v57 = vld [vmem:[%s7354_s2 + $0x14] sm:$0x3]  ;;  %v5483_v35 = vcombine.low %v5477_v3, %v5482_v8  ;;  %v5487_v46 = vcombine.low %v5486_v10, %v5482_v8  ;;  %v5500_v19 = vld [vmem:[%s7354_s2 + $0x10] sm:$0xe] }
 0x3e0   : >> { %6066 = vmatmul.mubr.msk.bf16.vlgmr.msra.gmra.mxu1 %vm1070_vm4, %v5470_v0  ;;  %v5497_v48 = vcombine.low %v5491_v11, %v5496_v57  ;;  %v3437_v32 = vrot.slane %v5473_v45, 1  ;;  %v5492_v25 = vld [vmem:[%s7354_s2 + $0x14] sm:$0x1]  ;;  %v5501_v31 = vcombine.low %v5500_v19, %v5496_v57  ;;  %v7495_v53 = vld [vmem:[%s7846_s11 + $0x38] sm:$0xf] (%p3307_p13)  ;;  %s7522_s2 = smov (%p3307_p13), 0  }
 0x3e1   : >> { %6076 = vmatpush3.bf16.msra.mxu1 %v5480_v41  ;;  %6077 = vmatprep.mubr.msk.bf16.mxu1 %vm6515_vm15, %v6514_v17  ;;  %v3327_v5 = vrot.slane %v3325_v2, 1  ;;  %v3560_v12 = vshll.u32 %v5483_v35, 16  ;;  %v3620_v61 = vrot.slane %v5487_v46, 1  ;;  %v3558_v16 = vshrl.u32 %v5483_v35, 16  ;;  %v7490_v14 = vld [vmem:[%s7846_s11 + $0x34] sm:$0xf] (%p3307_p13) }
 0x3e2   : >> { %6087 = vmatprep.subr.bf16.mxu1 %v6514_v17  ;;  %v3743_v60 = vshll.u32 %v5497_v48, 16  ;;  %v3741_v33 = vshrl.u32 %v5497_v48, 16  ;;  %v5493_v24 = vcombine.low %v5491_v11, %v5492_v25  ;;  %v3803_v34 = vrot.slane %v5501_v31, 1  ;;  %v7500_v44 = vld [vmem:[%s7846_s11 + $0x3c] sm:$0xf] (%p3307_p13) }
 0x3e3   : >> { %v3328_v9 = vor.u32 %v3327_v5, %v3323_v1  ;;  %v3562_v18 = vrot.slane %v3560_v12, 1  ;;  %v7505_v47 = vld [vmem:[%s7846_s11 + $0x40] sm:$0xf] (%p3307_p13)  ;;  %v7510_v52 = vld [vmem:[%s7846_s11 + $0x44] sm:$0xf] (%p3307_p13) }
 0x3e4   : >> { %v3745_v26 = vrot.slane %v3743_v60, 1  ;;  %v7515_v56 = vld [vmem:[%s7847_s12] ss:$0 sm:$0xff] (%p3307_p13) }
 0x3e5   : >> { %6060 = vmatmul.mubr.msk.bf16.vlgmr.msra.gmra.mxu0 %vm1070_vm4, %v3328_v9  ;;  %v3563_v21 = vor.u32 %v3562_v18, %v3558_v16  ;;  %v7520_v58 = vld [vmem:[%s7848_s13] ss:$0 sm:$0xff] (%p3307_p13) }
 0x3e6   : >> { %6070 = vmatpush3.bf16.msra.mxu0 %v5474_v6  ;;  %6071 = vmatprep.mubr.msk.bf16.mxu0 %vm6515_vm15, %v6514_v17  ;;  %v3746_v23 = vor.u32 %v3745_v26, %v3741_v33 }
 0x3e7   : >> { %6081 = vmatprep.subr.bf16.mxu0 %v6514_v17 }
 0x3e8   : >> { %6078 = vmatmul.mubr.msk.bf16.vlgmr.msra.gmra.mxu1 %vm1070_vm4, %v5479_v54 }
 0x3e9   : >> { %6088 = vmatpush3.bf16.msra.mxu1 %v5488_v55  ;;  %6089 = vmatprep.mubr.msk.bf16.mxu1 %vm6515_vm15, %v6514_v17 }
 0x3ea   : >> { %6099 = vmatprep.subr.bf16.mxu1 %v6514_v17 }
 0x3ed   : >> { %6072 = vmatmul.mubr.msk.bf16.vlgmr.msra.gmra.mxu0 %vm1070_vm4, %v3437_v32 }
 0x3ee   : >> { %6082 = vmatpush3.bf16.msra.mxu0 %v5484_v13  ;;  %6083 = vmatprep.mubr.msk.bf16.mxu0 %vm6515_vm15, %v6514_v17 }
 0x3ef   : >> { %6093 = vmatprep.subr.bf16.mxu0 %v6514_v17 }
 0x3f0   : >> { %6090 = vmatmul.mubr.msk.bf16.vlgmr.msra.gmra.mxu1 %vm1070_vm4, %v3620_v61 }
 0x3f1   : >> { %6100 = vmatpush3.bf16.msra.mxu1 %v5498_v15  ;;  %6101 = vmatprep.mubr.msk.bf16.mxu1 %vm6515_vm15, %v6514_v17 }
 0x3f5   : >> { %6084 = vmatmul.mubr.msk.bf16.vlgmr.msra.gmra.mxu0 %vm1070_vm4, %v3563_v21 }
 0x3f6   : >> { %6094 = vmatpush3.bf16.msra.mxu0 %v5494_v22  ;;  %6095 = vmatprep.mubr.msk.bf16.mxu0 %vm6515_vm15, %v6514_v17 }
 0x3f7   : >> { %6105 = vmatprep.subr.bf16.mxu0 %v6514_v17 }
 0x3f8   : >> { %6102 = vmatmul.mubr.msk.bf16.vlgmr.msra.gmra.mxu1 %vm1070_vm4, %v3746_v23 }
 0x3fd   : >> { %6096 = vmatmul.mubr.msk.bf16.vlgmr.msra.gmra.mxu0 %vm1070_vm4, %v5493_v24 }
 0x3fe   : >> { %6106 = vmatpush3.bf16.msra.mxu0 %v5502_v30  ;;  %6107 = vmatprep.mubr.msk.bf16.mxu0 %vm6515_vm15, %v6514_v17 }
 0x405   : >> { %6108 = vmatmul.mubr.msk.bf16.vlgmr.msra.gmra.mxu0 %vm1070_vm4, %v3803_v34 }
 0x4a0   : >> { %v3426_v37 = vpop.f32.mrf.mxu1 }
 0x4a2   : >> { %v6067_v40 = vpop.f32.mrf.mxu1 }
 0x4a4   : >> { %v3429_v41 = vpop.f32.mrf.mxu1 }
 0x4a5   : >> { %v3373_v43 = vpop.f32.mrf.mxu0 }
 0x4a6   : >> { %v6068_v0 = vpop.f32.mrf.mxu1  ;;  %v3427_v10 = vadd.f32 %v3426_v37, %v3373_v43 }
 0x4a7   : >> { %v6061_v1 = vpop.f32.mrf.mxu0 }
 0x4a8   : >> { %v3544_v2 = vpop.f32.mrf.mxu1 }
 0x4a9   : >> { %v3376_v3 = vpop.f32.mrf.mxu0 }
 0x4aa   : >> { %v6079_v4 = vpop.f32.mrf.mxu1  ;;  %v3430_v48 = vadd.f32 %v3429_v41, %v3376_v3 }
 0x4ab   : >> { %v6062_v5 = vpop.f32.mrf.mxu0 }
 0x4ac   : >> { %v3547_v6 = vpop.f32.mrf.mxu1 }
 0x4ad   : >> { %v3481_v7 = vpop.f32.mrf.mxu0 }
 0x4ae   : >> { %v6080_v8 = vpop.f32.mrf.mxu1  ;;  %v3488_v45 = vadd.f32 %v3481_v7, %v3427_v10  ;;  %v7425_v10 = vld [vmem:[%s7846_s11] sm:$0xf] (%p3307_p13) }
 0x4af   : >> { %v6073_v9 = vpop.f32.mrf.mxu0 }
 0x4b0   : >> { %v3664_v54 = vpop.f32.mrf.mxu1  ;;  %v3551_v13 = vadd.f32 %v3544_v2, %v3488_v45  ;;  %v7440_v45 = vld [vmem:[%s7846_s11 + $0xc] sm:$0xf] (%p3307_p13) }
 0x4b1   : >> { %v3484_v55 = vpop.f32.mrf.mxu0 }
 0x4b2   : >> { %v6091_v17 = vpop.f32.mrf.mxu1  ;;  %v3489_v61 = vadd.f32 %v3484_v55, %v3430_v48 }
 0x4b3   : >> { %v6074_v11 = vpop.f32.mrf.mxu0 }
 0x4b4   : >> { %v3667_v57 = vpop.f32.mrf.mxu1  ;;  %v3552_v26 = vadd.f32 %v3547_v6, %v3489_v61  ;;  %v7430_v11 = vld [vmem:[%s7846_s11 + $0x4] sm:$0xf] (%p3307_p13) }
 0x4b5   : >> { %v3607_v35 = vpop.f32.mrf.mxu0 }
 0x4b6   : >> { %v6092_v46 = vpop.f32.mrf.mxu1  ;;  %v3614_v16 = vadd.f32 %v3607_v35, %v3551_v13 }
 0x4b7   : >> { %v6085_v32 = vpop.f32.mrf.mxu0 }
 0x4b8   : >> { %v3790_v12 = vpop.f32.mrf.mxu1  ;;  %v3671_v23 = vadd.f32 %v3664_v54, %v3614_v16 }
 0x4b9   : >> { %v3610_v60 = vpop.f32.mrf.mxu0 }
 0x4ba   : >> { %v6103_v15 = vpop.f32.mrf.mxu1  ;;  %v3615_v25 = vadd.f32 %v3610_v60, %v3552_v26 }
 0x4bb   : >> { %v6086_v18 = vpop.f32.mrf.mxu0 }
 0x4bc   : >> { %v3793_v33 = vpop.f32.mrf.mxu1  ;;  %v3672_v31 = vadd.f32 %v3667_v57, %v3615_v25  ;;  %v7435_v57 = vld [vmem:[%s7846_s11 + $0x8] sm:$0xf] (%p3307_p13) }
 0x4bd   : >> { %v3727_v21 = vpop.f32.mrf.mxu0 }
 0x4be   : >> { %v6104_v22 = vpop.f32.mrf.mxu1  ;;  %v3734_v30 = vadd.f32 %v3727_v21, %v3671_v23 }
 0x4bf   : >> { %v6097_v24 = vpop.f32.mrf.mxu0 }
 0x4c0   : >> { %v3797_v37 = vadd.f32 %v3790_v12, %v3734_v30 }
 0x4c1   : >> { %v3730_v19 = vpop.f32.mrf.mxu0 }
 0x4c2   : >> { %v3735_v40 = vadd.f32 %v3730_v19, %v3672_v31 }
 0x4c3   : >> { %v6098_v34 = vpop.f32.mrf.mxu0 }
 0x4c4   : >> { %v3798_v1 = vadd.f32 %v3793_v33, %v3735_v40 }
 0x4c5   : >> { %v3847_v41 = vpop.f32.mrf.mxu0 }
 0x4c6   : >> { %v3854_v43 = vadd.f32 %v3847_v41, %v3797_v37 }
 0x4c7   : >> { %v6109_v0 = vpop.f32.mrf.mxu0 }
 0x4c8   : >> { %v3856_v2 = vmax.f32 %v3854_v43, 0.0 }
 0x4c9   : >> { %v3850_v3 = vpop.f32.mrf.mxu0 }
 0x4ca   : >> { %v3864_v4 = vmul.f32 %v7304_v38, %v3856_v2  ;;  %v3855_v5 = vadd.f32 %v3850_v3, %v3798_v1 }
 0x4cb   : >> { %v6110_v6 = vpop.f32.mrf.mxu0 }
 0x4cc   : >> { %v3872_v7 = vadd.f32 %v7309_v39, %v3864_v4  ;;  %v3857_v8 = vmax.f32 %v3855_v5, 0.0 }
 0x4ce   : >> { %v5627_v9 = vpack.c.bf16 %v3872_v7, %v3872_v7  ;;  %v3865_v54 = vmul.f32 %v7304_v38, %v3857_v8 }
 0x4d0   : >> { %3884 = vst.msk [vmem:[%s3883_s25] sm:$0xf] %vm998_vm2, %v5627_v9  ;;  %v3873_v55 = vadd.f32 %v7309_v39, %v3865_v54  ;;  %3309 = sbr.rel (!%p3307_p13) target bundleno = 982 (0x3d6), region = 247 }
 0x4d2   : >> { %v5628_v17 = vpack.c.bf16 %v3873_v55, %v3873_v55 }
 0x4d4   : >> { %3886 = vst.msk [vmem:[%s3883_s25 + $0x4] sm:$0x1] %vm1002_vm3, %v5628_v17 }
 0x4d5 LB: >> { %v5512_v27 = vcombine.low %v7435_v57, %v7440_v45  ;;  %v5514_v59 = vcombine.low %v7425_v10, %v7430_v11  ;;  %v6516_v38 = vmov 0.0   ;;  %s5630_s25 = sshll.u32 %s6505_s2, 3  ;;  %v5521_v39 = vcombine.low %v7455_v62, %v7460_v20  ;;  %s5547_s1 = sshll.u32 %s6505_s2, 2  ;;  %s6505_s2 = sphi %s7522_s2, %s3912_s2  }
 0x4d6   : >> { %6111 = vmatprep.subr.bf16.mxu0 %v6516_v38  ;;  %6117 = vmatprep.subr.bf16.mxu1 %v6516_v38  ;;  %vm6517_vm0 = vmmov 0   ;;  %s7541_s27 = scalar_lea.vmem [#allocation5], %s5630_s25  ;;  %v5517_v18 = vcombine.low %v7445_v28, %v7450_v36  ;;  %v5530_v23 = vcombine.low %v7475_v50, %v7480_v51  ;;  %v5526_v41 = vcombine.low %v7465_v63, %v7470_v49  ;;  %s4449_s22 = scalar_lea.vmem [#allocation6], %s5547_s1 }
 0x4d7   : >> { %6112 = vmatpush3.bf16.msra.mxu0 %v5512_v27  ;;  %6118 = vmatpush3.bf16.msra.mxu1 %v5514_v59  ;;  %v5539_v43 = vcombine.low %v7495_v53, %v7500_v44  ;;  %v5534_v6 = vcombine.low %v7485_v42, %v7490_v14  ;;  %v5543_v8 = vcombine.low %v7505_v47, %v7510_v52  ;;  %s3912_s2 = sadd.s32 1, %s6505_s2  }
 0x4d8   : >> { %6113 = vmatprep.mubr.msk.bf16.mxu0 %vm6517_vm0, %v6516_v38  ;;  %6119 = vmatprep.mubr.msk.bf16.mxu1 %vm6517_vm0, %v6516_v38  ;;  %p3909_p0 = scmp.ge.s32.totalorder %s3912_s2, 8  }
 0x4d9   : >> { %6123 = vmatprep.subr.bf16.mxu0 %v6516_v38  ;;  %6129 = vmatprep.subr.bf16.mxu1 %v6516_v38  ;;  %v7625_v10 = vld [vmem:[%s7849_s14 + $0x10] sm:$0xf] (%p3909_p0)  ;;  %v7630_v11 = vld [vmem:[%s7849_s14 + $0x14] sm:$0xf] (%p3909_p0)  ;;  %v7635_v57 = vld [vmem:[%s7849_s14 + $0x18] sm:$0xf] (%p3909_p0) }
 0x4da   : > { %v7640_v45 = vld [vmem:[%s7849_s14 + $0x1c] sm:$0xf] (%p3909_p0)  ;;  %v7645_v28 = vld [vmem:[%s7849_s14 + $0x20] sm:$0xf] (%p3909_p0)  ;;  %v7650_v36 = vld [vmem:[%s7849_s14 + $0x24] sm:$0xf] (%p3909_p0) }
 0x4db   : >> { %v3916_v35 = vld [vmem:[%s7541_s27] sm:$0xf]  ;;  %v3917_v46 = vld [vmem:[%s7541_s27 + $0x4] sm:$0x1]  ;;  %v5520_v61 = vld [vmem:[%s7541_s27 + $0x8] sm:$0xf] }
 0x4dc   : >> { %v5511_v48 = vcombine.low %v3916_v35, %v3917_v46  ;;  %6120 = vmatmul.mubr.msk.bf16.vlgmr.msra.gmra.mxu1 %vm1070_vm4, %v3916_v35  ;;  %v4029_v13 = vld [vmem:[%s7541_s27] sm:$0xe]  ;;  %v5523_v15 = vld [vmem:[%s7541_s27 + $0x8] sm:$0xf]  ;;  %v5524_v16 = vld [vmem:[%s7541_s27 + $0xc] sm:$0x1] }
 0x4dd   : >> { %6130 = vmatpush3.bf16.msra.mxu1 %v5521_v39  ;;  %6131 = vmatprep.mubr.msk.bf16.mxu1 %vm6517_vm0, %v6516_v38  ;;  %v5528_v33 = vld [vmem:[%s7541_s27 + $0x8] sm:$0xe]  ;;  %v5536_v26 = vld [vmem:[%s7541_s27 + $0x10] sm:$0xf]  ;;  %v5537_v21 = vld [vmem:[%s7541_s27 + $0x14] sm:$0x1]  ;;  %v5516_v25 = vcombine.low %v4029_v13, %v3917_v46  ;;  %v5525_v24 = vcombine.low %v5523_v15, %v5524_v16 }
 0x4de   : >> { %v3924_v32 = vshrl.u32 %v5511_v48, 16  ;;  %v3926_v12 = vshll.u32 %v5511_v48, 16  ;;  %6141 = vmatprep.subr.bf16.mxu1 %v6516_v38  ;;  %v5529_v30 = vcombine.low %v5528_v33, %v5524_v16  ;;  %v5538_v19 = vcombine.low %v5536_v26, %v5537_v21  ;;  %v5533_v7 = vld [vmem:[%s7541_s27 + $0x10] sm:$0xf]  ;;  %v7655_v62 = vld [vmem:[%s7849_s14 + $0x28] sm:$0xf] (%p3909_p0) }
 0x4df   : >> { %v4033_v31 = vrot.slane %v5516_v25, 1  ;;  %v4149_v34 = vshll.u32 %v5525_v24, 16  ;;  %v4147_v0 = vshrl.u32 %v5525_v24, 16  ;;  %v5541_v9 = vld [vmem:[%s7541_s27 + $0x10] sm:$0xe]  ;;  %s7702_s1 = smov (%p3909_p0), 0  }
 0x4e0   : >> { %v3928_v60 = vrot.slane %v3926_v12, 1  ;;  %v4207_v37 = vrot.slane %v5529_v30, 1  ;;  %v4323_v40 = vshll.u32 %v5538_v19, 16  ;;  %v4321_v2 = vshrl.u32 %v5538_v19, 16  ;;  %v7660_v20 = vld [vmem:[%s7849_s14 + $0x2c] sm:$0xf] (%p3909_p0) }
 0x4e1   : >> { %v4151_v1 = vrot.slane %v4149_v34, 1  ;;  %v5542_v54 = vcombine.low %v5541_v9, %v5537_v21  ;;  %v7665_v63 = vld [vmem:[%s7849_s14 + $0x30] sm:$0xf] (%p3909_p0)  ;;  %v7670_v49 = vld [vmem:[%s7849_s14 + $0x34] sm:$0xf] (%p3909_p0) }
 0x4e2   : >> { %v3929_v22 = vor.u32 %v3928_v60, %v3924_v32  ;;  %v4325_v3 = vrot.slane %v4323_v40, 1  ;;  %v7675_v50 = vld [vmem:[%s7849_s14 + $0x38] sm:$0xf] (%p3909_p0)  ;;  %v7680_v51 = vld [vmem:[%s7849_s14 + $0x3c] sm:$0xf] (%p3909_p0) }
 0x4e3   : >> { %v4152_v4 = vor.u32 %v4151_v1, %v4147_v0  ;;  %v4381_v55 = vrot.slane %v5542_v54, 1  ;;  %v7685_v42 = vld [vmem:[%s7849_s14 + $0x40] sm:$0xf] (%p3909_p0)  ;;  %v7690_v14 = vld [vmem:[%s7849_s14 + $0x44] sm:$0xf] (%p3909_p0) }
 0x4e4   : >> { %6114 = vmatmul.mubr.msk.bf16.vlgmr.msra.gmra.mxu0 %vm1070_vm4, %v3929_v22  ;;  %6132 = vmatmul.mubr.msk.bf16.vlgmr.msra.gmra.mxu1 %vm1070_vm4, %v5520_v61  ;;  %v4326_v5 = vor.u32 %v4325_v3, %v4321_v2  ;;  %v7695_v53 = vld [vmem:[%s7850_s15] ss:$0 sm:$0xff] (%p3909_p0) }
 0x4e5   : >> { %6124 = vmatpush3.bf16.msra.mxu0 %v5517_v18  ;;  %6125 = vmatprep.mubr.msk.bf16.mxu0 %vm6517_vm0, %v6516_v38  ;;  %v7700_v44 = vld [vmem:[%s7851_s16] ss:$0 sm:$0xff] (%p3909_p0) }
 0x4e6   : >> { %6135 = vmatprep.subr.bf16.mxu0 %v6516_v38  ;;  %6142 = vmatpush3.bf16.msra.mxu1 %v5530_v23 }
 0x4e7   : >> { %6143 = vmatprep.mubr.msk.bf16.mxu1 %vm6517_vm0, %v6516_v38  ;;  %6153 = vmatprep.subr.bf16.mxu1 %v6516_v38 }
 0x4ec   : >> { %6126 = vmatmul.mubr.msk.bf16.vlgmr.msra.gmra.mxu0 %vm1070_vm4, %v4033_v31  ;;  %6144 = vmatmul.mubr.msk.bf16.vlgmr.msra.gmra.mxu1 %vm1070_vm4, %v4207_v37 }
 0x4ed   : >> { %6136 = vmatpush3.bf16.msra.mxu0 %v5526_v41  ;;  %6137 = vmatprep.mubr.msk.bf16.mxu0 %vm6517_vm0, %v6516_v38 }
 0x4ee   : >> { %6147 = vmatprep.subr.bf16.mxu0 %v6516_v38  ;;  %6154 = vmatpush3.bf16.msra.mxu1 %v5539_v43 }
 0x4ef   : >> { %6155 = vmatprep.mubr.msk.bf16.mxu1 %vm6517_vm0, %v6516_v38 }
 0x4f4   : >> { %6138 = vmatmul.mubr.msk.bf16.vlgmr.msra.gmra.mxu0 %vm1070_vm4, %v4152_v4  ;;  %6156 = vmatmul.mubr.msk.bf16.vlgmr.msra.gmra.mxu1 %vm1070_vm4, %v4326_v5 }
 0x4f5   : >> { %6148 = vmatpush3.bf16.msra.mxu0 %v5534_v6  ;;  %6149 = vmatprep.mubr.msk.bf16.mxu0 %vm6517_vm0, %v6516_v38 }
 0x4f6   : >> { %6159 = vmatprep.subr.bf16.mxu0 %v6516_v38 }
 0x4fc   : >> { %6150 = vmatmul.mubr.msk.bf16.vlgmr.msra.gmra.mxu0 %vm1070_vm4, %v5533_v7 }
 0x4fd   : >> { %6160 = vmatpush3.bf16.msra.mxu0 %v5543_v8  ;;  %6161 = vmatprep.mubr.msk.bf16.mxu0 %vm6517_vm0, %v6516_v38 }
 0x504   : >> { %6162 = vmatmul.mubr.msk.bf16.vlgmr.msra.gmra.mxu0 %vm1070_vm4, %v4381_v55 }
 0x59c   : >> { %v4023_v17 = vpop.f32.mrf.mxu1 }
 0x59e   : >> { %v6121_v27 = vpop.f32.mrf.mxu1 }
 0x5a0   : >> { %v4026_v59 = vpop.f32.mrf.mxu1 }
 0x5a2   : >> { %v6122_v39 = vpop.f32.mrf.mxu1 }
 0x5a4   : >> { %v3974_v35 = vpop.f32.mrf.mxu0  ;;  %v4132_v46 = vpop.f32.mrf.mxu1 }
 0x5a5   : >> { %v4024_v21 = vadd.f32 %v4023_v17, %v3974_v35 }
 0x5a6   : >> { %v6115_v48 = vpop.f32.mrf.mxu0  ;;  %v6133_v32 = vpop.f32.mrf.mxu1 }
 0x5a7   : > { %v7610_v48 = vld [vmem:[%s7849_s14 + $0x4] sm:$0xf] (%p3909_p0)  ;;  %v7615_v32 = vld [vmem:[%s7849_s14 + $0x8] sm:$0xf] (%p3909_p0) }
 0x5a8   : >> { %v3977_v12 = vpop.f32.mrf.mxu0  ;;  %v4135_v13 = vpop.f32.mrf.mxu1 }
 0x5a9   : > { %v7620_v12 = vld [vmem:[%s7849_s14 + $0xc] sm:$0xf] (%p3909_p0) }
 0x5aa   : >> { %v6116_v61 = vpop.f32.mrf.mxu0  ;;  %v6134_v60 = vpop.f32.mrf.mxu1 }
 0x5ac   : >> { %v4077_v15 = vpop.f32.mrf.mxu0  ;;  %v4251_v16 = vpop.f32.mrf.mxu1 }
 0x5ad   : >> { %v4083_v25 = vadd.f32 %v4077_v15, %v4024_v21 }
 0x5ae   : >> { %v6127_v18 = vpop.f32.mrf.mxu0  ;;  %v6145_v33 = vpop.f32.mrf.mxu1 }
 0x5af   : >> { %v4138_v34 = vadd.f32 %v4132_v46, %v4083_v25  ;;  %v7605_v46 = vld [vmem:[%s7849_s14] sm:$0xf] (%p3909_p0) }
 0x5b0   : >> { %v4080_v38 = vpop.f32.mrf.mxu0  ;;  %v4254_v26 = vpop.f32.mrf.mxu1 }
 0x5b2   : >> { %v6128_v22 = vpop.f32.mrf.mxu0  ;;  %v6146_v23 = vpop.f32.mrf.mxu1 }
 0x5b4   : >> { %v4196_v24 = vpop.f32.mrf.mxu0  ;;  %v4370_v30 = vpop.f32.mrf.mxu1 }
 0x5b5   : >> { %v4202_v41 = vadd.f32 %v4196_v24, %v4138_v34 }
 0x5b6   : >> { %v6139_v19 = vpop.f32.mrf.mxu0  ;;  %v6157_v31 = vpop.f32.mrf.mxu1 }
 0x5b7   : >> { %v4257_v2 = vadd.f32 %v4251_v16, %v4202_v41 }
 0x5b8   : >> { %v4199_v37 = vpop.f32.mrf.mxu0  ;;  %v4373_v40 = vpop.f32.mrf.mxu1 }
 0x5ba   : >> { %v6140_v43 = vpop.f32.mrf.mxu0  ;;  %v6158_v0 = vpop.f32.mrf.mxu1 }
 0x5bc   : >> { %v4306_v1 = vpop.f32.mrf.mxu0 }
 0x5bd   : >> { %v4312_v4 = vadd.f32 %v4306_v1, %v4257_v2 }
 0x5be   : >> { %v6151_v3 = vpop.f32.mrf.mxu0 }
 0x5bf   : >> { %v4376_v7 = vadd.f32 %v4370_v30, %v4312_v4 }
 0x5c0   : >> { %v4309_v5 = vpop.f32.mrf.mxu0 }
 0x5c2   : >> { %v6152_v6 = vpop.f32.mrf.mxu0 }
 0x5c4   : >> { %v4425_v8 = vpop.f32.mrf.mxu0 }
 0x5c5   : >> { %v4431_v9 = vadd.f32 %v4425_v8, %v4376_v7 }
 0x5c6   : >> { %v6163_v54 = vpop.f32.mrf.mxu0 }
 0x5c7   : >> { %v4432_v55 = vmax.f32 %v4431_v9, 0.0 }
 0x5c8   : >> { %v4428_v17 = vpop.f32.mrf.mxu0 }
 0x5c9   : >> { %v4439_v27 = vmul.f32 %v7515_v56, %v4432_v55 }
 0x5ca   : >> { %v6164_v59 = vpop.f32.mrf.mxu0 }
 0x5cb   : >> { %v4446_v39 = vadd.f32 %v7520_v58, %v4439_v27  ;;  %3911 = sbr.rel (!%p3909_p0) target bundleno = 1237 (0x4d5), region = 258 }
 0x5cd   : >> { %v4447_v35 = vpack.c.bf16 %v4446_v39, %v4446_v39 }
 0x5cf   : >> { %4450 = vst.msk [vmem:[%s4449_s22] sm:$0xf] %vm998_vm2, %v4447_v35 }
 0x5d0 LB: >> { %v5550_v47 = vcombine.low %v7615_v32, %v7620_v12  ;;  %v5552_v52 = vcombine.low %v7605_v46, %v7610_v48  ;;  %v6518_v56 = vmov 0.0   ;;  %s5548_s22 = sshll.u32 %s6509_s1, 2  ;;  %v5559_v58 = vcombine.low %v7635_v57, %v7640_v45  ;;  %s5583_s26 = sshll.u32 %s6509_s1, 3  ;;  %s6509_s1 = sphi %s7702_s1, %s4476_s1  }
 0x5d1   : >> { %6165 = vmatprep.subr.bf16.mxu0 %v6518_v56  ;;  %6171 = vmatprep.subr.bf16.mxu1 %v6518_v56  ;;  %vm6519_vm1 = vmmov 0   ;;  %s7721_s29 = scalar_lea.vmem [#allocation6], %s5548_s22  ;;  %v5555_v18 = vcombine.low %v7625_v10, %v7630_v11  ;;  %v5567_v26 = vcombine.low %v7655_v62, %v7660_v20  ;;  %v5563_v19 = vcombine.low %v7645_v28, %v7650_v36  ;;  %s5001_s19 = scalar_lea.vmem [#allocation7], %s5583_s26 }
 0x5d2   : >> { %6166 = vmatpush3.bf16.msra.mxu0 %v5550_v47  ;;  %6172 = vmatpush3.bf16.msra.mxu1 %v5552_v52  ;;  %v5575_v37 = vcombine.low %v7675_v50, %v7680_v51  ;;  %v5571_v2 = vcombine.low %v7665_v63, %v7670_v49  ;;  %v5579_v5 = vcombine.low %v7685_v42, %v7690_v14  ;;  %vm5002_vm2 = vcmask 128000   ;;  %s4476_s1 = sadd.s32 1, %s6509_s1  }
 0x5d3   : >> { %6167 = vmatprep.mubr.msk.bf16.mxu0 %vm6519_vm1, %v6518_v56  ;;  %6173 = vmatprep.mubr.msk.bf16.mxu1 %vm6519_vm1, %v6518_v56  ;;  %p4473_p1 = scmp.ge.s32.totalorder %s4476_s1, 6  }
 0x5d4   : >> { %6177 = vmatprep.subr.bf16.mxu0 %v6518_v56  ;;  %6183 = vmatprep.subr.bf16.mxu1 %v6518_v56  ;;  %vm5134_vm3 = vcmask (%p4473_p1), 73728   ;;  %s7887_s24 = sld [smem:[#allocation14_spill]] (%p4473_p1)  ;;  %s5162_s25 = sshll.u32 (%p4473_p1), %s6719_s23, 4  ;;  %s5163_s25 = int_to_ptr.vmem [resolvable:$true] %s5162_s25 }
 0x5d5   : > { %s7889_s22 = sld [smem:[#allocation23_spill]] (%p4473_p1)  ;;  %s7890_s26 = sand.u32 (%p4473_p1), 1, %s6481_s30  }
 0x5d6   : >> { %v6397_v13 = vld [vmem:[%s7721_s29] ss:$0 sps:$4 sm:$0xff]   ;;  %v5558_v38 = vld [vmem:[%s7721_s29 + $0x4] sm:$0x7]  ;;  %v6401_v25 = vld [vmem:[%s7721_s29 + $0x8] ss:$0 sps:$4 sm:$0xff]  }
 0x5d7   : >> { %v4479_v61 = vld [vmem:[%s7721_s29] sm:$0x7]  ;;  %v4485_v60 = vshrl.u32 %v6397_v13, 16  ;;  %v4487_v15 = vshll.u32 %v6397_v13, 16  ;;  %v6399_v22 = vld [vmem:[%s7721_s29 + $0x4] ss:$0 sps:$4 sm:$0xff]  }
 0x5d8   : >> { %6174 = vmatmul.mubr.msk.bf16.vlgmr.msra.gmra.mxu1 %vm1070_vm4, %v4479_v61  ;;  %v6398_v21 = vld [vmem:[%s7721_s29] ss:$0 sps:$4 sm:$0xee]   ;;  %v6400_v23 = vld [vmem:[%s7721_s29 + $0x4] ss:$0 sps:$4 sm:$0xee]  }
 0x5d9   : >> { %6184 = vmatpush3.bf16.msra.mxu1 %v5559_v58  ;;  %6185 = vmatprep.mubr.msk.bf16.mxu1 %vm6519_vm1, %v6518_v56  ;;  %v4489_v16 = vrot.slane %v4487_v15, 1  ;;  %v4594_v24 = vrot.slane %v6398_v21, 1  ;;  %v4706_v30 = vshll.u32 %v6399_v22, 16  ;;  %v4764_v31 = vrot.slane %v6400_v23, 1  ;;  %v5570_v4 = vld [vmem:[%s7721_s29 + $0x8] sm:$0x7] }
 0x5da   : >> { %6195 = vmatprep.subr.bf16.mxu1 %v6518_v56  ;;  %v4876_v34 = vshll.u32 %v6401_v25, 16  ;;  %v4704_v40 = vshrl.u32 %v6399_v22, 16  ;;  %v4874_v43 = vshrl.u32 %v6401_v25, 16  ;;  %v6402_v6 = vld [vmem:[%s7721_s29 + $0x8] ss:$0 sps:$4 sm:$0xee]  }
 0x5db   : >> { %v4490_v33 = vor.u32 %v4489_v16, %v4485_v60  ;;  %v4708_v41 = vrot.slane %v4706_v30, 1  ;;  %v4934_v7 = vrot.slane %v6402_v6, 1  ;;  %s5588_s2 = sshll.u32 (%p4473_p1), %s7887_s24, 4  ;;  %s6409_s0 = scalar_lea.vmem (%p4473_p1), %s5163_s25, 16 }
 0x5dc   : >> { %v4878_v0 = vrot.slane %v4876_v34, 1  ;;  %s5160_s29 = scalar_lea.hbm (%p4473_p1), %s7889_s22, %s5588_s2  ;;  %p6410_p2 = scmp.ne.s32.totalorder (%p4473_p1), %s5163_s25, %s6409_s0 }
 0x5dd   : >> { %6168 = vmatmul.mubr.msk.bf16.vlgmr.msra.gmra.mxu0 %vm1070_vm4, %v4490_v33  ;;  %v4709_v1 = vor.u32 %v4708_v41, %v4704_v40  ;;  %s6520_s21 = smov (%p4473_p1), [#allocation8]  }
 0x5de   : >> { %6178 = vmatpush3.bf16.msra.mxu0 %v5555_v18  ;;  %6179 = vmatprep.mubr.msk.bf16.mxu0 %vm6519_vm1, %v6518_v56  ;;  %v4879_v3 = vor.u32 %v4878_v0, %v4874_v43  ;;  %p6411_p3 = pnand (%p4473_p1), %p6410_p2, %p6659_p5  ;;  %s6413_s3 = sshll.u32 (%p4473_p1), %s6520_s21, 4  ;;  %s6414_s3 = int_to_ptr.vmem [resolvable:$false] %s6413_s3 }
 0x5df   : >> { %6189 = vmatprep.subr.bf16.mxu0 %v6518_v56  ;;  %s6415_s28 = scalar_lea.vmem (%p4473_p1), %s6414_s3, 32  ;;  %p6416_p7 = scmp.lt.s32.totalorder (%p4473_p1), %s5163_s25, %s6414_s3 }
 0x5e0   : >> { %6186 = vmatmul.mubr.msk.bf16.vlgmr.msra.gmra.mxu1 %vm1070_vm4, %v5558_v38  ;;  %p6412_p4 = pneg (%p4473_p1), %p6411_p3  ;;  %p6417_p8 = scmp.lt.s32.totalorder (%p4473_p1), %s6415_s28, %s6409_s0 }
 0x5e1   : >> { %6196 = vmatpush3.bf16.msra.mxu1 %v5567_v26  ;;  %6197 = vmatprep.mubr.msk.bf16.mxu1 %vm6519_vm1, %v6518_v56 }
 0x5e2   : >> { %6207 = vmatprep.subr.bf16.mxu1 %v6518_v56  ;;  %p6418_p9 = por (%p4473_p1), %p6417_p8, %p6416_p7 }
 0x5e4   : > { %p6419_p10 = pnand (%p4473_p1), %p6418_p9, %p6412_p4 }
 0x5e5   : >> { %6180 = vmatmul.mubr.msk.bf16.vlgmr.msra.gmra.mxu0 %vm1070_vm4, %v4594_v24 }
 0x5e6   : >> { %6190 = vmatpush3.bf16.msra.mxu0 %v5563_v19  ;;  %6191 = vmatprep.mubr.msk.bf16.mxu0 %vm6519_vm1, %v6518_v56 }
 0x5e7   : >> { %6201 = vmatprep.subr.bf16.mxu0 %v6518_v56 }
 0x5e8   : >> { %6198 = vmatmul.mubr.msk.bf16.vlgmr.msra.gmra.mxu1 %vm1070_vm4, %v4764_v31 }
 0x5e9   : >> { %6208 = vmatpush3.bf16.msra.mxu1 %v5575_v37  ;;  %6209 = vmatprep.mubr.msk.bf16.mxu1 %vm6519_vm1, %v6518_v56 }
 0x5ea   : > { %6225 = vmatprep.subr.bf16.mxu1 (%p4473_p1), %v6512_v29 }
 0x5ed   : >> { %6192 = vmatmul.mubr.msk.bf16.vlgmr.msra.gmra.mxu0 %vm1070_vm4, %v4709_v1 }
 0x5ee   : >> { %6202 = vmatpush3.bf16.msra.mxu0 %v5571_v2  ;;  %6203 = vmatprep.mubr.msk.bf16.mxu0 %vm6519_vm1, %v6518_v56 }
 0x5ef   : >> { %6213 = vmatprep.subr.bf16.mxu0 %v6518_v56 }
 0x5f0   : >> { %6210 = vmatmul.mubr.msk.bf16.vlgmr.msra.gmra.mxu1 %vm1070_vm4, %v4879_v3 }
 0x5f1   : > { %6227 = vmatprep.mubr.msk.bf16.mxu1 (%p4473_p1), %vm6513_vm8, %v6512_v29 }
 0x5f5   : >> { %6204 = vmatmul.mubr.msk.bf16.vlgmr.msra.gmra.mxu0 %vm1070_vm4, %v5570_v4 }
 0x5f6   : >> { %6214 = vmatpush3.bf16.msra.mxu0 %v5579_v5  ;;  %6215 = vmatprep.mubr.msk.bf16.mxu0 %vm6519_vm1, %v6518_v56 }
 0x5f7   : > { %6219 = vmatprep.subr.bf16.mxu0 (%p4473_p1), %v6512_v29 }
 0x5fd   : >> { %6216 = vmatmul.mubr.msk.bf16.vlgmr.msra.gmra.mxu0 %vm1070_vm4, %v4934_v7 }
 0x5fe   : > { %6221 = vmatprep.mubr.msk.bf16.mxu0 (%p4473_p1), %vm6513_vm8, %v6512_v29  ;;  %v6404_v29 = vld [vmem:[%s7853_s18] sm:$0xff] (%p4473_p1)  }
 0x5ff   : > { %6226 = vmatpush3.bf16.msra.mxu1 (%p4473_p1), %v6404_v29 }
 0x698   : >> { %v4584_v8 = vpop.f32.mrf.mxu1 }
 0x69a   : >> { %v6175_v9 = vpop.f32.mrf.mxu1 }
 0x69c   : >> { %v4587_v54 = vpop.f32.mrf.mxu1 }
 0x69d   : >> { %v4535_v17 = vpop.f32.mrf.mxu0 }
 0x69e   : >> { %v6176_v55 = vpop.f32.mrf.mxu1  ;;  %v4585_v16 = vadd.f32 %v4584_v8, %v4535_v17  ;;  %v6403_v17 = vld [vmem:[%s7852_s17] sm:$0xff] (%p4473_p1)  }
 0x69f   : >> { %v6169_v27 = vpop.f32.mrf.mxu0  ;;  %6220 = vmatpush3.bf16.msra.mxu0 (%p4473_p1), %v6403_v17 }
 0x6a0   : >> { %v4692_v59 = vpop.f32.mrf.mxu1 }
 0x6a1   : >> { %v4538_v39 = vpop.f32.mrf.mxu0 }
 0x6a2   : >> { %v6187_v35 = vpop.f32.mrf.mxu1 }
 0x6a3   : >> { %v6170_v47 = vpop.f32.mrf.mxu0 }
 0x6a4   : >> { %v4695_v52 = vpop.f32.mrf.mxu1 }
 0x6a5   : >> { %v4638_v58 = vpop.f32.mrf.mxu0 }
 0x6a6   : >> { %v6188_v13 = vpop.f32.mrf.mxu1  ;;  %v4644_v38 = vadd.f32 %v4638_v58, %v4585_v16 }
 0x6a7   : >> { %v6181_v61 = vpop.f32.mrf.mxu0 }
 0x6a8   : >> { %v4808_v60 = vpop.f32.mrf.mxu1  ;;  %v4698_v25 = vadd.f32 %v4692_v59, %v4644_v38 }
 0x6a9   : >> { %v4641_v15 = vpop.f32.mrf.mxu0 }
 0x6aa   : >> { %v6199_v56 = vpop.f32.mrf.mxu1 }
 0x6ab   : >> { %v6182_v18 = vpop.f32.mrf.mxu0 }
 0x6ac   : >> { %v4811_v33 = vpop.f32.mrf.mxu1 }
 0x6ad   : >> { %v4753_v26 = vpop.f32.mrf.mxu0 }
 0x6ae   : >> { %v6200_v21 = vpop.f32.mrf.mxu1  ;;  %v4759_v19 = vadd.f32 %v4753_v26, %v4698_v25 }
 0x6af   : >> { %v6193_v22 = vpop.f32.mrf.mxu0 }
 0x6b0   : >> { %v4923_v23 = vpop.f32.mrf.mxu1  ;;  %v4814_v41 = vadd.f32 %v4808_v60, %v4759_v19 }
 0x6b1   : >> { %v4756_v24 = vpop.f32.mrf.mxu0 }
 0x6b2   : >> { %v6211_v30 = vpop.f32.mrf.mxu1 }
 0x6b3   : >> { %v6194_v31 = vpop.f32.mrf.mxu0 }
 0x6b4   : >> { %v4926_v34 = vpop.f32.mrf.mxu1 }
 0x6b5   : >> { %v4862_v37 = vpop.f32.mrf.mxu0 }
 0x6b6   : >> { %v6212_v40 = vpop.f32.mrf.mxu1  ;;  %v4868_v0 = vadd.f32 %v4862_v37, %v4814_v41 }
 0x6b7   : >> { %v6205_v43 = vpop.f32.mrf.mxu0 }
 0x6b8   : >> { %v4929_v3 = vadd.f32 %v4923_v23, %v4868_v0 }
 0x6b9   : >> { %v4865_v1 = vpop.f32.mrf.mxu0 }
 0x6bb   : >> { %v6206_v2 = vpop.f32.mrf.mxu0 }
 0x6bd   : >> { %v4978_v4 = vpop.f32.mrf.mxu0 }
 0x6be   : >> { %v4984_v5 = vadd.f32 %v4978_v4, %v4929_v3 }
 0x6bf   : >> { %v6217_v6 = vpop.f32.mrf.mxu0 }
 0x6c0   : >> { %v4985_v7 = vmax.f32 %v4984_v5, 0.0 }
 0x6c1   : >> { %v4981_v8 = vpop.f32.mrf.mxu0 }
 0x6c2   : >> { %v4992_v9 = vmul.f32 %v7695_v53, %v4985_v7  ;;  %4475 = sbr.rel (!%p4473_p1) target bundleno = 1488 (0x5d0), region = 269 }
 0x6c3   : >> { %v6218_v54 = vpop.f32.mrf.mxu0 }
 0x6c4   : >> { %v4999_v55 = vadd.f32 %v7700_v44, %v4992_v9 }
 0x6c6   : >> { %5003 = vst.msk [vmem:[%s5001_s19] sm:$0x3f] %vm5002_vm2, %v4999_v55  ;;  %s5150_s19 = scalar_lea.sflag (%p4473_p1), [#allocation9], %s7890_s26 }
 0x6cd   : > { %v5004_v27 = vld [vmem:[#allocation7] sm:$0x3f]  ;;  %v5006_v59 = vld [vmem:[#allocation7 + $0x8] sm:$0x3f]  ;;  %v5009_v39 = vld [vmem:[#allocation7 + $0x10] sm:$0x3f] }
 0x6ce   : > { %v5007_v35 = vadd.f32 %v5006_v59, %v5004_v27  ;;  %v5012_v47 = vld [vmem:[#allocation7 + $0x18] sm:$0x3f]  ;;  %v5015_v48 = vld [vmem:[#allocation7 + $0x20] sm:$0x3f]  ;;  %v5018_v12 = vld [vmem:[#allocation7 + $0x28] sm:$0x3f] }
 0x6d0   : > { %v5010_v46 = vadd.f32 %v5009_v39, %v5007_v35 }
 0x6d2   : > { %v5013_v32 = vadd.f32 %v5012_v47, %v5010_v46 }
 0x6d4   : > { %v5016_v10 = vadd.f32 %v5015_v48, %v5013_v32 }
 0x6d6   : > { %v5019_v11 = vadd.f32 %v5018_v12, %v5016_v10 }
 0x6d8   : > { %v5021_v57 = vsel %vm5002_vm2, %v5019_v11, 0.0 }
 0x6d9   : > { %v5022_v45 = vrot.slane %v5021_v57, 4 }
 0x6db   : > { %v5023_v28 = vadd.f32 %v5022_v45, %v5021_v57 }
 0x6dd   : > { %v5024_v36 = vrot.slane %v5023_v28, 2 }
 0x6df   : > { %v5025_v62 = vadd.f32 %v5024_v36, %v5023_v28 }
 0x6e1   : > { %v5026_v20 = vrot.slane %v5025_v62, 1 }
 0x6e3   : > { %v5027_v63 = vadd.f32 %v5026_v20, %v5025_v62 }
 0x6e5   : > { %v5028_v49 = vmul.f32 0.027777778, %v5027_v63 }
 0x6e7   : > { %v5029_v50 = vpack.c.bf16 %v5028_v49, %v5028_v49 }
 0x6e9   : > { %6222 = vmatmul.mubr.msk.bf16.vlgmr.msra.gmra.mxu0 %vm1070_vm4, %v5029_v50 }
 0x7a9   : > { %v5076_v51 = vpop.f32.mrf.mxu0 }
 0x7aa   : > { %v5082_v42 = vpack.c.bf16 %v5076_v51, %v5076_v51 }
 0x7ab   : > { %v6223_v14 = vpop.f32.mrf.mxu0 }
 0x7ac   : > { %6228 = vmatmul.mubr.msk.bf16.vlgmr.msra.gmra.mxu1 %vm1070_vm4, %v5082_v42 }
 0x7ad   : > { %v5079_v53 = vpop.f32.mrf.mxu0 }
 0x7af   : > { %v6224_v44 = vpop.f32.mrf.mxu0 }
 0x86c   : > { %v5128_v52 = vpop.f32.mrf.mxu1 }
 0x86d   : > { %v5135_v58 = vsel %vm5134_vm3, %v5128_v52, -inf }
 0x86e   : > { %5136 = vmax.xlane.f32.xlu0 %v5135_v58  ;;  %v6229_v13 = vpop.f32.mrf.mxu1 }
 0x870   : > { %v5131_v61 = vpop.f32.mrf.mxu1 }
 0x872   : > { %v6230_v60 = vpop.f32.mrf.mxu1 }
 0x8f7   : > { %v5137_v15 = vpop.xlane.xlu0 %5136 }
 0x8f8   : > { %v5138_v56 = vsub.f32 %v5128_v52, %v5137_v15 }
 0x8fa   : > { %v5139_v16 = vmul.f32 1.442695, %v5138_v56 }
 0x8fc   : > { %6405 = vpow2.f32 %v5139_v16 }
 0x909   : > { %v6406_v18 = vpop.eup %6405 }
 0x90a   : > { %v5141_v33 = vsel %vm5134_vm3, %v6406_v18, 0.0 }
 0x90b   : > { %5142 = vadd.xlane.f32.xlu0 %v5141_v33 }
 0x994   : > { %v5143_v38 = vpop.xlane.xlu0 %5142 }
 0x995   : > { %6407 = vlog2.f32 %v5143_v38 }
 0x9a2   : > { %v6408_v26 = vpop.eup %6407 }
 0x9a3   : > { %v5145_v21 = vmul.f32 0.6931472, %v6408_v26 }
 0x9a5   : > { %v5146_v22 = vadd.f32 %v5145_v21, %v5137_v15 }
 0x9a7   : > { %v5147_v23 = vsub.f32 %v5128_v52, %v5146_v22 }
 0x9a9   : > { %5148 = vst.msk [vmem:[%s6719_s23] sm:$0x1] %vm5134_vm3, %v5147_v23 }
 0x9aa   : > { %6422 = shalt.err (!%p6419_p10)
}
 0x9ab   : > { %s6423_s24 = scalar_lea.hbm %s5160_s29, 16  ;;  %s6427_s27 = scalar_lea.hbm %s7889_s22, 32 }
 0x9ac   : > { %p6424_p11 = scmp.ne.s32.totalorder %s5160_s29, %s6423_s24  ;;  %p6428_p0 = scmp.lt.s32.totalorder %s5160_s29, %s7889_s22 }
 0x9ad   : > { %p6429_p1 = scmp.lt.s32.totalorder %s6427_s27, %s6423_s24 }
 0x9ae   : > { %p6425_p12 = pnand %p6424_p11, %p6659_p5 }
 0x9af   : > { %p6430_p2 = por %p6429_p1, %p6428_p0 }
 0x9b0   : > { %p6426_p13 = pneg %p6425_p12 }
 0x9b2   : > { %p6431_p3 = pnand %p6430_p2, %p6426_p13 }
 0x9b4   : > { %6434 = shalt.err (!%p6431_p3)
}
 0x9b5   : > { %6233 = dma.vmem_to_hbm [thread:$0]  (%p6659_p5), %s5163_s25, 16, %s5160_s29, %s5150_s19  }
 0x9b6 PF: > { %s7891_s0 = sld [smem:[#allocation13_spill]] }
 0x9b7   : > { %s7892_s21 = sld [smem:[#allocation11_spill]] }
 0x9bc   : > { %p6239_p4 = scmp.ge.s32.totalorder %s7891_s0, 2 }
 0x9bd   : > { %s5174_s28 = sand.u32 1, %s7892_s21  }
 0x9be   : > { %p6236_p7 = pnand %p6239_p4, %p6663_p6  ;;  %s5175_s23 = scalar_lea.sflag [#allocation9], %s5174_s28 }
 0x9c0   : > { %p6237_p8 = pneg %p6236_p7 }
 0x9c2   : > { %6472 = dma.done.wait (%p6237_p8), %s5175_s23, 16  }
 0x9c3   : > { %6474 = vsyncadd (%p6237_p8), %s5175_s23, 4294967280  ;;  %s7894_s21 = sld [smem:[#allocation15_spill]]  ;;  %s7897_s0 = smov %s6481_s30 }
 0x9c4   : > { %s7895_s24 = sld [smem:[#allocation12_spill]] }
 0x9c5   : > { %s7896_s20 = sld [smem:[#allocation16_spill]] }
 0x9c9   : > { %p29_p9 = scmp.ge.s32.totalorder %s7894_s21, 4  }
 0x9ca   : > { %s7898_s30 = smov %s7895_s24 }
 0x9cb   :  { %31 = sbr.rel (!%p29_p9) target bundleno = 9 (0x9), region = 280 }
 0x9d0   :  { %5179 = vsyncpa [#allocation9], 1 }
 0x9d1   :  { %5181 = vsyncpa [#allocation9 + $0x1], 1 }

</bundles_post_ra>
